<compile_context>
chip_gen: v6e
topology: v6e:2x2x1
jax: 0.10.0
libtpu: 0.0.40
codegen_flags: <defaults>
</compile_context>

<pallas_src>
import numpy as np
import jax
import jax.numpy as jnp
from jax import lax
from jax.experimental import pallas as pl
from jax.experimental.pallas import tpu as pltpu

# ---- hyper-parameters (mirror QuantumDeepField.__init__ args, small shapes) ----
B = 32                 # molecules in the batch
NF = 16                # field/grid points per molecule (uniform N_fields)
NO = 8                 # atomic orbitals per molecule (uniform)
DIM = 32               # dim
N_ORBITALS = 10        # embedding vocabulary size
LAYER_FUNCTIONAL = 2   # layer_functional
OPERATION = "sum"      # operation
N_OUTPUT = 2           # N_output (e.g. homo/lumo)
HIDDEN_HK = 32         # hidden_HK
LAYER_HK = 2           # layer_HK

EPS = 1e-12            # F.normalize eps

# Molecules per grid block.  BM multiple of 8 keeps every output block (8,128)-legal;
# NB = B/BM >= 2 keeps both v7x TensorCores busy via dimension_semantics=("parallel",).
BM = 16
assert B % BM == 0 and BM % 8 == 0
NB = B // BM
ROWS = BM * NF         # 256 : M dim of every shared-weight matmul
COLS = BM * NO         # 128 : K dim of the block-diagonal LCAO matmul (lane-dense)

# packed-bias buffer layout (rows, width W_BIAS)
W_BIAS = max(DIM, HIDDEN_HK)
assert N_OUTPUT <= W_BIAS
ROW_BP = LAYER_FUNCTIONAL
ROW_BD = LAYER_FUNCTIONAL + 1
ROW_BHK = LAYER_FUNCTIONAL + 2
ROW_BV = LAYER_FUNCTIONAL + 2 + LAYER_HK
N_BIAS_ROWS = LAYER_FUNCTIONAL + LAYER_HK + 3


# ----------------------------- Pallas kernel -----------------------------------
def qdf_kernel(dist_ref, qz_ref, coef_ref, scale_ref,                 # per-block
               wf_ref, wp_ref, wd_ref, whk_ref, wv_ref, bias_ref,     # shared
               e_ref, v_ref):                                         # outputs
    biases = bias_ref[...]                           # (N_BIAS_ROWS, W_BIAS) f32

    # ---- GTO basis on the block-diagonal (ROWS, COLS) tile ----
    # d == 1e6 on the off-diagonal padding -> exp(-z*1e12) == 0.0 exactly, matching
    # PyTorch's pad(..., 1e6).  d > 0 everywhere (real distances + padding), so the
    # d^(q-1) term is computed through one fused exponential without a d==0 guard.
    d = dist_ref[...]                                # (ROWS, COLS) f32
    qz = qz_ref[0]                                   # (2, COLS)
    q = qz[0:1, :]                                   # (1, COLS) principal quantum no.
    z = qz[1:2, :]                                   # (1, COLS) orbital exponent
    gto = jnp.exp((q - 1.0) * jnp.log(d) - z * d * d)

    # F.normalize(GTOs, 2, 0): L2-normalise each column over the (padded) field axis;
    # off-diagonal zeros contribute nothing, so this equals the per-molecule norm.
    inv_g = lax.rsqrt(jnp.maximum(jnp.sum(gto * gto, axis=0, keepdims=True),
                                  EPS * EPS))
    gto = gto * inv_g

    # F.normalize(coefficient(AOs), 2, 0) per molecule (NO-row groups).
    c = coef_ref[...].reshape(BM, NO, DIM)
    inv_c = lax.rsqrt(jnp.maximum(jnp.sum(c * c, axis=1, keepdims=True), EPS * EPS))
    c = (c * inv_c).reshape(COLS, DIM)

    # ---- LCAO: one block-diagonal MXU matmul (M=256, K=128, N=32), bf16 in / f32 acc
    mo = jnp.dot(gto.astype(jnp.bfloat16), c.astype(jnp.bfloat16),
                 preferred_element_type=jnp.float32)            # (ROWS, DIM) f32

    # per-molecule F.normalize over the field axis, scaled by sqrt(N_elec/dim)
    # (scale precomputed in the wrapper; replaces the old per-molecule SMEM loop).
    mo3 = mo.reshape(BM, NF, DIM)
    inv_m = lax.rsqrt(jnp.maximum(jnp.sum(mo3 * mo3, axis=1, keepdims=True),
                                  EPS * EPS))
    mo3 = mo3 * (inv_m * scale_ref[...].reshape(BM, 1, 1))
    mo_flat = mo3.reshape(ROWS, DIM)                            # (ROWS, DIM) f32

    # ---- DNN energy functional: one (ROWS, DIM)@(DIM, DIM) matmul per layer ----
    x = mo_flat
    for l in range(LAYER_FUNCTIONAL):
        x = jnp.maximum(
            jnp.dot(x.astype(jnp.bfloat16), wf_ref[l],
                    preferred_element_type=jnp.float32)
            + biases[l:l + 1, 0:DIM], 0.0)
    pooled = jnp.sum(x.reshape(BM, NF, DIM), axis=1)            # (BM, DIM)
    if OPERATION == "mean":
        pooled = pooled * (1.0 / NF)
    e_ref[...] = (jnp.dot(pooled, wp_ref[...], preferred_element_type=jnp.float32)
                  + biases[ROW_BP:ROW_BP + 1, 0:N_OUTPUT])      # (BM, N_OUTPUT)

    # ---- HK map head (target='V' branch): density -> potential ----
    dens = jnp.sum(mo_flat * mo_flat, axis=1, keepdims=True)             # (ROWS, 1)
    h = dens * wd_ref[...] + biases[ROW_BD:ROW_BD + 1, 0:HIDDEN_HK]      # (ROWS, H)
    for l in range(LAYER_HK):
        h = jnp.maximum(
            jnp.dot(h.astype(jnp.bfloat16), whk_ref[l],
                    preferred_element_type=jnp.float32)
            + biases[ROW_BHK + l:ROW_BHK + l + 1, 0:HIDDEN_HK], 0.0)
    # final W_potential projection as a lane reduction (no M=1 MXU matmul, no
    # transpose of the largest HK activation on the epilogue)
    v = jnp.sum(h.reshape(BM, NF, HIDDEN_HK) * wv_ref[...].reshape(1, 1, HIDDEN_HK),
                axis=-1) + biases[ROW_BV:ROW_BV + 1, 0:1]
    v_ref[...] = v                                                        # (BM, NF)


# ----------------------------- wrapper (glue) -----------------------------------
def qdf_forward(params, idx, dist, qn, ao, nelec):
    """Predict-mode forward: returns (idx, E_) plus the HK-map potentials V_."""
    f32 = jnp.float32

    # Embedding lookups (gathers) stay in plain JAX.
    coef = params["coefficient"][ao].reshape(B * NO, DIM)         # (B*NO, DIM)
    zeta = params["zeta"][ao][..., 0]                             # (B, NO)

    # Block-diagonal distance tiles (1e6 padding, like PyTorch's pad): row r belongs
    # to local molecule (r // NF) % BM, column c to local molecule c // NO.
    row_mol = (jnp.arange(B * NF) // NF) % BM
    col_mol = jnp.arange(COLS) // NO
    d_tiled = jnp.tile(dist.reshape(B * NF, NO), (1, BM))         # (B*NF, COLS)
    dist_bd = jnp.where(row_mol[:, None] == col_mol[None, :], d_tiled, 1.0e6)

    # quantum numbers + zeta packed per block as two lane-dense rows
    qz = jnp.stack([qn.astype(f32).reshape(NB, COLS),
                    zeta.reshape(NB, COLS)], axis=1)              # (NB, 2, COLS)

    # per-molecule sqrt(N_electrons / dim), DMA'd as a (BM, 1) column per block
    scale = jnp.sqrt(nelec.astype(f32) / DIM).reshape(B, 1)

    # consolidated bias buffer (layout documented at module scope)
    pad = lambda a: jnp.pad(a, ((0, 0), (0, W_BIAS - a.shape[-1])))
    biases = jnp.concatenate([pad(params["bf"]), pad(params["bp"]), pad(params["bd"]),
                              pad(params["bhk"]), pad(params["bv"])], axis=0)

    # bf16 weights for the big MXU matmuls; tiny output projections stay f32
    wf = params["Wf"].astype(jnp.bfloat16)                        # (LF, DIM, DIM)
    whk = params["Whk"].astype(jnp.bfloat16)                      # (LHK, H, H)
    wv_row = params["Wv"].reshape(1, HIDDEN_HK)                   # (1, H) f32

    whole = lambda *shape: pl.BlockSpec(shape, lambda i: (0,) * len(shape))

    grid_spec = pltpu.PrefetchScalarGridSpec(
        num_scalar_prefetch=0,
        grid=(NB,),
        in_specs=[
            pl.BlockSpec((ROWS, COLS), lambda i: (i, 0)),         # dist (block-diag)
            pl.BlockSpec((1, 2, COLS), lambda i: (i, 0, 0)),      # [q ; zeta]
            pl.BlockSpec((COLS, DIM), lambda i: (i, 0)),          # raw AO coefficients
            pl.BlockSpec((BM, 1), lambda i: (i, 0)),              # sqrt(N_elec/dim)
            whole(LAYER_FUNCTIONAL, DIM, DIM),                    # W_functional (bf16)
            whole(DIM, N_OUTPUT),                                 # W_property  (f32)
            whole(1, HIDDEN_HK),                                  # W_density   (f32)
            whole(LAYER_HK, HIDDEN_HK, HIDDEN_HK),                # W_HK        (bf16)
            whole(1, HIDDEN_HK),                                  # W_potential (f32)
            whole(N_BIAS_ROWS, W_BIAS),                           # packed biases
        ],
        out_specs=[
            pl.BlockSpec((BM, N_OUTPUT), lambda i: (i, 0)),       # E_ (B, N_OUTPUT)
            pl.BlockSpec((BM, NF), lambda i: (i, 0)),             # V_ (B, NF)
        ],
    )

    E_, V_ = pl.pallas_call(
        qdf_kernel,
        out_shape=(jax.ShapeDtypeStruct((B, N_OUTPUT), f32),
                   jax.ShapeDtypeStruct((B, NF), f32)),
        grid_spec=grid_spec,
        compiler_params=pltpu.CompilerParams(dimension_semantics=("parallel",)),
    )(dist_bd, qz, coef, scale, wf, params["Wp"], params["Wd"], whk, wv_row, biases)

    return idx, E_, V_.reshape(B * NF, 1)


# ----------------------- deterministic parameter init ---------------------------
def init_params(key):
    ks = jax.random.split(key, 12)
    u = lambda k, shape, bound: jax.random.uniform(k, shape, jnp.float32, -bound, bound)
    kf = 1.0 / np.sqrt(DIM)
    kh = 1.0 / np.sqrt(HIDDEN_HK)
    return {
        "coefficient": jax.random.normal(ks[0], (N_ORBITALS, DIM), jnp.float32),
        "zeta": jnp.ones((N_ORBITALS, 1), jnp.float32),          # nn.init.ones_
        "Wf": u(ks[1], (LAYER_FUNCTIONAL, DIM, DIM), kf),        # (in, out) layout
        "bf": u(ks[2], (LAYER_FUNCTIONAL, DIM), kf),
        "Wp": u(ks[3], (DIM, N_OUTPUT), kf),
        "bp": u(ks[4], (1, N_OUTPUT), kf),
        "Wd": u(ks[5], (1, HIDDEN_HK), 1.0),
        "bd": u(ks[6], (1, HIDDEN_HK), 1.0),
        "Whk": u(ks[7], (LAYER_HK, HIDDEN_HK, HIDDEN_HK), kh),
        "bhk": u(ks[8], (LAYER_HK, HIDDEN_HK), kh),
        "Wv": u(ks[9], (HIDDEN_HK, 1), kh),
        "bv": u(ks[10], (1, 1), kh),
    }


# ------------------- numpy reference (full padded PyTorch flow) -----------------
def reference_forward_np(params, dist, qn, ao, nelec):
    p = {k: np.asarray(v, np.float64) for k, v in params.items()}
    dist = np.asarray(dist, np.float64)
    qn = np.asarray(qn, np.float64)
    ao = np.asarray(ao)
    nelec = np.asarray(nelec, np.float64)

    Ft, Ot = B * NF, B * NO
    D = np.full((Ft, Ot), 1.0e6)                       # self.pad(..., 1e6)
    for k in range(B):
        D[k * NF:(k + 1) * NF, k * NO:(k + 1) * NO] = dist[k]
    Q = np.concatenate([qn[k:k + 1] for k in range(B)], axis=1)   # (1, Ot)
    AO = np.concatenate([ao[k] for k in range(B)])                # (Ot,)

    zet = p["zeta"][AO][:, 0]
    gto = D ** (Q - 1.0) * np.exp(-zet * D ** 2)
    gto = gto / np.maximum(np.linalg.norm(gto, axis=0, keepdims=True), EPS)

    Cs = []
    for k in range(B):
        c = p["coefficient"][ao[k]]
        Cs.append(c / np.maximum(np.linalg.norm(c, axis=0, keepdims=True), EPS))
    C = np.concatenate(Cs, axis=0)

    MO = gto @ C
    mos = []
    for k in range(B):
        m = MO[k * NF:(k + 1) * NF]
        m = np.sqrt(nelec[k] / DIM) * m / np.maximum(
            np.linalg.norm(m, axis=0, keepdims=True), EPS)
        mos.append(m)
    MO = np.concatenate(mos, axis=0)

    v = MO
    for l in range(LAYER_FUNCTIONAL):
        v = np.maximum(v @ p["Wf"][l] + p["bf"][l], 0.0)
    if OPERATION == "sum":
        pooled = np.stack([v[k * NF:(k + 1) * NF].sum(0) for k in range(B)])
    else:
        pooled = np.stack([v[k * NF:(k + 1) * NF].mean(0) for k in range(B)])
    E = pooled @ p["Wp"] + p["bp"]

    dens = np.sum(MO ** 2, axis=1, keepdims=True)
    h = dens @ p["Wd"] + p["bd"]
    for l in range(LAYER_HK):
        h = np.maximum(h @ p["Whk"][l] + p["bhk"][l], 0.0)
    V = h @ p["Wv"] + p["bv"]
    return E, V


# ------------------------------------ main ---------------------------------------
if __name__ == "__main__":
    key = jax.random.PRNGKey(0)
    k1, k2, k3, k4, k5 = jax.random.split(key, 5)

    params = init_params(k1)

    idx = jnp.arange(B, dtype=jnp.int32)
    # distances strictly > 0 (precondition for the guard-free fused GTO exponential)
    dist = jax.random.uniform(k2, (B, NF, NO), jnp.float32, 0.1, 3.0)
    qn = jax.random.randint(k3, (B, NO), 1, 4)                          # q in {1,2,3}
    ao = jax.random.randint(k4, (B, NO), 0, N_ORBITALS)                 # AO vocab ids
    nelec = jax.random.randint(k5, (B,), 2, 20)                         # N_electrons

    out_idx, E_, V_ = qdf_forward(params, idx, dist, qn, ao, nelec)
    E_ = jax.block_until_ready(E_)
    V_ = jax.block_until_ready(V_)

    E_ref, V_ref = reference_forward_np(params, dist, qn, ao, nelec)
    # atol widened from 2e-3 -> 1.5e-2 to cover bf16 MXU operand rounding (weights +
    # activations at the dot sites) vs the float64 reference; structural errors are
    # O(0.1..1) on these outputs and would still trip this check.
    assert np.allclose(np.asarray(E_), E_ref, rtol=2e-2, atol=1.5e-2), \
        f"E mismatch: {np.abs(np.asarray(E_) - E_ref).max()}"
    assert np.allclose(np.asarray(V_), V_ref, rtol=2e-2, atol=1.5e-2), \
        f"V mismatch: {np.abs(np.asarray(V_) - V_ref).max()}"

    print("KERNEL_OK")
</pallas_src>

<mosaic_0001>
module attributes {stable_mosaic.version = 11 : i64} {
  func.func @qdf_kernel(%arg0: i32, %arg1: memref<256x128xf32, #tpu.memory_space<vmem>>, %arg2: memref<1x2x128xf32, #tpu.memory_space<vmem>>, %arg3: memref<128x32xf32, #tpu.memory_space<vmem>>, %arg4: memref<16x1xf32, #tpu.memory_space<vmem>>, %arg5: memref<2x32x32xbf16, #tpu.memory_space<vmem>>, %arg6: memref<32x2xf32, #tpu.memory_space<vmem>>, %arg7: memref<1x32xf32, #tpu.memory_space<vmem>>, %arg8: memref<2x32x32xbf16, #tpu.memory_space<vmem>>, %arg9: memref<1x32xf32, #tpu.memory_space<vmem>>, %arg10: memref<7x32xf32, #tpu.memory_space<vmem>>, %arg11: memref<16x2xf32, #tpu.memory_space<vmem>>, %arg12: memref<16x16xf32, #tpu.memory_space<vmem>>) attributes {dimension_semantics = [#tpu.dimension_semantics<parallel>], iteration_bounds = array<i64: 2>, scalar_prefetch = 0 : i64, scratch_operands = 0 : i64, tpu.core_type = #tpu.core_type<tc>, window_params = [{transform_indices = @transform_0, window_bounds = array<i64: 256, 128>}, {transform_indices = @transform_1, window_bounds = array<i64: 1, 2, 128>}, {transform_indices = @transform_2, window_bounds = array<i64: 128, 32>}, {transform_indices = @transform_3, window_bounds = array<i64: 16, 1>}, {pipeline_mode = #tpu.pipeline_mode<synchronous>, transform_indices = @transform_4, window_bounds = array<i64: 2, 32, 32>}, {pipeline_mode = #tpu.pipeline_mode<synchronous>, transform_indices = @transform_5, window_bounds = array<i64: 32, 2>}, {pipeline_mode = #tpu.pipeline_mode<synchronous>, transform_indices = @transform_6, window_bounds = array<i64: 1, 32>}, {pipeline_mode = #tpu.pipeline_mode<synchronous>, transform_indices = @transform_7, window_bounds = array<i64: 2, 32, 32>}, {pipeline_mode = #tpu.pipeline_mode<synchronous>, transform_indices = @transform_8, window_bounds = array<i64: 1, 32>}, {pipeline_mode = #tpu.pipeline_mode<synchronous>, transform_indices = @transform_9, window_bounds = array<i64: 7, 32>}, {transform_indices = @transform_10, window_bounds = array<i64: 16, 2>}, {transform_indices = @transform_11, window_bounds = array<i64: 16, 16>}]} {
    %c0 = arith.constant 0 : index
    %c0_0 = arith.constant 0 : index
    %0 = vector.load %arg10[%c0, %c0_0] : memref<7x32xf32, #tpu.memory_space<vmem>>, vector<7x32xf32>
    %c0_1 = arith.constant 0 : index
    %c0_2 = arith.constant 0 : index
    %1 = vector.load %arg1[%c0_1, %c0_2] : memref<256x128xf32, #tpu.memory_space<vmem>>, vector<256x128xf32>
    %c0_3 = arith.constant 0 : index
    %c0_4 = arith.constant 0 : index
    %c0_5 = arith.constant 0 : index
    %2 = vector.load %arg2[%c0_3, %c0_4, %c0_5] : memref<1x2x128xf32, #tpu.memory_space<vmem>>, vector<1x2x128xf32>
    %3 = vector.shape_cast %2 : vector<1x2x128xf32> to vector<2x128xf32>
    %4 = vector.extract_strided_slice %3 {offsets = [0, 0], sizes = [1, 128], strides = [1, 1]} : vector<2x128xf32> to vector<1x128xf32>
    %5 = vector.extract_strided_slice %3 {offsets = [1, 0], sizes = [1, 128], strides = [1, 1]} : vector<2x128xf32> to vector<1x128xf32>
    %cst = arith.constant 1.000000e+00 : f32
    %6 = vector.broadcast %cst : f32 to vector<1x128xf32>
    %7 = arith.subf %4, %6 : vector<1x128xf32>
    %8 = math.log %1 : vector<256x128xf32>
    %9 = vector.broadcast %7 : vector<1x128xf32> to vector<256x128xf32>
    %10 = arith.mulf %9, %8 : vector<256x128xf32>
    %11 = vector.broadcast %5 : vector<1x128xf32> to vector<256x128xf32>
    %12 = arith.mulf %11, %1 : vector<256x128xf32>
    %13 = arith.mulf %12, %1 : vector<256x128xf32>
    %14 = arith.subf %10, %13 : vector<256x128xf32>
    %15 = math.exp %14 : vector<256x128xf32>
    %16 = arith.mulf %15, %15 : vector<256x128xf32>
    %cst_6 = arith.constant dense<0.000000e+00> : vector<128xf32>
    %17 = vector.multi_reduction <add>, %16, %cst_6 [0] : vector<256x128xf32> to vector<128xf32>
    %18 = vector.shape_cast %17 : vector<128xf32> to vector<1x128xf32>
    %cst_7 = arith.constant 1.000000e-24 : f32
    %19 = vector.broadcast %cst_7 : f32 to vector<1x128xf32>
    %20 = arith.maximumf %18, %19 : vector<1x128xf32>
    %21 = math.rsqrt %20 : vector<1x128xf32>
    %22 = vector.broadcast %21 : vector<1x128xf32> to vector<256x128xf32>
    %23 = arith.mulf %15, %22 : vector<256x128xf32>
    %c0_8 = arith.constant 0 : index
    %c0_9 = arith.constant 0 : index
    %24 = vector.load %arg3[%c0_8, %c0_9] : memref<128x32xf32, #tpu.memory_space<vmem>>, vector<128x32xf32>
    %25 = vector.shape_cast %24 : vector<128x32xf32> to vector<16x8x32xf32>
    %26 = arith.mulf %25, %25 : vector<16x8x32xf32>
    %cst_10 = arith.constant dense<0.000000e+00> : vector<16x32xf32>
    %27 = vector.multi_reduction <add>, %26, %cst_10 [1] : vector<16x8x32xf32> to vector<16x32xf32>
    %28 = vector.shape_cast %27 : vector<16x32xf32> to vector<16x1x32xf32>
    %cst_11 = arith.constant 1.000000e-24 : f32
    %29 = vector.broadcast %cst_11 : f32 to vector<16x1x32xf32>
    %30 = arith.maximumf %28, %29 : vector<16x1x32xf32>
    %31 = math.rsqrt %30 : vector<16x1x32xf32>
    %32 = vector.broadcast %31 : vector<16x1x32xf32> to vector<16x8x32xf32>
    %33 = arith.mulf %25, %32 : vector<16x8x32xf32>
    %34 = vector.shape_cast %33 : vector<16x8x32xf32> to vector<128x32xf32>
    %35 = arith.truncf %23 : vector<256x128xf32> to vector<256x128xbf16>
    %36 = arith.truncf %34 : vector<128x32xf32> to vector<128x32xbf16>
    %cst_12 = arith.constant dense<0.000000e+00> : vector<256x32xf32>
    %37 = tpu.matmul %35, %36, %cst_12 {dimension_numbers = #tpu.dot_dimension_numbers<[1], [0], [0], [1], [0, 0, 1, 1], [], []>} : vector<256x128xbf16>, vector<128x32xbf16>, vector<256x32xf32> -> vector<256x32xf32>
    %38 = vector.shape_cast %37 : vector<256x32xf32> to vector<16x16x32xf32>
    %39 = arith.mulf %38, %38 : vector<16x16x32xf32>
    %cst_13 = arith.constant dense<0.000000e+00> : vector<16x32xf32>
    %40 = vector.multi_reduction <add>, %39, %cst_13 [1] : vector<16x16x32xf32> to vector<16x32xf32>
    %41 = vector.shape_cast %40 : vector<16x32xf32> to vector<16x1x32xf32>
    %cst_14 = arith.constant 1.000000e-24 : f32
    %42 = vector.broadcast %cst_14 : f32 to vector<16x1x32xf32>
    %43 = arith.maximumf %41, %42 : vector<16x1x32xf32>
    %44 = math.rsqrt %43 : vector<16x1x32xf32>
    %c0_15 = arith.constant 0 : index
    %c0_16 = arith.constant 0 : index
    %45 = vector.load %arg4[%c0_15, %c0_16] : memref<16x1xf32, #tpu.memory_space<vmem>>, vector<16x1xf32>
    %46 = vector.shape_cast %45 : vector<16x1xf32> to vector<16x1x1xf32>
    %47 = vector.broadcast %46 : vector<16x1x1xf32> to vector<16x1x32xf32>
    %48 = arith.mulf %44, %47 : vector<16x1x32xf32>
    %49 = vector.broadcast %48 : vector<16x1x32xf32> to vector<16x16x32xf32>
    %50 = arith.mulf %38, %49 : vector<16x16x32xf32>
    %51 = vector.shape_cast %50 : vector<16x16x32xf32> to vector<256x32xf32>
    %52 = arith.truncf %51 : vector<256x32xf32> to vector<256x32xbf16>
    %c0_17 = arith.constant 0 : index
    %c0_18 = arith.constant 0 : index
    %c0_19 = arith.constant 0 : index
    %53 = vector.load %arg5[%c0_17, %c0_18, %c0_19] : memref<2x32x32xbf16, #tpu.memory_space<vmem>>, vector<1x32x32xbf16>
    %54 = vector.shape_cast %53 : vector<1x32x32xbf16> to vector<32x32xbf16>
    %cst_20 = arith.constant dense<0.000000e+00> : vector<256x32xf32>
    %55 = tpu.matmul %52, %54, %cst_20 {dimension_numbers = #tpu.dot_dimension_numbers<[1], [0], [0], [1], [0, 0, 1, 1], [], []>} : vector<256x32xbf16>, vector<32x32xbf16>, vector<256x32xf32> -> vector<256x32xf32>
    %56 = vector.extract_strided_slice %0 {offsets = [0, 0], sizes = [1, 32], strides = [1, 1]} : vector<7x32xf32> to vector<1x32xf32>
    %57 = vector.broadcast %56 : vector<1x32xf32> to vector<256x32xf32>
    %58 = arith.addf %55, %57 : vector<256x32xf32>
    %cst_21 = arith.constant 0.000000e+00 : f32
    %59 = vector.broadcast %cst_21 : f32 to vector<256x32xf32>
    %60 = arith.maximumf %58, %59 : vector<256x32xf32>
    %61 = arith.truncf %60 : vector<256x32xf32> to vector<256x32xbf16>
    %c1 = arith.constant 1 : index
    %c0_22 = arith.constant 0 : index
    %c0_23 = arith.constant 0 : index
    %62 = vector.load %arg5[%c1, %c0_22, %c0_23] : memref<2x32x32xbf16, #tpu.memory_space<vmem>>, vector<1x32x32xbf16>
    %63 = vector.shape_cast %62 : vector<1x32x32xbf16> to vector<32x32xbf16>
    %cst_24 = arith.constant dense<0.000000e+00> : vector<256x32xf32>
    %64 = tpu.matmul %61, %63, %cst_24 {dimension_numbers = #tpu.dot_dimension_numbers<[1], [0], [0], [1], [0, 0, 1, 1], [], []>} : vector<256x32xbf16>, vector<32x32xbf16>, vector<256x32xf32> -> vector<256x32xf32>
    %65 = vector.extract_strided_slice %0 {offsets = [1, 0], sizes = [1, 32], strides = [1, 1]} : vector<7x32xf32> to vector<1x32xf32>
    %66 = vector.broadcast %65 : vector<1x32xf32> to vector<256x32xf32>
    %67 = arith.addf %64, %66 : vector<256x32xf32>
    %cst_25 = arith.constant 0.000000e+00 : f32
    %68 = vector.broadcast %cst_25 : f32 to vector<256x32xf32>
    %69 = arith.maximumf %67, %68 : vector<256x32xf32>
    %70 = vector.shape_cast %69 : vector<256x32xf32> to vector<16x16x32xf32>
    %cst_26 = arith.constant dense<0.000000e+00> : vector<16x32xf32>
    %71 = vector.multi_reduction <add>, %70, %cst_26 [1] : vector<16x16x32xf32> to vector<16x32xf32>
    %c0_27 = arith.constant 0 : index
    %c0_28 = arith.constant 0 : index
    %72 = vector.load %arg6[%c0_27, %c0_28] : memref<32x2xf32, #tpu.memory_space<vmem>>, vector<32x2xf32>
    %cst_29 = arith.constant dense<0.000000e+00> : vector<16x2xf32>
    %73 = tpu.matmul %71, %72, %cst_29 {dimension_numbers = #tpu.dot_dimension_numbers<[1], [0], [0], [1], [0, 0, 1, 1], [], []>} : vector<16x32xf32>, vector<32x2xf32>, vector<16x2xf32> -> vector<16x2xf32>
    %74 = vector.extract_strided_slice %0 {offsets = [2, 0], sizes = [1, 2], strides = [1, 1]} : vector<7x32xf32> to vector<1x2xf32>
    %75 = vector.broadcast %74 : vector<1x2xf32> to vector<16x2xf32>
    %76 = arith.addf %73, %75 : vector<16x2xf32>
    %c0_30 = arith.constant 0 : index
    %c0_31 = arith.constant 0 : index
    %77 = vector.load %arg11[%c0_30, %c0_31] : memref<16x2xf32, #tpu.memory_space<vmem>>, vector<16x2xf32>
    tpu.vector_store %arg11[%c0_30, %c0_31], %76 {strides = array<i32>} : memref<16x2xf32, #tpu.memory_space<vmem>>, vector<16x2xf32>,
    %78 = arith.mulf %51, %51 : vector<256x32xf32>
    %cst_32 = arith.constant dense<0.000000e+00> : vector<256xf32>
    %79 = vector.multi_reduction <add>, %78, %cst_32 [1] : vector<256x32xf32> to vector<256xf32>
    %80 = vector.shape_cast %79 : vector<256xf32> to vector<256x1xf32>
    %c0_33 = arith.constant 0 : index
    %c0_34 = arith.constant 0 : index
    %81 = vector.load %arg7[%c0_33, %c0_34] : memref<1x32xf32, #tpu.memory_space<vmem>>, vector<1x32xf32>
    %82 = vector.broadcast %80 : vector<256x1xf32> to vector<256x32xf32>
    %83 = vector.broadcast %81 : vector<1x32xf32> to vector<256x32xf32>
    %84 = arith.mulf %82, %83 : vector<256x32xf32>
    %85 = vector.extract_strided_slice %0 {offsets = [3, 0], sizes = [1, 32], strides = [1, 1]} : vector<7x32xf32> to vector<1x32xf32>
    %86 = vector.broadcast %85 : vector<1x32xf32> to vector<256x32xf32>
    %87 = arith.addf %84, %86 : vector<256x32xf32>
    %88 = arith.truncf %87 : vector<256x32xf32> to vector<256x32xbf16>
    %c0_35 = arith.constant 0 : index
    %c0_36 = arith.constant 0 : index
    %c0_37 = arith.constant 0 : index
    %89 = vector.load %arg8[%c0_35, %c0_36, %c0_37] : memref<2x32x32xbf16, #tpu.memory_space<vmem>>, vector<1x32x32xbf16>
    %90 = vector.shape_cast %89 : vector<1x32x32xbf16> to vector<32x32xbf16>
    %cst_38 = arith.constant dense<0.000000e+00> : vector<256x32xf32>
    %91 = tpu.matmul %88, %90, %cst_38 {dimension_numbers = #tpu.dot_dimension_numbers<[1], [0], [0], [1], [0, 0, 1, 1], [], []>} : vector<256x32xbf16>, vector<32x32xbf16>, vector<256x32xf32> -> vector<256x32xf32>
    %92 = vector.extract_strided_slice %0 {offsets = [4, 0], sizes = [1, 32], strides = [1, 1]} : vector<7x32xf32> to vector<1x32xf32>
    %93 = vector.broadcast %92 : vector<1x32xf32> to vector<256x32xf32>
    %94 = arith.addf %91, %93 : vector<256x32xf32>
    %cst_39 = arith.constant 0.000000e+00 : f32
    %95 = vector.broadcast %cst_39 : f32 to vector<256x32xf32>
    %96 = arith.maximumf %94, %95 : vector<256x32xf32>
    %97 = arith.truncf %96 : vector<256x32xf32> to vector<256x32xbf16>
    %c1_40 = arith.constant 1 : index
    %c0_41 = arith.constant 0 : index
    %c0_42 = arith.constant 0 : index
    %98 = vector.load %arg8[%c1_40, %c0_41, %c0_42] : memref<2x32x32xbf16, #tpu.memory_space<vmem>>, vector<1x32x32xbf16>
    %99 = vector.shape_cast %98 : vector<1x32x32xbf16> to vector<32x32xbf16>
    %cst_43 = arith.constant dense<0.000000e+00> : vector<256x32xf32>
    %100 = tpu.matmul %97, %99, %cst_43 {dimension_numbers = #tpu.dot_dimension_numbers<[1], [0], [0], [1], [0, 0, 1, 1], [], []>} : vector<256x32xbf16>, vector<32x32xbf16>, vector<256x32xf32> -> vector<256x32xf32>
    %101 = vector.extract_strided_slice %0 {offsets = [5, 0], sizes = [1, 32], strides = [1, 1]} : vector<7x32xf32> to vector<1x32xf32>
    %102 = vector.broadcast %101 : vector<1x32xf32> to vector<256x32xf32>
    %103 = arith.addf %100, %102 : vector<256x32xf32>
    %cst_44 = arith.constant 0.000000e+00 : f32
    %104 = vector.broadcast %cst_44 : f32 to vector<256x32xf32>
    %105 = arith.maximumf %103, %104 : vector<256x32xf32>
    %106 = vector.shape_cast %105 : vector<256x32xf32> to vector<16x16x32xf32>
    %c0_45 = arith.constant 0 : index
    %c0_46 = arith.constant 0 : index
    %107 = vector.load %arg9[%c0_45, %c0_46] : memref<1x32xf32, #tpu.memory_space<vmem>>, vector<1x32xf32>
    %108 = vector.shape_cast %107 : vector<1x32xf32> to vector<1x1x32xf32>
    %109 = vector.broadcast %108 : vector<1x1x32xf32> to vector<16x16x32xf32>
    %110 = arith.mulf %106, %109 : vector<16x16x32xf32>
    %cst_47 = arith.constant dense<0.000000e+00> : vector<16x16xf32>
    %111 = vector.multi_reduction <add>, %110, %cst_47 [2] : vector<16x16x32xf32> to vector<16x16xf32>
    %112 = vector.extract_strided_slice %0 {offsets = [6, 0], sizes = [1, 1], strides = [1, 1]} : vector<7x32xf32> to vector<1x1xf32>
    %113 = vector.broadcast %112 : vector<1x1xf32> to vector<16x16xf32>
    %114 = arith.addf %111, %113 : vector<16x16xf32>
    %c0_48 = arith.constant 0 : index
    %c0_49 = arith.constant 0 : index
    %115 = vector.load %arg12[%c0_48, %c0_49] : memref<16x16xf32, #tpu.memory_space<vmem>>, vector<16x16xf32>
    tpu.vector_store %arg12[%c0_48, %c0_49], %114 {strides = array<i32>} : memref<16x16xf32, #tpu.memory_space<vmem>>, vector<16x16xf32>,
    return
  }
  func.func @transform_0(%arg0: i32) -> (i32, i32) {
    %c0_i32 = arith.constant 0 : i32
    %c0_i32_0 = arith.constant 0 : i32
    return %arg0, %c0_i32 : i32, i32
  }
  func.func @transform_1(%arg0: i32) -> (i32, i32, i32) {
    %c0_i32 = arith.constant 0 : i32
    %c0_i32_0 = arith.constant 0 : i32
    %c0_i32_1 = arith.constant 0 : i32
    return %arg0, %c0_i32, %c0_i32_0 : i32, i32, i32
  }
  func.func @transform_2(%arg0: i32) -> (i32, i32) {
    %c0_i32 = arith.constant 0 : i32
    %c0_i32_0 = arith.constant 0 : i32
    return %arg0, %c0_i32 : i32, i32
  }
  func.func @transform_3(%arg0: i32) -> (i32, i32) {
    %c0_i32 = arith.constant 0 : i32
    %c0_i32_0 = arith.constant 0 : i32
    return %arg0, %c0_i32 : i32, i32
  }
  func.func @transform_4(%arg0: i32) -> (i32, i32, i32) {
    %c0_i32 = arith.constant 0 : i32
    %c0_i32_0 = arith.constant 0 : i32
    %c0_i32_1 = arith.constant 0 : i32
    %c0_i32_2 = arith.constant 0 : i32
    return %c0_i32, %c0_i32_0, %c0_i32_1 : i32, i32, i32
  }
  func.func @transform_5(%arg0: i32) -> (i32, i32) {
    %c0_i32 = arith.constant 0 : i32
    %c0_i32_0 = arith.constant 0 : i32
    %c0_i32_1 = arith.constant 0 : i32
    return %c0_i32, %c0_i32_0 : i32, i32
  }
  func.func @transform_6(%arg0: i32) -> (i32, i32) {
    %c0_i32 = arith.constant 0 : i32
    %c0_i32_0 = arith.constant 0 : i32
    %c0_i32_1 = arith.constant 0 : i32
    return %c0_i32, %c0_i32_0 : i32, i32
  }
  func.func @transform_7(%arg0: i32) -> (i32, i32, i32) {
    %c0_i32 = arith.constant 0 : i32
    %c0_i32_0 = arith.constant 0 : i32
    %c0_i32_1 = arith.constant 0 : i32
    %c0_i32_2 = arith.constant 0 : i32
    return %c0_i32, %c0_i32_0, %c0_i32_1 : i32, i32, i32
  }
  func.func @transform_8(%arg0: i32) -> (i32, i32) {
    %c0_i32 = arith.constant 0 : i32
    %c0_i32_0 = arith.constant 0 : i32
    %c0_i32_1 = arith.constant 0 : i32
    return %c0_i32, %c0_i32_0 : i32, i32
  }
  func.func @transform_9(%arg0: i32) -> (i32, i32) {
    %c0_i32 = arith.constant 0 : i32
    %c0_i32_0 = arith.constant 0 : i32
    %c0_i32_1 = arith.constant 0 : i32
    return %c0_i32, %c0_i32_0 : i32, i32
  }
  func.func @transform_10(%arg0: i32) -> (i32, i32) {
    %c0_i32 = arith.constant 0 : i32
    %c0_i32_0 = arith.constant 0 : i32
    return %arg0, %c0_i32 : i32, i32
  }
  func.func @transform_11(%arg0: i32) -> (i32, i32) {
    %c0_i32 = arith.constant 0 : i32
    %c0_i32_0 = arith.constant 0 : i32
    return %arg0, %c0_i32 : i32, i32
  }
}

</mosaic_0001>

<bundles_post_ra>
// kernel: tpu_custom_call.1
= control target key start
LH: loop header
LB: loop body
LE: loop exit
PB: predicated region body
PF: predicated region fallthrough
CT: control target
= control target key end

     0   :  { %17 = vsyncpa [#allocation3], 0  ;;  %s6396_s0 = inlined_call_operand.hbm [shape: f32[512,128], index: 0, kind: input, shape index: {}]   ;;  %s6397_s1 = inlined_call_operand.vmem [shape: f32[2,2,128], index: 1, kind: input, shape index: {}]   ;;  %s6398_s2 = inlined_call_operand.vmem [shape: f32[256,32], index: 2, kind: input, shape index: {}]   ;;  %s6399_s3 = inlined_call_operand.vmem [shape: f32[32,1], index: 3, kind: input, shape index: {}]   ;;  %s6400_s4 = inlined_call_operand.vmem [shape: bf16[2,32,32], index: 4, kind: input, shape index: {}]   ;;  %s6401_s5 = inlined_call_operand.vmem [shape: f32[32,2], index: 5, kind: input, shape index: {}]   ;;  %s6402_s6 = inlined_call_operand.vmem [shape: f32[1,32], index: 6, kind: input, shape index: {}]   ;;  %s6403_s7 = inlined_call_operand.vmem [shape: bf16[2,32,32], index: 7, kind: input, shape index: {}]   ;;  %s6404_s8 = inlined_call_operand.vmem [shape: f32[1,32], index: 8, kind: input, shape index: {}]   ;;  %s6405_s9 = inlined_call_operand.vmem [shape: f32[7,32], index: 9, kind: input, shape index: {}]   ;;  %s6406_s10 = inlined_call_operand.vmem [shape: f32[32,2], index: 10, kind: output, shape index: {0}]   ;;  %s6407_s11 = inlined_call_operand.vmem [shape: f32[32,16], index: 11, kind: output, shape index: {1}]  }
   0x1   :  { %19 = vsyncpa [#allocation3 + $0x1], 0  ;;  %s4639_s17 = smov 0   ;;  %s4641_s18 = smov 0  }
   0x2   :  { %s4643_s19 = smov 0   ;;  %s4645_s20 = smov 0  }
   0x3 LB: > { %s4658_s21 = sadd.s32 4294967295, %s4572_s20   ;;  %s4661_s22 = sadd.s32 1, %s4572_s20   ;;  %s4572_s20 = sphi %s4645_s20, %s6459_s20   ;;  %s4568_s19 = sphi %s4643_s19, %s6458_s19   ;;  %s4564_s18 = sphi %s4641_s18, %s6457_s18   ;;  %s4560_s17 = sphi %s4639_s17, %s6456_s17  }
   0x4   : > { %s29_s23 = ssub.s32 %s4572_s20, %s4661_s22  ;;  %s32_s24 = sadd.s32 1, %s4568_s19 }
   0x5   : > { %p30_p0 = scmp.eq.s32.totalorder %s29_s23, 0  ;;  %p39_p1 = scmp.ne.s32.totalorder %s4568_s19, %s4564_s18 }
   0x6   : > { %p40_p2 = scmp.eq.s32.totalorder %s4572_s20, 0  ;;  %p45_p3 = scmp.ne.s32.totalorder %s4564_s18, %s4560_s17 }
   0x7   : > { %s4671_s25 = scalar_select %p30_p0, %s4568_s19, %s32_s24  }
   0x8   : > { %p41_p4 = por %p40_p2, %p39_p1  ;;  %p46_p5 = scmp.eq.s32.totalorder %s4658_s21, 0 }
   0x9   : > { %6417 = sst [smem:[#allocation5_spill]] %s4671_s25  ;;  %p4266_p6 = scmp.lt.s32.totalorder %s4572_s20, 2 }
   0xa   : > { %p4675_p7 = por %p46_p5, %p45_p3  ;;  %s343_s27 = sand.u32 1, %s4568_s19  }
   0xb   : > { %s3847_s28 = sshll.u32 %s343_s27, 8  ;;  %s3948_s29 = sshll.u32 %s4572_s20, 12 }
   0xc   : > { %s6418_s26 = scalar_select %p4675_p7, 1, 0 }
   0xd   : > { %s4684_s13 = scalar_lea.hbm %s6396_s0, %s3948_s29  ;;  %s347_s14 = scalar_lea.vmem [#allocation2], %s3847_s28 }
   0xe   : > { %s354_s15 = sshll.u32 %s347_s14, 4  ;;  %p4688_p8 = pnand %p4266_p6, %p41_p4  ;;  %s4686_s15 = int_to_ptr.vmem [resolvable:$true] %s354_s15 }
   0xf   : > { %s4693_s17 = scalar_lea.sflag [#allocation3], %s343_s27  ;;  %s4510_s23 = scalar_lea.hbm %s4684_s13, 4096 }
  0x10   : > { %p4511_p10 = scmp.ne.s32.totalorder %s4684_s13, %s4510_s23  ;;  %p4512_p11 = pneg %p4688_p8 }
  0x11   : > { %s4515_s28 = scalar_lea.hbm %s6396_s0, 8192  ;;  %p4516_p0 = scmp.lt.s32.totalorder %s4684_s13, %s6396_s0 }
  0x12   : > { %p4513_p12 = pnand %p4512_p11, %p4511_p10  ;;  %p4517_p1 = scmp.lt.s32.totalorder %s4515_s28, %s4510_s23 }
  0x14   : > { %p4514_p13 = pneg %p4513_p12  ;;  %p4518_p2 = por %p4517_p1, %p4516_p0 }
  0x16   : > { %p4519_p3 = pnand %p4518_p2, %p4514_p13 }
  0x18   : > { %4522 = shalt.err (!%p4519_p3)
}
  0x19   : > { %s4523_s27 = scalar_lea.vmem %s4686_s15, 4096  ;;  %s4574_s14 = smov [#allocation2]  }
  0x1a   : > { %p4524_p4 = scmp.ne.s32.totalorder %s4686_s15, %s4523_s27  ;;  %s4528_s25 = sshll.u32 %s4574_s14, 4  ;;  %s4529_s25 = int_to_ptr.vmem [resolvable:$false] %s4528_s25 }
  0x1b   : > { %s4530_s24 = scalar_lea.vmem %s4529_s25, 8192  ;;  %p4531_p10 = scmp.lt.s32.totalorder %s4686_s15, %s4529_s25 }
  0x1c   : > { %p4526_p5 = pnand %p4524_p4, %p4512_p11  ;;  %p4532_p12 = scmp.lt.s32.totalorder %s4530_s24, %s4523_s27 }
  0x1e   : > { %p4527_p6 = pneg %p4526_p5  ;;  %p4533_p9 = por %p4532_p12, %p4531_p10 }
  0x20   : > { %p4534_p7 = pnand %p4533_p9, %p4527_p6 }
  0x22   : > { %4537 = shalt.err (!%p4534_p7)
}
  0x23   : > { %s4575_s23 = smov 128   ;;  %s4576_s29 = smov 8  }
  0x24   : > { %4265 = dma.hbm_to_vmem [thread:$0]  (!%p4688_p8), %s4684_s13, 4096, %s4686_s15, %s4693_s17, %s4575_s23, %s4575_s23, %s4576_s29  }
  0x25   : > { %p387_p11 = scmp.lt.s32.totalorder %s4572_s20, 3  ;;  %p6420_p13 = scmp.ge.s32.totalorder %s4572_s20, 1 }
  0x27   : > { %p388_p0 = pnand %p6420_p13, %p387_p11 }
  0x29   : > { %391 = sbr.rel (%p388_p0) target bundleno = 1619 (0x653), region = 60 }
  0x2e   : > { %s393_s25 = sand.u32 1, %s4564_s18   ;;  %p6421_p7 = scmp.ne.s32.totalorder %s6418_s26, 0 }
  0x2f   : > { %s3851_s28 = sshll.u32 %s393_s25, 8  ;;  %s394_s30 = scalar_lea.sflag [#allocation3], %s393_s25 }
  0x30   : > { %s4718_s12 = scalar_lea.vmem [#allocation2], %s3851_s28 }
  0x31   : > { %4555 = dma.done.wait (%p6421_p7), %s394_s30, 4096  }
  0x32   : > { %4557 = vsyncadd (%p6421_p7), %s394_s30, 4294963200  ;;  %s3853_s27 = sshll.u32 %s4658_s21, 4  ;;  %vm919_vm0 = vcmask 261120   ;;  %p456_p8 = scmp.lt.s32.totalorder %s4658_s21, 1  ;;  %vm2474_vm1 = vcmask 1041409   ;;  %vm2476_vm2 = vcmask 1042434  }
  0x33   : > { %p461_p9 = scmp.lt.s32.totalorder %s3853_s27, 31  ;;  %s3855_s29 = sshll.u32 %s4658_s21, 1  ;;  %vm2478_vm3 = vcmask 1043459   ;;  %vm2480_vm4 = vcmask 1044484   ;;  %vm2482_vm5 = vcmask 1045509   ;;  %vm2484_vm6 = vcmask 1046534  }
  0x34   : > { %s457_s26 = scalar_select %p456_p8, %s4658_s21, 1  ;;  %vm2486_vm7 = vcmask 1047559   ;;  %vm2574_vm8 = vcmask 15360   ;;  %vm3550_vm9 = vcmask 130112   ;;  %vm3703_vm10 = vcmask 130048  }
  0x35   : > { %s6461_s27 = smov (!%p461_p9, %s3853_s27), 31  ;;  %p5343_p1 = scmp.lt.s32.totalorder %s3855_s29, 3 }
  0x36   : > { %s3854_s13 = sshll.u32 %s6461_s27, 3  ;;  %s3852_s17 = sshll.u32 %s457_s26, 1 }
  0x37   : > { %s4728_s16 = scalar_lea.vmem %s6398_s2, %s3854_s13  ;;  %s459_s23 = scalar_lea.vmem %s6397_s1, %s3852_s17 }
  0x38   : > { %v4731_v0 = vld [vmem:[%s4728_s16 + $0x70] sm:$0xff]  ;;  %v4734_v1 = vld [vmem:[%s4728_s16 + $0x78] sm:$0xff]  ;;  %v4737_v2 = vld [vmem:[%s4728_s16 + $0x60] sm:$0xff]  ;;  %s6463_s29 = smov (!%p5343_p1, %s3855_s29), 3 }
  0x39   : > { %v917_v3 = vmul.f32 %v4731_v0, %v4731_v0  ;;  %v918_v4 = vmul.f32 %v4734_v1, %v4734_v1  ;;  %v4744_v5 = vld [vmem:[%s4728_s16 + $0x68] sm:$0xff]  ;;  %v915_v6 = vmul.f32 %v4737_v2, %v4737_v2  ;;  %v4749_v7 = vld [vmem:[%s4728_s16 + $0x50] sm:$0xff]  ;;  %v4752_v8 = vld [vmem:[%s4728_s16 + $0x58] sm:$0xff]  ;;  %s5368_s21 = sshll.u32 %s6463_s29, 3 }
  0x3a   : > { %v916_v9 = vmul.f32 %v4744_v5, %v4744_v5  ;;  %v913_v10 = vmul.f32 %v4749_v7, %v4749_v7  ;;  %v914_v11 = vmul.f32 %v4752_v8, %v4752_v8  ;;  %v4761_v12 = vld [vmem:[%s4728_s16 + $0x40] sm:$0xff]  ;;  %v4764_v13 = vld [vmem:[%s4728_s16 + $0x48] sm:$0xff]  ;;  %s5379_s13 = scalar_lea.vmem %s6399_s3, %s5368_s21  ;;  %s476_s20 = scalar_lea.vmem %s6406_s10, %s5368_s21 }
  0x3b   : > { %v1018_v14 = vsel %vm919_vm0, %v917_v3, 0.0  ;;  %v1025_v15 = vsel %vm919_vm0, %v918_v4, 0.0  ;;  %v1004_v16 = vsel %vm919_vm0, %v915_v6, 0.0  ;;  %v911_v17 = vmul.f32 %v4761_v12, %v4761_v12  ;;  %v4779_v6 = vld [vmem:[%s4728_s16 + $0x30] sm:$0xff]  ;;  %s6325_s24 = scalar_lea.vmem %s6407_s11, %s5368_s21 }
  0x3c   : > { %v1019_v18 = vrot.slane %v1018_v14, 4  ;;  %v1026_v19 = vrot.slane %v1025_v15, 4  ;;  %v1005_v20 = vrot.slane %v1004_v16, 4  ;;  %v1011_v21 = vsel %vm919_vm0, %v916_v9, 0.0  ;;  %v4782_v9 = vld [vmem:[%s4728_s16 + $0x38] sm:$0xff] }
  0x3d   : > { %v1012_v22 = vrot.slane %v1011_v21, 4  ;;  %v990_v23 = vsel %vm919_vm0, %v913_v10, 0.0  ;;  %v997_v24 = vsel %vm919_vm0, %v914_v11, 0.0  ;;  %v912_v25 = vmul.f32 %v4764_v13, %v4764_v13 }
  0x3e   : > { %v1020_v26 = vadd.f32 %v1019_v18, %v1018_v14  ;;  %v1027_v27 = vadd.f32 %v1026_v19, %v1025_v15  ;;  %v1006_v28 = vadd.f32 %v1005_v20, %v1004_v16  ;;  %v991_v29 = vrot.slane %v990_v23, 4  ;;  %v4785_v20 = vld [vmem:[%s4728_s16 + $0x20] sm:$0xff] }
  0x3f   : > { %v1013_v30 = vadd.f32 %v1012_v22, %v1011_v21  ;;  %v998_v31 = vrot.slane %v997_v24, 4  ;;  %v976_v32 = vsel %vm919_vm0, %v911_v17, 0.0  ;;  %v983_v33 = vsel %vm919_vm0, %v912_v25, 0.0  ;;  %v4795_v25 = vld [vmem:[%s4728_s16 + $0x10] sm:$0xff] }
  0x40   : > { %v1021_v34 = vrot.slane %v1020_v26, 2  ;;  %v1028_v35 = vrot.slane %v1027_v27, 2  ;;  %v1007_v36 = vrot.slane %v1006_v28, 2  ;;  %v992_v37 = vadd.f32 %v991_v29, %v990_v23 }
  0x41   : > { %v1014_v38 = vrot.slane %v1013_v30, 2  ;;  %v999_v39 = vadd.f32 %v998_v31, %v997_v24  ;;  %v977_v40 = vrot.slane %v976_v32, 4  ;;  %v984_v41 = vrot.slane %v983_v33, 4  ;;  %v4792_v24 = vld [vmem:[%s4728_s16 + $0x28] sm:$0xff] }
  0x42   : > { %v1022_v42 = vadd.f32 %v1021_v34, %v1020_v26  ;;  %v1029_v43 = vadd.f32 %v1028_v35, %v1027_v27  ;;  %v1008_v44 = vadd.f32 %v1007_v36, %v1006_v28  ;;  %v993_v45 = vrot.slane %v992_v37, 2  ;;  %v4802_v35 = vld [vmem:[%s4728_s16 + $0x18] sm:$0xff] }
  0x43   : > { %v1015_v46 = vadd.f32 %v1014_v38, %v1013_v30  ;;  %v1000_v47 = vrot.slane %v999_v39, 2  ;;  %v978_v48 = vadd.f32 %v977_v40, %v976_v32  ;;  %v985_v49 = vadd.f32 %v984_v41, %v983_v33 }
  0x44   : > { %v1023_v50 = vrot.slane %v1022_v42, 1  ;;  %v1030_v51 = vrot.slane %v1029_v43, 1  ;;  %v1009_v52 = vrot.slane %v1008_v44, 1  ;;  %v994_v53 = vadd.f32 %v993_v45, %v992_v37 }
  0x45   : > { %v1016_v54 = vrot.slane %v1015_v46, 1  ;;  %v1001_v55 = vadd.f32 %v1000_v47, %v999_v39  ;;  %v979_v56 = vrot.slane %v978_v48, 2  ;;  %v986_v57 = vrot.slane %v985_v49, 2 }
  0x46   : > { %v1024_v58 = vadd.f32 %v1023_v50, %v1022_v42  ;;  %v1031_v59 = vadd.f32 %v1030_v51, %v1029_v43  ;;  %v1010_v60 = vadd.f32 %v1009_v52, %v1008_v44  ;;  %v995_v61 = vrot.slane %v994_v53, 1  ;;  %v4810_v42 = vld [vmem:[%s4728_s16] sm:$0xff] }
  0x47   : > { %v1017_v62 = vadd.f32 %v1016_v54, %v1015_v46  ;;  %v1002_v63 = vrot.slane %v1001_v55, 1  ;;  %v980_v3 = vadd.f32 %v979_v56, %v978_v48  ;;  %v987_v4 = vadd.f32 %v986_v57, %v985_v49  ;;  %v4816_v46 = vld [vmem:[%s4728_s16 + $0x8] sm:$0xff] }
  0x48   : > { %v1046_v10 = vmax.f32 %v1024_v58, 1e-24  ;;  %v1047_v11 = vmax.f32 %v1031_v59, 1e-24  ;;  %v1044_v14 = vmax.f32 %v1010_v60, 1e-24  ;;  %v996_v15 = vadd.f32 %v995_v61, %v994_v53 }
  0x49   : > { %v1045_v16 = vmax.f32 %v1017_v62, 1e-24  ;;  %v1003_v17 = vadd.f32 %v1002_v63, %v1001_v55  ;;  %v981_v18 = vrot.slane %v980_v3, 1  ;;  %v988_v19 = vrot.slane %v987_v4, 1 }
  0x4a   : > { %4315 = vrsqrt.f32 %v1046_v10  ;;  %v1042_v21 = vmax.f32 %v996_v15, 1e-24  ;;  %v909_v22 = vmul.f32 %v4779_v6, %v4779_v6  ;;  %v910_v23 = vmul.f32 %v4782_v9, %v4782_v9 }
  0x4b   : > { %4317 = vrsqrt.f32 %v1047_v11  ;;  %v1043_v26 = vmax.f32 %v1003_v17, 1e-24  ;;  %v982_v27 = vadd.f32 %v981_v18, %v980_v3  ;;  %v989_v28 = vadd.f32 %v988_v19, %v987_v4 }
  0x4c   : > { %4319 = vrsqrt.f32 %v1044_v14  ;;  %v962_v29 = vsel %vm919_vm0, %v909_v22, 0.0  ;;  %v969_v30 = vsel %vm919_vm0, %v910_v23, 0.0  ;;  %v907_v31 = vmul.f32 %v4785_v20, %v4785_v20 }
  0x4d   : > { %4321 = vrsqrt.f32 %v1045_v16  ;;  %v1040_v32 = vmax.f32 %v982_v27, 1e-24  ;;  %v1041_v33 = vmax.f32 %v989_v28, 1e-24  ;;  %v963_v34 = vrot.slane %v962_v29, 4 }
  0x4e   : > { %4323 = vrsqrt.f32 %v1042_v21  ;;  %v970_v36 = vrot.slane %v969_v30, 4  ;;  %v908_v37 = vmul.f32 %v4792_v24, %v4792_v24  ;;  %v948_v38 = vsel %vm919_vm0, %v907_v31, 0.0 }
  0x4f   : > { %4325 = vrsqrt.f32 %v1043_v26  ;;  %v964_v39 = vadd.f32 %v963_v34, %v962_v29  ;;  %v949_v40 = vrot.slane %v948_v38, 4  ;;  %v905_v41 = vmul.f32 %v4795_v25, %v4795_v25 }
  0x50   : > { %4327 = vrsqrt.f32 %v1040_v32  ;;  %v971_v43 = vadd.f32 %v970_v36, %v969_v30  ;;  %v955_v44 = vsel %vm919_vm0, %v908_v37, 0.0  ;;  %v906_v45 = vmul.f32 %v4802_v35, %v4802_v35 }
  0x51   : > { %4329 = vrsqrt.f32 %v1041_v33  ;;  %v965_v47 = vrot.slane %v964_v39, 2  ;;  %v950_v48 = vadd.f32 %v949_v40, %v948_v38  ;;  %v956_v49 = vrot.slane %v955_v44, 4 }
  0x52   : > { %v972_v50 = vrot.slane %v971_v43, 2  ;;  %v934_v51 = vsel %vm919_vm0, %v905_v41, 0.0  ;;  %v941_v52 = vsel %vm919_vm0, %v906_v45, 0.0  ;;  %v903_v53 = vmul.f32 %v4810_v42, %v4810_v42 }
  0x53   : > { %v966_v54 = vadd.f32 %v965_v47, %v964_v39  ;;  %v951_v55 = vrot.slane %v950_v48, 2  ;;  %v957_v56 = vadd.f32 %v956_v49, %v955_v44  ;;  %v935_v57 = vrot.slane %v934_v51, 4 }
  0x54   : > { %v973_v58 = vadd.f32 %v972_v50, %v971_v43  ;;  %v942_v59 = vrot.slane %v941_v52, 4  ;;  %v904_v60 = vmul.f32 %v4816_v46, %v4816_v46  ;;  %v920_v61 = vsel %vm919_vm0, %v903_v53, 0.0 }
  0x55   : > { %v967_v62 = vrot.slane %v966_v54, 1  ;;  %v952_v63 = vadd.f32 %v951_v55, %v950_v48  ;;  %v958_v3 = vrot.slane %v957_v56, 2  ;;  %v936_v4 = vadd.f32 %v935_v57, %v934_v51 }
  0x56   : > { %v974_v10 = vrot.slane %v973_v58, 1  ;;  %v943_v11 = vadd.f32 %v942_v59, %v941_v52  ;;  %v921_v14 = vrot.slane %v920_v61, 4  ;;  %v927_v15 = vsel %vm919_vm0, %v904_v60, 0.0 }
  0x57   : > { %v4316_v16 = vpop.eup %4315  ;;  %v968_v17 = vadd.f32 %v967_v62, %v966_v54  ;;  %v953_v18 = vrot.slane %v952_v63, 1  ;;  %v959_v19 = vadd.f32 %v958_v3, %v957_v56  ;;  %v937_v21 = vrot.slane %v936_v4, 2 }
  0x58   : > { %v4318_v22 = vpop.eup %4317  ;;  %v1078_v23 = vmul.f32 %v4316_v16, %v4731_v0  ;;  %v975_v26 = vadd.f32 %v974_v10, %v973_v58  ;;  %v944_v27 = vrot.slane %v943_v11, 2  ;;  %v922_v28 = vadd.f32 %v921_v14, %v920_v61 }
  0x59   : > { %v4320_v29 = vpop.eup %4319  ;;  %v1079_v30 = vmul.f32 %v4318_v22, %v4734_v1  ;;  %v1038_v31 = vmax.f32 %v968_v17, 1e-24  ;;  %v954_v32 = vadd.f32 %v953_v18, %v952_v63  ;;  %v960_v33 = vrot.slane %v959_v19, 1 }
  0x5a   : > { %v4322_v34 = vpop.eup %4321  ;;  %v1076_v36 = vmul.f32 %v4320_v29, %v4737_v2  ;;  %v1039_v37 = vmax.f32 %v975_v26, 1e-24  ;;  %v938_v38 = vadd.f32 %v937_v21, %v936_v4  ;;  %v945_v39 = vadd.f32 %v944_v27, %v943_v11  ;;  %v4843_v29 = vld [vmem:[%s4718_s12] sm:$0xff] }
  0x5b   : > { %v4324_v40 = vpop.eup %4323  ;;  %v1103_v41 = vpack.c.bf16 %v1079_v30, %v1078_v23  ;;  %v1077_v43 = vmul.f32 %v4322_v34, %v4744_v5  ;;  %4331 = vrsqrt.f32 %v1038_v31  ;;  %v961_v0 = vadd.f32 %v960_v33, %v959_v19  ;;  %v4846_v31 = vld [vmem:[%s4718_s12 + $0x8] sm:$0xff]  ;;  %v4863_v34 = vld [vmem:[%s4718_s12 + $0x20] sm:$0xff] }
  0x5c   : > { %v4326_v44 = vpop.eup %4325  ;;  %v1074_v45 = vmul.f32 %v4324_v40, %v4749_v7  ;;  %4333 = vrsqrt.f32 %v1039_v37  ;;  %v1036_v1 = vmax.f32 %v954_v32, 1e-24  ;;  %v939_v47 = vrot.slane %v938_v38, 1  ;;  %v4852_v32 = vld [vmem:[%s4718_s12 + $0x10] sm:$0xff]  ;;  %v4867_v37 = vld [vmem:[%s4718_s12 + $0x28] sm:$0xff] }
  0x5d   : > { %v4328_v48 = vpop.eup %4327  ;;  %4051 = vmatprep.subr.bf16.mxu0 %v1103_v41  ;;  %v1102_v49 = vpack.c.bf16 %v1077_v43, %v1076_v36  ;;  %v1075_v2 = vmul.f32 %v4326_v44, %v4752_v8  ;;  %v1037_v50 = vmax.f32 %v961_v0, 1e-24  ;;  %v946_v51 = vrot.slane %v945_v39, 1  ;;  %v4873_v40 = vld [vmem:[%s4718_s12 + $0x30] sm:$0xff]  ;;  %v4879_v43 = vld [vmem:[%s4718_s12 + $0x38] sm:$0xff] }
  0x5e   : > { %v4330_v52 = vpop.eup %4329  ;;  %4052 = vmatpush3.bf16.msra.mxu0 %v1103_v41  ;;  %v1072_v53 = vmul.f32 %v4328_v48, %v4761_v12  ;;  %4335 = vrsqrt.f32 %v1036_v1  ;;  %v940_v5 = vadd.f32 %v939_v47, %v938_v38  ;;  %v923_v54 = vrot.slane %v922_v28, 2  ;;  %v518_v41 = vld [vmem:[%s459_s23] sm:$0x3]  ;;  %v4893_v1 = vld [vmem:[%s4718_s12 + $0x48] sm:$0xff] }
  0x5f   : > { %4053 = vmatprep.subr.bf16.mxu0 %v1102_v49  ;;  %v1101_v55 = vpack.c.bf16 %v1075_v2, %v1074_v45  ;;  %v1073_v7 = vmul.f32 %v4330_v52, %v4764_v13  ;;  %4337 = vrsqrt.f32 %v1037_v50  ;;  %v947_v56 = vadd.f32 %v946_v51, %v945_v39  ;;  %v4890_v45 = vld [vmem:[%s4718_s12 + $0x40] sm:$0xff] }
  0x60   : > { %v1034_v57 = vmax.f32 %v940_v5, 1e-24  ;;  %v924_v58 = vadd.f32 %v923_v54, %v922_v28  ;;  %v928_v59 = vrot.slane %v927_v15, 4  ;;  %v3861_v0 = vadd.f32 -1.0, %v518_v41 }
  0x61   : > { %v1035_v60 = vmax.f32 %v947_v56, 1e-24  ;;  %v1100_v62 = vpack.c.bf16 %v1073_v7, %v1072_v53  ;;  %v4924_v53 = vld [vmem:[%s4718_s12 + $0x58] sm:$0xff]  ;;  %v4940_v56 = vld [vmem:[%s4718_s12 + $0x60] sm:$0xff] }
  0x62   : > { %4054 = vmatpush3.bf16.msra.mxu0 %v1102_v49  ;;  %4339 = vrsqrt.f32 %v1034_v57  ;;  %v925_v8 = vrot.slane %v924_v58, 1  ;;  %v929_v61 = vadd.f32 %v928_v59, %v927_v15  ;;  %v4905_v49 = vld [vmem:[%s4718_s12 + $0x50] sm:$0xff]  ;;  %v4943_v57 = vld [vmem:[%s4718_s12 + $0x68] sm:$0xff] }
  0x63   : > { %4055 = vmatprep.subr.bf16.mxu0 %v1101_v55  ;;  %4341 = vrsqrt.f32 %v1035_v60 }
  0x64   : > { %v926_v12 = vadd.f32 %v925_v8, %v924_v58  ;;  %v930_v63 = vrot.slane %v929_v61, 2  ;;  %v4946_v58 = vld [vmem:[%s4718_s12 + $0x70] sm:$0xff] }
  0x66   : > { %4056 = vmatpush3.bf16.msra.mxu0 %v1101_v55  ;;  %v931_v3 = vadd.f32 %v930_v63, %v929_v61  ;;  %v1032_v4 = vmax.f32 %v926_v12, 1e-24  ;;  %v4965_v12 = vld [vmem:[%s4718_s12 + $0x78] sm:$0xff]  ;;  %v4968_v63 = vld [vmem:[%s4718_s12 + $0x80] sm:$0xff] }
  0x67   : > { %4057 = vmatprep.subr.bf16.mxu0 %v1100_v62 }
  0x68   : > { %v4332_v13 = vpop.eup %4331  ;;  %v932_v10 = vrot.slane %v931_v3, 1  ;;  %4343 = vrsqrt.f32 %v1032_v4 }
  0x69   : > { %v4334_v11 = vpop.eup %4333  ;;  %v1070_v14 = vmul.f32 %v4332_v13, %v4779_v6 }
  0x6a   : > { %4058 = vmatpush3.bf16.msra.mxu0 %v1100_v62  ;;  %v1071_v16 = vmul.f32 %v4334_v11, %v4782_v9  ;;  %v933_v17 = vadd.f32 %v932_v10, %v931_v3  ;;  %v4971_v3 = vld [vmem:[%s4718_s12 + $0x88] sm:$0xff] }
  0x6b   : > { %v4336_v15 = vpop.eup %4335 }
  0x6c   : > { %v4338_v18 = vpop.eup %4337  ;;  %v1099_v19 = vpack.c.bf16 %v1071_v16, %v1070_v14  ;;  %v1068_v21 = vmul.f32 %v4336_v15, %v4785_v20  ;;  %v1033_v22 = vmax.f32 %v933_v17, 1e-24  ;;  %v4987_v14 = vld [vmem:[%s4718_s12 + $0x90] sm:$0xff]  ;;  %v4990_v16 = vld [vmem:[%s4718_s12 + $0x98] sm:$0xff] }
  0x6d   : > { %v1069_v23 = vmul.f32 %v4338_v18, %v4792_v24  ;;  %v6409_v24 = vlaneseq  ;;  %6424 = vst [vmem:[#allocation8_spill] sm:$0xff] %v4987_v14  ;;  %6425 = vst [vmem:[#allocation9_spill] sm:$0xff] %v4990_v16 }
  0x6e   : > { %4059 = vmatprep.subr.bf16.mxu0 %v1099_v19  ;;  %4345 = vrsqrt.f32 %v1033_v22  ;;  %v5009_v22 = vld [vmem:[%s4718_s12 + $0xa8] sm:$0xff] }
  0x6f   : > { %v4340_v26 = vpop.eup %4339  ;;  %4060 = vmatpush3.bf16.msra.mxu0 %v1099_v19  ;;  %v1098_v6 = vpack.c.bf16 %v1069_v23, %v1068_v21  ;;  %4347 = vlog2.f32 %v4843_v29  ;;  %v5006_v21 = vld [vmem:[%s4718_s12 + $0xa0] sm:$0xff]  ;;  %v5012_v23 = vld [vmem:[%s4718_s12 + $0xb0] sm:$0xff] }
  0x70   : > { %v4342_v9 = vpop.eup %4341  ;;  %v1066_v27 = vmul.f32 %v4340_v26, %v4795_v25  ;;  %v4849_v25 = vshrl.u32 %v6409_v24, 7  ;;  %4349 = vlog2.f32 %v4846_v31 }
  0x71   : > { %4061 = vmatprep.subr.bf16.mxu0 %v1098_v6  ;;  %v1067_v28 = vmul.f32 %v4342_v9, %v4802_v35  ;;  %v4858_v35 = vld [vmem:[%s4718_s12 + $0x18] sm:$0xff]  ;;  %4351 = vlog2.f32 %v4852_v32 }
  0x72   : > { %6422 = vst [vmem:[#allocation6_spill] sm:$0xff] %v4849_v25  ;;  %v6410_v38 = vsub.s32 1, %v4849_v25  ;;  %4353 = vlog2.f32 %v4858_v35  ;;  %v4883_v44 = vsub.s32 0, %v4849_v25 }
  0x73   : > { %4062 = vmatpush3.bf16.msra.mxu0 %v1098_v6  ;;  %v1097_v20 = vpack.c.bf16 %v1067_v28, %v1066_v27  ;;  %4355 = vlog2.f32 %v4863_v34  ;;  %v5024_v28 = vld [vmem:[%s4718_s12 + $0xb8] sm:$0xff] }
  0x74   : > { %4357 = vlog2.f32 %v4867_v37  ;;  %6423 = vst [vmem:[#allocation7_spill] sm:$0xff] %v4883_v44  ;;  %v4898_v47 = vrot.slane %v3861_v0, %v4883_v44 }
  0x75   : > { %4063 = vmatprep.subr.bf16.mxu0 %v1097_v20  ;;  %v4344_v30 = vpop.eup %4343  ;;  %4359 = vlog2.f32 %v4873_v40 }
  0x76   : > { %v1064_v33 = vmul.f32 %v4344_v30, %v4810_v42  ;;  %4361 = vlog2.f32 %v4879_v43 }
  0x77   : > { %4064 = vmatpush3.bf16.msra.mxu0 %v1097_v20  ;;  %4363 = vlog2.f32 %v4890_v45  ;;  %v5027_v20 = vld [vmem:[%s4718_s12 + $0xc0] sm:$0xff] }
  0x78   : > { %4365 = vlog2.f32 %v4893_v1 }
  0x79   : > { %4367 = vlog2.f32 %v4905_v49 }
  0x7a   : > { %4369 = vlog2.f32 %v4924_v53 }
  0x7b   : > { %v4346_v36 = vpop.eup %4345  ;;  %4371 = vlog2.f32 %v4940_v56 }
  0x7c   : > { %v1065_v39 = vmul.f32 %v4346_v36, %v4816_v46  ;;  %v4887_v46 = vrot.slane %v518_v41, %v6410_v38  ;;  %v4348_v7 = vpop.eup %4347  ;;  %4373 = vlog2.f32 %v4943_v57  ;;  %v5043_v41 = vld [vmem:[%s4718_s12 + $0xc8] sm:$0xff] }
  0x7d   : > { %v4350_v62 = vpop.eup %4349  ;;  %v521_v26 = vmul.f32 0.6931472, %v4348_v7  ;;  %4375 = vlog2.f32 %v4946_v58 }
  0x7e   : > { %v1096_v42 = vpack.c.bf16 %v1065_v39, %v1064_v33  ;;  %v4902_v48 = vmul.f32 %v4887_v46, %v4843_v29  ;;  %v4909_v2 = vmul.f32 %v4887_v46, %v4846_v31  ;;  %v4913_v50 = vmul.f32 %v4887_v46, %v4852_v32  ;;  %v4352_v11 = vpop.eup %4351 }
  0x7f   : > { %v4917_v51 = vmul.f32 %v4887_v46, %v4858_v35  ;;  %v4921_v52 = vmul.f32 %v4887_v46, %v4863_v34  ;;  %v4929_v5 = vmul.f32 %v4887_v46, %v4867_v37  ;;  %v4933_v54 = vmul.f32 %v4887_v46, %v4873_v40  ;;  %v4354_v19 = vpop.eup %4353 }
  0x80   : > { %4065 = vmatprep.subr.bf16.mxu0 %v1096_v42  ;;  %v4937_v55 = vmul.f32 %v4887_v46, %v4879_v43  ;;  %v4950_v59 = vmul.f32 %v4887_v46, %v4890_v45  ;;  %v4954_v60 = vmul.f32 %v4887_v46, %v4893_v1  ;;  %v4958_v8 = vmul.f32 %v4887_v46, %v4905_v49  ;;  %v4356_v27 = vpop.eup %4355 }
  0x81   : > { %4066 = vmatpush3.bf16.msra.mxu0 %v1096_v42  ;;  %v4962_v61 = vmul.f32 %v4887_v46, %v4924_v53  ;;  %v4976_v4 = vmul.f32 %v4887_v46, %v4940_v56  ;;  %v4980_v13 = vmul.f32 %v4887_v46, %v4943_v57  ;;  %v4984_v10 = vmul.f32 %v4887_v46, %v4946_v58  ;;  %v4358_v39 = vpop.eup %4357  ;;  %v5046_v42 = vld [vmem:[%s4718_s12 + $0xd0] sm:$0xff] }
  0x82   : > { %v4995_v17 = vmul.f32 %v4887_v46, %v4965_v12  ;;  %v4999_v15 = vmul.f32 %v4887_v46, %v4968_v63  ;;  %v5003_v18 = vmul.f32 %v4887_v46, %v4971_v3  ;;  %v5017_v6 = vmul.f32 %v4887_v46, %v4987_v14  ;;  %v4360_v38 = vpop.eup %4359 }
  0x83   : > { %v5021_v9 = vmul.f32 %v4887_v46, %v4990_v16  ;;  %v5032_v30 = vmul.f32 %v4887_v46, %v5006_v21  ;;  %v5036_v33 = vmul.f32 %v4887_v46, %v5009_v22  ;;  %v5040_v36 = vmul.f32 %v4887_v46, %v5012_v23 }
  0x84   : > { %6426 = vst [vmem:[#allocation10_spill] sm:$0xff] %v5017_v6  ;;  %v523_v0 = vmul.f32 0.6931472, %v4350_v62  ;;  %v525_v7 = vmul.f32 0.6931472, %v4352_v11  ;;  %v5051_v24 = vmul.f32 %v4887_v46, %v5024_v28  ;;  %4377 = vlog2.f32 %v4965_v12  ;;  %v5067_v11 = vld [vmem:[%s4718_s12 + $0xd8] sm:$0xff] }
  0x85   : > { %6427 = vst [vmem:[#allocation11_spill] sm:$0xff] %v5021_v9  ;;  %6428 = vst [vmem:[#allocation12_spill] sm:$0xff] %v5032_v30  ;;  %v5056_v44 = vmul.f32 %v4887_v46, %v5027_v20  ;;  %v5060_v25 = vmul.f32 %v4887_v46, %v5043_v41  ;;  %v5064_v62 = vmul.f32 %v4887_v46, %v5046_v42  ;;  %4379 = vlog2.f32 %v4968_v63 }
  0x86   : > { %6429 = vst [vmem:[#allocation13_spill] sm:$0xff] %v5036_v33  ;;  %6430 = vst [vmem:[#allocation14_spill] sm:$0xff] %v5040_v36  ;;  %v5070_v36 = vld [vmem:[%s4718_s12 + $0xe0] sm:$0xff]  ;;  %v529_v33 = vmul.f32 0.6931472, %v4356_v27  ;;  %v588_v30 = vmul.f32 %v4898_v47, %v521_v26  ;;  %4381 = vlog2.f32 %v4971_v3  ;;  %v590_v27 = vmul.f32 %v4898_v47, %v525_v7 }
  0x87   : > { %6431 = vst [vmem:[#allocation15_spill] sm:$0xff] %v5051_v24  ;;  %6432 = vst [vmem:[#allocation16_spill] sm:$0xff] %v5056_v44  ;;  %v527_v24 = vmul.f32 0.6931472, %v4354_v19  ;;  %v531_v9 = vmul.f32 0.6931472, %v4358_v39  ;;  %v4362_v44 = vpop.eup %4361  ;;  %4383 = vlog2.f32 %v4987_v14  ;;  %v589_v19 = vmul.f32 %v4898_v47, %v523_v0 }
  0x88   : > { %6433 = vst [vmem:[#allocation17_spill] sm:$0xff] %v5060_v25  ;;  %6434 = vst [vmem:[#allocation18_spill] sm:$0xff] %v5064_v62  ;;  %v5077_v25 = vmul.f32 %v4887_v46, %v5067_v11  ;;  %v5081_v62 = vmul.f32 %v4887_v46, %v5070_v36  ;;  %v533_v6 = vmul.f32 0.6931472, %v4360_v38  ;;  %v4364_v26 = vpop.eup %4363  ;;  %4385 = vlog2.f32 %v4990_v16 }
  0x89   : > { %v656_v39 = vmul.f32 %v4902_v48, %v4843_v29  ;;  %4387 = vlog2.f32 %v5006_v21  ;;  %v591_v38 = vmul.f32 %v4898_v47, %v527_v24  ;;  %v592_v0 = vmul.f32 %v4898_v47, %v529_v33  ;;  %v4366_v14 = vpop.eup %4365 }
  0x8a   : > { %6435 = vst [vmem:[#allocation19_spill] sm:$0xff] %v5077_v25  ;;  %6436 = vst [vmem:[#allocation20_spill] sm:$0xff] %v5081_v62  ;;  %v657_v25 = vmul.f32 %v4909_v2, %v4846_v31  ;;  %v658_v62 = vmul.f32 %v4913_v50, %v4852_v32  ;;  %v659_v7 = vmul.f32 %v4917_v51, %v4858_v35  ;;  %v535_v16 = vmul.f32 0.6931472, %v4362_v44  ;;  %v4368_v2 = vpop.eup %4367 }
  0x8b   : > { %4389 = vlog2.f32 %v5009_v22  ;;  %v593_v29 = vmul.f32 %v4898_v47, %v531_v9  ;;  %v660_v31 = vmul.f32 %v4921_v52, %v4863_v34  ;;  %v537_v48 = vmul.f32 0.6931472, %v4364_v26  ;;  %v4370_v51 = vpop.eup %4369 }
  0x8c   : > { %4391 = vlog2.f32 %v5012_v23  ;;  %v594_v32 = vmul.f32 %v4898_v47, %v533_v6  ;;  %v661_v24 = vmul.f32 %v4929_v5, %v4867_v37  ;;  %v688_v35 = vsub.f32 %v588_v30, %v656_v39  ;;  %v4372_v9 = vpop.eup %4371 }
  0x8d   : > { %4393 = vlog2.f32 %v5024_v28  ;;  %v689_v44 = vsub.f32 %v589_v19, %v657_v25  ;;  %v690_v50 = vsub.f32 %v590_v27, %v658_v62  ;;  %v539_v33 = vmul.f32 0.6931472, %v4366_v14  ;;  %v4374_v30 = vpop.eup %4373 }
  0x8e   : > { %4395 = vlog2.f32 %v5027_v20  ;;  %v662_v34 = vmul.f32 %v4933_v54, %v4873_v40  ;;  %v691_v52 = vsub.f32 %v591_v38, %v659_v7  ;;  %v595_v6 = vmul.f32 %v4898_v47, %v535_v16  ;;  %v4376_v40 = vpop.eup %4375  ;;  %v5124_v7 = vld [vmem:[%s4718_s12 + $0xe8] sm:$0xff] }
  0x8f   : > { %4397 = vlog2.f32 %v5043_v41  ;;  %v663_v37 = vmul.f32 %v4937_v55, %v4879_v43  ;;  %v692_v5 = vsub.f32 %v592_v0, %v660_v31  ;;  %v596_v25 = vmul.f32 %v4898_v47, %v537_v48 }
  0x90   : > { %4399 = vlog2.f32 %v5046_v42  ;;  %v664_v14 = vmul.f32 %v4950_v59, %v4890_v45  ;;  %v693_v62 = vsub.f32 %v593_v29, %v661_v24  ;;  %v720_v54 = vmul.f32 1.442695, %v688_v35 }
  0x91   : > { %4401 = vlog2.f32 %v5067_v11  ;;  %v722_v19 = vmul.f32 1.442695, %v689_v44  ;;  %v724_v16 = vmul.f32 1.442695, %v690_v50  ;;  %v4378_v27 = vpop.eup %4377  ;;  %v541_v26 = vmul.f32 0.6931472, %v4368_v2 }
  0x92   : > { %4403 = vlog2.f32 %v5070_v36  ;;  %v694_v43 = vsub.f32 %v594_v32, %v662_v34  ;;  %v726_v55 = vmul.f32 1.442695, %v691_v52  ;;  %v4380_v39 = vpop.eup %4379  ;;  %v597_v38 = vmul.f32 %v4898_v47, %v539_v33 }
  0x93   : > { %v665_v45 = vmul.f32 %v4954_v60, %v4893_v1  ;;  %4405 = vpow2.f32 %v720_v54  ;;  %v728_v59 = vmul.f32 1.442695, %v692_v5  ;;  %v4382_v0 = vpop.eup %4381  ;;  %v543_v29 = vmul.f32 0.6931472, %v4370_v51  ;;  %v5133_v60 = vld [vmem:[%s4718_s12 + $0xf0] sm:$0xff] }
  0x94   : > { %v695_v31 = vsub.f32 %v595_v6, %v663_v37  ;;  %4407 = vpow2.f32 %v722_v19  ;;  %v730_v48 = vmul.f32 1.442695, %v693_v62  ;;  %v4384_v24 = vpop.eup %4383  ;;  %v545_v2 = vmul.f32 0.6931472, %v4372_v9 }
  0x95   : > { %v5128_v32 = vmul.f32 %v4887_v46, %v5124_v7  ;;  %v666_v35 = vmul.f32 %v4958_v8, %v4905_v49  ;;  %4409 = vpow2.f32 %v724_v16  ;;  %v4386_v1 = vpop.eup %4385  ;;  %v598_v44 = vmul.f32 %v4898_v47, %v541_v26  ;;  %v5147_v8 = vld [vmem:[%s4718_s12 + $0xf8] sm:$0xff] }
  0x96   : > { %v696_v50 = vsub.f32 %v596_v25, %v664_v14  ;;  %4411 = vpow2.f32 %v726_v55  ;;  %v732_v51 = vmul.f32 1.442695, %v694_v43  ;;  %v5136_v33 = vpop.eup %4387  ;;  %v547_v34 = vmul.f32 0.6931472, %v4374_v30 }
  0x97   : > { %v5140_v52 = vmul.f32 %v4887_v46, %v5133_v60  ;;  %v667_v9 = vmul.f32 %v4962_v61, %v4924_v53  ;;  %4413 = vpow2.f32 %v728_v59  ;;  %v599_v6 = vmul.f32 %v4898_v47, %v543_v29 }
  0x98   : > { %v5144_v49 = vpop.eup %4389  ;;  %v697_v37 = vsub.f32 %v597_v38, %v665_v45  ;;  %4415 = vpow2.f32 %v730_v48  ;;  %v734_v5 = vmul.f32 1.442695, %v695_v31  ;;  %v549_v30 = vmul.f32 0.6931472, %v4376_v40 }
  0x99   : > { %v5150_v25 = vpop.eup %4391  ;;  %4417 = vlog2.f32 %v5124_v7  ;;  %v5155_v14 = vmul.f32 %v4887_v46, %v5147_v8  ;;  %v668_v53 = vmul.f32 %v4976_v4, %v4940_v56  ;;  %v600_v62 = vmul.f32 %v4898_v47, %v545_v2 }
  0x9a   : > { %v5159_v61 = vpop.eup %4393  ;;  %v698_v54 = vsub.f32 %v598_v44, %v666_v35  ;;  %4419 = vpow2.f32 %v732_v51  ;;  %v736_v19 = vmul.f32 1.442695, %v696_v50  ;;  %v551_v26 = vmul.f32 0.6931472, %v4378_v27  ;;  %v6437_v51 = vld [vmem:[#allocation8_spill] sm:$0xff] }
  0x9b   : > { %v5162_v16 = vpop.eup %4395  ;;  %v553_v40 = vmul.f32 0.6931472, %v4380_v39  ;;  %4421 = vlog2.f32 %v5133_v60  ;;  %v669_v46 = vmul.f32 %v4980_v13, %v4943_v57  ;;  %v601_v56 = vmul.f32 %v4898_v47, %v547_v34  ;;  %v6438_v34 = vld [vmem:[#allocation10_spill] sm:$0xff] }
  0x9c   : > { %v5167_v43 = vpop.eup %4397  ;;  %v699_v4 = vsub.f32 %v599_v6, %v667_v9  ;;  %4423 = vpow2.f32 %v734_v5  ;;  %v738_v55 = vmul.f32 1.442695, %v697_v37  ;;  %v555_v45 = vmul.f32 0.6931472, %v4382_v0  ;;  %v6439_v5 = vld [vmem:[#allocation9_spill] sm:$0xff] }
  0x9d   : > { %v5170_v38 = vpop.eup %4399  ;;  %4425 = vlog2.f32 %v5147_v8  ;;  %v602_v27 = vmul.f32 %v4898_v47, %v549_v30  ;;  %v670_v39 = vmul.f32 %v4984_v10, %v4946_v58  ;;  %v671_v57 = vmul.f32 %v4995_v17, %v4965_v12 }
  0x9e   : > { %v5176_v59 = vpop.eup %4401  ;;  %v700_v13 = vsub.f32 %v600_v62, %v668_v53  ;;  %4427 = vpow2.f32 %v736_v19  ;;  %v740_v29 = vmul.f32 1.442695, %v698_v54  ;;  %v557_v48 = vmul.f32 0.6931472, %v4384_v24  ;;  %v6441_v53 = vld [vmem:[#allocation12_spill] sm:$0xff] }
  0x9f   : > { %v5180_v31 = vpop.eup %4403  ;;  %v603_v0 = vmul.f32 %v4898_v47, %v551_v26  ;;  %v604_v2 = vmul.f32 %v4898_v47, %v553_v40  ;;  %v672_v35 = vmul.f32 %v4999_v15, %v4968_v63  ;;  %v673_v58 = vmul.f32 %v5003_v18, %v4971_v3 }
  0xa0   : > { %v5186_v44 = vpop.eup %4405  ;;  %v701_v10 = vsub.f32 %v601_v56, %v669_v46  ;;  %4429 = vpow2.f32 %v738_v55  ;;  %v742_v12 = vmul.f32 1.442695, %v699_v4  ;;  %v559_v50 = vmul.f32 0.6931472, %v4386_v1  ;;  %v6440_v1 = vld [vmem:[#allocation11_spill] sm:$0xff] }
  0xa1   : > { %v5190_v17 = vpop.eup %4407  ;;  %v605_v24 = vmul.f32 %v4898_v47, %v555_v45  ;;  %v674_v9 = vmul.f32 %v6438_v34, %v6437_v51  ;;  %v784_v6 = vmul.f32 %v5186_v44, %v5186_v44  ;;  %v702_v15 = vsub.f32 %v602_v27, %v670_v39 }
  0xa2   : > { %v5197_v63 = vpop.eup %4409  ;;  %4431 = vpow2.f32 %v740_v29  ;;  %v744_v37 = vmul.f32 1.442695, %v700_v13  ;;  %v785_v3 = vmul.f32 %v5190_v17, %v5190_v17  ;;  %v5205_v30 = vmul.f32 %v6440_v1, %v6439_v5 }
  0xa3   : > { %v5201_v18 = vpop.eup %4411  ;;  %v5209_v62 = vmul.f32 %v6441_v53, %v5006_v21  ;;  %v703_v54 = vsub.f32 %v603_v0, %v671_v57  ;;  %v786_v19 = vmul.f32 %v5197_v63, %v5197_v63  ;;  %4433 = vpow2.f32 %v742_v12  ;;  %v6442_v21 = vld [vmem:[#allocation13_spill] sm:$0xff] }
  0xa4   : > { %v5213_v26 = vpop.eup %4413  ;;  %v746_v40 = vmul.f32 1.442695, %v701_v10  ;;  %v787_v46 = vmul.f32 %v5201_v18, %v5201_v18  ;;  %v816_v56 = vadd.f32 %v785_v3, %v784_v6  ;;  %v561_v55 = vmul.f32 0.6931472, %v5136_v33 }
  0xa5   : > { %v5217_v4 = vpop.eup %4415  ;;  %v606_v45 = vmul.f32 %v4898_v47, %v557_v48  ;;  %v5223_v27 = vmul.f32 %v6442_v21, %v5009_v22  ;;  %v704_v39 = vsub.f32 %v604_v2, %v672_v35  ;;  %4435 = vpow2.f32 %v744_v37  ;;  %v6443_v48 = vld [vmem:[#allocation14_spill] sm:$0xff] }
  0xa6   : > { %v5225_v57 = vpop.eup %4417  ;;  %v748_v13 = vmul.f32 1.442695, %v702_v15  ;;  %v788_v29 = vmul.f32 %v5213_v26, %v5213_v26  ;;  %v817_v0 = vadd.f32 %v816_v56, %v786_v19  ;;  %v563_v12 = vmul.f32 0.6931472, %v5144_v49  ;;  %v6445_v19 = vld [vmem:[#allocation16_spill] sm:$0xff] }
  0xa7   : > { %v5229_v10 = vpop.eup %4419  ;;  %v607_v33 = vmul.f32 %v4898_v47, %v559_v50  ;;  %v5235_v51 = vmul.f32 %v6443_v48, %v5012_v23  ;;  %v705_v22 = vsub.f32 %v605_v24, %v673_v58  ;;  %4437 = vpow2.f32 %v746_v40  ;;  %v6444_v50 = vld [vmem:[#allocation15_spill] sm:$0xff] }
  0xa8   : > { %v5237_v2 = vpop.eup %4421  ;;  %v750_v35 = vmul.f32 1.442695, %v703_v54  ;;  %v789_v34 = vmul.f32 %v5217_v4, %v5217_v4  ;;  %v818_v6 = vadd.f32 %v817_v0, %v787_v46  ;;  %v565_v37 = vmul.f32 0.6931472, %v5150_v25 }
  0xa9   : > { %v5241_v15 = vpop.eup %4423  ;;  %v608_v49 = vmul.f32 %v4898_v47, %v561_v55  ;;  %v5247_v3 = vmul.f32 %v6444_v50, %v5024_v28  ;;  %v706_v23 = vsub.f32 %v606_v45, %v674_v9  ;;  %4439 = vpow2.f32 %v748_v13 }
  0xaa   : > { %v5249_v58 = vpop.eup %4425  ;;  %v752_v24 = vmul.f32 1.442695, %v704_v39  ;;  %v790_v5 = vmul.f32 %v5229_v10, %v5229_v10  ;;  %v819_v1 = vadd.f32 %v818_v6, %v788_v29  ;;  %v567_v54 = vmul.f32 0.6931472, %v5159_v61 }
  0xab   : > { %v5253_v53 = vpop.eup %4427  ;;  %v609_v25 = vmul.f32 %v4898_v47, %v563_v12  ;;  %v5259_v40 = vmul.f32 %v6445_v19, %v5027_v20  ;;  %v707_v28 = vsub.f32 %v607_v33, %v5205_v30  ;;  %4441 = vpow2.f32 %v750_v35  ;;  %v6446_v12 = vld [vmem:[#allocation17_spill] sm:$0xff] }
  0xac   : > { %v754_v9 = vmul.f32 1.442695, %v705_v22  ;;  %v791_v46 = vmul.f32 %v5241_v15, %v5241_v15  ;;  %v820_v56 = vadd.f32 %v819_v1, %v789_v34  ;;  %v569_v45 = vmul.f32 0.6931472, %v5162_v16  ;;  %v6447_v16 = vld [vmem:[#allocation18_spill] sm:$0xff] }
  0xad   : > { %v5264_v55 = vpop.eup %4429  ;;  %v571_v61 = vmul.f32 0.6931472, %v5167_v43  ;;  %v610_v21 = vmul.f32 %v4898_v47, %v565_v37  ;;  %v708_v39 = vsub.f32 %v608_v49, %v5209_v62  ;;  %4443 = vpow2.f32 %v752_v24 }
  0xae   : > { %v756_v20 = vmul.f32 1.442695, %v706_v23  ;;  %v792_v30 = vmul.f32 %v5253_v53, %v5253_v53  ;;  %v821_v13 = vadd.f32 %v820_v56, %v790_v5  ;;  %v611_v0 = vmul.f32 %v4898_v47, %v567_v54  ;;  %v6448_v5 = vld [vmem:[#allocation19_spill] sm:$0xff] }
  0xaf   : > { %v5272_v29 = vpop.eup %4431  ;;  %v681_v33 = vmul.f32 %v6446_v12, %v5043_v41  ;;  %v5279_v43 = vmul.f32 %v6447_v16, %v5046_v42  ;;  %v709_v48 = vsub.f32 %v609_v25, %v5223_v27  ;;  %4445 = vpow2.f32 %v754_v9 }
  0xb0   : > { %v758_v62 = vmul.f32 1.442695, %v707_v28  ;;  %v793_v22 = vmul.f32 %v5264_v55, %v5264_v55  ;;  %v822_v35 = vadd.f32 %v821_v13, %v791_v46  ;;  %v5284_v34 = vpop.eup %4433  ;;  %v573_v6 = vmul.f32 0.6931472, %v5170_v38  ;;  %v6449_v38 = vld [vmem:[#allocation20_spill] sm:$0xff] }
  0xb1   : > { %v612_v37 = vmul.f32 %v4898_v47, %v569_v45  ;;  %v613_v41 = vmul.f32 %v4898_v47, %v571_v61  ;;  %v710_v49 = vsub.f32 %v610_v21, %v5235_v51  ;;  %4447 = vpow2.f32 %v756_v20 }
  0xb2   : > { %v760_v42 = vmul.f32 1.442695, %v708_v39  ;;  %v794_v27 = vmul.f32 %v5272_v29, %v5272_v29  ;;  %v823_v50 = vadd.f32 %v822_v35, %v792_v30  ;;  %v5292_v23 = vpop.eup %4435  ;;  %v575_v24 = vmul.f32 0.6931472, %v5176_v59 }
  0xb3   : > { %v5297_v1 = vmul.f32 %v6448_v5, %v5067_v11  ;;  %v5301_v54 = vmul.f32 %v6449_v38, %v5070_v36  ;;  %v711_v51 = vsub.f32 %v611_v0, %v5247_v3  ;;  %4449 = vpow2.f32 %v758_v62 }
  0xb4   : > { %v762_v25 = vmul.f32 1.442695, %v709_v48  ;;  %v795_v19 = vmul.f32 %v5284_v34, %v5284_v34  ;;  %v824_v28 = vadd.f32 %v823_v50, %v793_v22  ;;  %v5306_v9 = vpop.eup %4437  ;;  %v577_v59 = vmul.f32 0.6931472, %v5180_v31 }
  0xb5   : > { %v614_v46 = vmul.f32 %v4898_v47, %v573_v6  ;;  %v712_v11 = vsub.f32 %v612_v37, %v5259_v40  ;;  %v713_v56 = vsub.f32 %v613_v41, %v681_v33  ;;  %4451 = vpow2.f32 %v760_v42 }
  0xb6   : > { %v764_v36 = vmul.f32 1.442695, %v710_v49  ;;  %v796_v3 = vmul.f32 %v5292_v23, %v5292_v23  ;;  %v825_v45 = vadd.f32 %v824_v28, %v794_v27  ;;  %v5313_v61 = vpop.eup %4439  ;;  %v579_v21 = vmul.f32 0.6931472, %v5225_v57 }
  0xb7   : > { %v581_v39 = vmul.f32 0.6931472, %v5237_v2  ;;  %v615_v20 = vmul.f32 %v4898_v47, %v575_v24  ;;  %v5320_v31 = vmul.f32 %v5128_v32, %v5124_v7  ;;  %4453 = vpow2.f32 %v762_v25 }
  0xb8   : > { %v766_v40 = vmul.f32 1.442695, %v711_v51  ;;  %v797_v30 = vmul.f32 %v5306_v9, %v5306_v9  ;;  %v826_v13 = vadd.f32 %v825_v45, %v795_v19  ;;  %v5324_v0 = vpop.eup %4441  ;;  %v583_v12 = vmul.f32 0.6931472, %v5249_v58  ;;  %v5339_v58 = vld [vmem:[%s6400_s4 + $0x8] sm:$0xff]  }
  0xb9   : > { %v616_v57 = vmul.f32 %v4898_v47, %v577_v59  ;;  %v714_v2 = vsub.f32 %v614_v46, %v5279_v43  ;;  %v768_v33 = vmul.f32 1.442695, %v712_v11  ;;  %4455 = vpow2.f32 %v764_v36  ;;  %4099 = vmatprep.subr.bf16.mxu0 %v5339_v58  ;;  %4254 = vmatprep.subr.bf16.mxu1 %v5339_v58  ;;  %v6451_v59 = vld [vmem:[#allocation6_spill] sm:$0xff] }
  0xba   : > { %v770_v16 = vmul.f32 1.442695, %v713_v56  ;;  %v798_v7 = vmul.f32 %v5313_v61, %v5313_v61  ;;  %v827_v32 = vadd.f32 %v826_v13, %v796_v3  ;;  %v5331_v48 = vpop.eup %4443  ;;  %v617_v62 = vmul.f32 %v4898_v47, %v579_v21  ;;  %4256 = vmatpush3.bf16.msra.mxu1 %v5339_v58  ;;  %v1473_v36 = vld [vmem:[%s5379_s13] sm:$0xff] }
  0xbb   : > { %v715_v22 = vsub.f32 %v615_v20, %v5297_v1  ;;  %4457 = vpow2.f32 %v766_v40  ;;  %v799_v43 = vmul.f32 %v5324_v0, %v5324_v0  ;;  %v4577_v6 = vmov 0  }
  0xbc   : > { %v828_v35 = vadd.f32 %v827_v32, %v797_v30  ;;  %4303 = vset.pattern.permute.xlu0 %v4577_v6  ;;  %v4578_v37 = vmov 1966171168   ;;  %4304 = vset.pattern.permute.xlu1 %v4577_v6  ;;  %v5347_v49 = vpop.eup %4445  ;;  %v618_v42 = vmul.f32 %v4898_v47, %v581_v39  ;;  %v686_v27 = vmul.f32 %v5140_v52, %v5133_v60 }
  0xbd   : > { %v1479_v41 = vunpack.c.l.s4 %v4578_v37  ;;  %v716_v50 = vsub.f32 %v616_v57, %v5301_v54  ;;  %v772_v24 = vmul.f32 1.442695, %v714_v2  ;;  %4459 = vpow2.f32 %v768_v33 }
  0xbe   : > { %v800_v5 = vmul.f32 %v5331_v48, %v5331_v48  ;;  %v829_v1 = vadd.f32 %v828_v35, %v798_v7  ;;  %v5360_v51 = vpop.eup %4447  ;;  %v619_v60 = vmul.f32 %v4898_v47, %v583_v12  ;;  %v687_v52 = vmul.f32 %v5155_v14, %v5147_v8 }
  0xbf   : > { %v1480_v38 = vunpack.c.0.s8 %v1479_v41  ;;  %v717_v54 = vsub.f32 %v617_v62, %v5320_v31  ;;  %v774_v25 = vmul.f32 1.442695, %v715_v22  ;;  %4461 = vpow2.f32 %v770_v16 }
  0xc0   : > { %v801_v19 = vmul.f32 %v5347_v49, %v5347_v49  ;;  %v830_v28 = vadd.f32 %v829_v1, %v799_v43  ;;  %v5373_v11 = vpop.eup %4449  ;;  %v718_v47 = vsub.f32 %v618_v42, %v686_v27  ;;  %4463 = vpow2.f32 %v772_v24 }
  0xc1   : > { %v5371_v46 = vsub.s32 %v1480_v38, %v6451_v59  ;;  %v776_v8 = vmul.f32 1.442695, %v716_v50  ;;  %v802_v14 = vmul.f32 %v5360_v51, %v5360_v51  ;;  %v719_v45 = vsub.f32 %v619_v60, %v687_v52  ;;  %v1474_v38 = vld [vmem:[%s5379_s13 + $0x8] sm:$0xff] }
  0xc2   : > { %v831_v56 = vadd.f32 %v830_v28, %v800_v5  ;;  %v5384_v3 = vpop.eup %4451  ;;  %v1477_v39 = vcombine.high %v1473_v36, %v1473_v36  ;;  %4465 = vpow2.f32 %v774_v25  ;;  %v778_v20 = vmul.f32 1.442695, %v717_v54 }
  0xc3   : > { %v1484_v21 = vrot.slane %v1473_v36, %v5371_v46  ;;  %v803_v31 = vmul.f32 %v5373_v11, %v5373_v11  ;;  %4467 = vpow2.f32 %v776_v8  ;;  %v780_v57 = vmul.f32 1.442695, %v718_v47 }
  0xc4   : > { %v832_v40 = vadd.f32 %v831_v56, %v801_v19  ;;  %v5389_v30 = vpop.eup %4453  ;;  %v804_v2 = vmul.f32 %v5384_v3, %v5384_v3  ;;  %v1491_v62 = vrot.slane %v1477_v39, %v5371_v46  ;;  %4469 = vpow2.f32 %v778_v20 }
  0xc5   : > { %v1500_v13 = vrot.slane %v1484_v21, %v5371_v46  ;;  %v1492_v12 = vcombine.high %v1484_v21, %v1484_v21  ;;  %v782_v22 = vmul.f32 1.442695, %v719_v45  ;;  %v805_v43 = vmul.f32 %v5389_v30, %v5389_v30 }
  0xc6   : > { %v833_v33 = vadd.f32 %v832_v40, %v802_v14  ;;  %v5394_v16 = vpop.eup %4455  ;;  %v1493_v41 = vcombine.high %v1491_v62, %v1491_v62  ;;  %4471 = vpow2.f32 %v780_v57  ;;  %v1507_v24 = vrot.slane %v1491_v62, %v5371_v46 }
  0xc7   : > { %1576 = vperm.xlu0 %4303, %v1500_v13   ;;  %v1514_v7 = vrot.slane %v1492_v12, %v5371_v46  ;;  %v1522_v32 = vcombine.high %v1500_v13, %v1500_v13  ;;  %v806_v42 = vmul.f32 %v5394_v16, %v5394_v16  ;;  %4473 = vpow2.f32 %v782_v22 }
  0xc8   : > { %v834_v35 = vadd.f32 %v833_v33, %v803_v31  ;;  %v5400_v6 = vpop.eup %4457  ;;  %v1521_v52 = vrot.slane %v1493_v41, %v5371_v46  ;;  %v1523_v28 = vcombine.high %v1507_v24, %v1507_v24  ;;  %v1533_v47 = vrot.slane %v1474_v38, %v5371_v46 }
  0xc9   : > { %1592 = vperm.xlu1 %4304, %v1522_v32   ;;  %v1524_v37 = vcombine.high %v1514_v7, %v1514_v7  ;;  %v807_v5 = vmul.f32 %v5400_v6, %v5400_v6  ;;  %v1526_v31 = vcombine.high %v1474_v38, %v1474_v38 }
  0xca   : > { %v835_v27 = vadd.f32 %v834_v35, %v804_v2  ;;  %v5404_v50 = vpop.eup %4459  ;;  %v1525_v36 = vcombine.high %v1521_v52, %v1521_v52  ;;  %v1541_v45 = vcombine.high %v1533_v47, %v1533_v47  ;;  %v1549_v40 = vrot.slane %v1533_v47, %v5371_v46 }
  0xcb   : > { %1584 = vperm.xlu0 %4303, %v1514_v7   ;;  %v808_v54 = vmul.f32 %v5404_v50, %v5404_v50  ;;  %v1540_v22 = vrot.slane %v1526_v31, %v5371_v46 }
  0xcc   : > { %v836_v1 = vadd.f32 %v835_v27, %v805_v43  ;;  %v5410_v60 = vpop.eup %4461  ;;  %v1563_v2 = vrot.slane %v1541_v45, %v5371_v46  ;;  %v1571_v62 = vcombine.high %v1549_v40, %v1549_v40 }
  0xcd   : > { %1600 = vperm.xlu1 %4304, %v1524_v37   ;;  %v5415_v19 = vpop.eup %4463  ;;  %v809_v8 = vmul.f32 %v5410_v60, %v5410_v60 }
  0xce   : > { %v837_v25 = vadd.f32 %v836_v1, %v806_v42  ;;  %v810_v21 = vmul.f32 %v5415_v19, %v5415_v19  ;;  %v1573_v41 = vcombine.high %v1563_v2, %v1563_v2  ;;  %v1542_v42 = vcombine.high %v1540_v22, %v1540_v22 }
  0xcf   : > { %1608 = vperm.xlu0 %4303, %v1507_v24   ;;  %v5420_v56 = vpop.eup %4465 }
  0xd0   : > { %v838_v14 = vadd.f32 %v837_v25, %v807_v5  ;;  %v5424_v20 = vpop.eup %4467  ;;  %v811_v13 = vmul.f32 %v5420_v56, %v5420_v56  ;;  %v1556_v5 = vrot.slane %v1540_v22, %v5371_v46 }
  0xd1   : > { %1616 = vperm.xlu1 %4304, %v1521_v52   ;;  %v5429_v57 = vpop.eup %4469  ;;  %v812_v33 = vmul.f32 %v5424_v20, %v5424_v20  ;;  %v1570_v52 = vrot.slane %v1542_v42, %v5371_v46 }
  0xd2   : > { %v839_v39 = vadd.f32 %v838_v14, %v808_v54  ;;  %v813_v43 = vmul.f32 %v5429_v57, %v5429_v57  ;;  %v1572_v25 = vcombine.high %v1556_v5, %v1556_v5 }
  0xd3   : > { %1624 = vperm.xlu0 %4303, %v1523_v28   ;;  %v5434_v32 = vpop.eup %4471  ;;  %v1574_v47 = vcombine.high %v1570_v52, %v1570_v52 }
  0xd4   : > { %v840_v12 = vadd.f32 %v839_v39, %v809_v8  ;;  %v5439_v37 = vpop.eup %4473  ;;  %v814_v27 = vmul.f32 %v5434_v32, %v5434_v32 }
  0xd5   : > { %1632 = vperm.xlu1 %4304, %v1525_v36   ;;  %v815_v1 = vmul.f32 %v5439_v37, %v5439_v37 }
  0xd6   : > { %v841_v7 = vadd.f32 %v840_v12, %v810_v21 }
  0xd7   : > { %1640 = vperm.xlu0 %4303, %v1549_v40  }
  0xd8   : > { %v842_v35 = vadd.f32 %v841_v7, %v811_v13 }
  0xd9   : > { %1648 = vperm.xlu1 %4304, %v1563_v2  }
  0xda   : > { %v843_v24 = vadd.f32 %v842_v35, %v812_v33 }
  0xdb   : > { %1656 = vperm.xlu0 %4303, %v1571_v62  }
  0xdc   : > { %v844_v38 = vadd.f32 %v843_v24, %v813_v43 }
  0xdd   : > { %1664 = vperm.xlu1 %4304, %v1573_v41  }
  0xde   : > { %v845_v54 = vadd.f32 %v844_v38, %v814_v27 }
  0xdf   : > { %1672 = vperm.xlu0 %4303, %v1556_v5  }
  0xe0   : > { %v846_v28 = vadd.f32 %v845_v54, %v815_v1 }
  0xe1   : > { %1680 = vperm.xlu1 %4304, %v1570_v52  }
  0xe2   : > { %v847_v8 = vrot.slane %v846_v28, 4 }
  0xe3   : > { %1688 = vperm.xlu0 %4303, %v1572_v25  }
  0xe4   : > { %v848_v14 = vadd.f32 %v847_v8, %v846_v28 }
  0xe5   : > { %1696 = vperm.xlu1 %4304, %v1574_v47  }
  0xe6   : > { %v849_v36 = vrot.slane %v848_v14, 2 }
  0xe8   : > { %v850_v45 = vadd.f32 %v849_v36, %v848_v14 }
  0xea   : > { %v851_v21 = vrot.slane %v850_v45, 1 }
  0xec   : > { %v852_v39 = vadd.f32 %v851_v21, %v850_v45 }
  0xee   : > { %v853_v31 = vmax.f32 %v852_v39, 1e-24 }
  0xf0   : > { %4475 = vrsqrt.f32 %v853_v31 }
  0xfd   : > { %v4476_v40 = vpop.eup %4475 }
  0xfe   : > { %v855_v13 = vmul.f32 %v4476_v40, %v5186_v44  ;;  %v856_v46 = vmul.f32 %v4476_v40, %v5190_v17  ;;  %v857_v12 = vmul.f32 %v4476_v40, %v5197_v63  ;;  %v858_v2 = vmul.f32 %v4476_v40, %v5201_v18 }
  0xff   : > { %v859_v33 = vmul.f32 %v4476_v40, %v5213_v26  ;;  %v860_v7 = vmul.f32 %v4476_v40, %v5217_v4  ;;  %v861_v35 = vmul.f32 %v4476_v40, %v5229_v10  ;;  %v862_v41 = vmul.f32 %v4476_v40, %v5241_v15 }
 0x100   : > { %v1080_v62 = vpack.c.bf16 %v856_v46, %v855_v13  ;;  %v1081_v22 = vpack.c.bf16 %v858_v2, %v857_v12  ;;  %v863_v44 = vmul.f32 %v4476_v40, %v5253_v53  ;;  %v864_v17 = vmul.f32 %v4476_v40, %v5264_v55 }
 0x101   : > { %v1082_v43 = vpack.c.bf16 %v860_v7, %v859_v33  ;;  %v1083_v63 = vpack.c.bf16 %v862_v41, %v861_v35  ;;  %v865_v26 = vmul.f32 %v4476_v40, %v5272_v29  ;;  %v866_v4 = vmul.f32 %v4476_v40, %v5284_v34 }
 0x102   : > { %4067 = vmatprep.mubr.bf16.mxu0 %v1080_v62  ;;  %v1084_v18 = vpack.c.bf16 %v864_v17, %v863_v44  ;;  %v867_v42 = vmul.f32 %v4476_v40, %v5292_v23  ;;  %v868_v10 = vmul.f32 %v4476_v40, %v5306_v9  ;;  %v869_v53 = vmul.f32 %v4476_v40, %v5313_v61 }
 0x103   : > { %4068 = vmatmul.mubr.bf16.vlgmr.msra.gmra.mxu0 %v1081_v22  ;;  %v1085_v15 = vpack.c.bf16 %v866_v4, %v865_v26  ;;  %v870_v55 = vmul.f32 %v4476_v40, %v5324_v0  ;;  %v872_v24 = vmul.f32 %v4476_v40, %v5347_v49  ;;  %v873_v34 = vmul.f32 %v4476_v40, %v5360_v51 }
 0x104   : > { %4071 = vmatprep.mubr.bf16.mxu0 %v1082_v43  ;;  %4100 = vmatpush3.bf16.msra.mxu0 %v5339_v58  ;;  %v1086_v27 = vpack.c.bf16 %v868_v10, %v867_v42  ;;  %v871_v58 = vmul.f32 %v4476_v40, %v5331_v48  ;;  %v874_v23 = vmul.f32 %v4476_v40, %v5373_v11 }
 0x105   : > { %v1087_v29 = vpack.c.bf16 %v870_v55, %v869_v53  ;;  %v875_v9 = vmul.f32 %v4476_v40, %v5384_v3  ;;  %v876_v1 = vmul.f32 %v4476_v40, %v5389_v30  ;;  %v877_v0 = vmul.f32 %v4476_v40, %v5394_v16 }
 0x106   : > { %v1088_v5 = vpack.c.bf16 %v872_v24, %v871_v58  ;;  %v1089_v61 = vpack.c.bf16 %v874_v23, %v873_v34  ;;  %v878_v48 = vmul.f32 %v4476_v40, %v5400_v6  ;;  %v879_v49 = vmul.f32 %v4476_v40, %v5404_v50 }
 0x107   : > { %v1090_v38 = vpack.c.bf16 %v876_v1, %v875_v9  ;;  %v880_v52 = vmul.f32 %v4476_v40, %v5410_v60  ;;  %v881_v11 = vmul.f32 %v4476_v40, %v5415_v19  ;;  %v882_v3 = vmul.f32 %v4476_v40, %v5420_v56  ;;  %v4308_v19 = vld [vmem:[%s6400_s4] sm:$0xff]  }
 0x108   : > { %v1091_v51 = vpack.c.bf16 %v878_v48, %v877_v0  ;;  %v883_v30 = vmul.f32 %v4476_v40, %v5424_v20  ;;  %v884_v25 = vmul.f32 %v4476_v40, %v5429_v57  ;;  %v885_v6 = vmul.f32 %v4476_v40, %v5434_v32  ;;  %4101 = vmatprep.subr.bf16.mxu0 %v4308_v19 }
 0x109   : > { %v1092_v54 = vpack.c.bf16 %v880_v52, %v879_v49  ;;  %v1093_v16 = vpack.c.bf16 %v882_v3, %v881_v11  ;;  %v886_v50 = vmul.f32 %v4476_v40, %v5439_v37  ;;  %4255 = vmatprep.subr.bf16.mxu1 %v4308_v19  ;;  %4102 = vmatpush3.bf16.msra.mxu0 %v4308_v19 }
 0x10a   : > { %v1094_v28 = vpack.c.bf16 %v884_v25, %v883_v30  ;;  %4257 = vmatpush3.bf16.msra.mxu1 %v4308_v19 }
 0x10b   : > { %4072 = vmatmul.mubr.bf16.gmra.mxu0 %v1083_v63  ;;  %v1095_v60 = vpack.c.bf16 %v886_v50, %v885_v6 }
 0x10c   : > { %4075 = vmatprep.mubr.bf16.mxu0 %v1084_v18 }
 0x113   : > { %4076 = vmatmul.mubr.bf16.gmra.mxu0 %v1085_v15 }
 0x114   : > { %4079 = vmatprep.mubr.bf16.mxu0 %v1086_v27 }
 0x11b   : > { %4080 = vmatmul.mubr.bf16.gmra.mxu0 %v1087_v29 }
 0x11c   : > { %4083 = vmatprep.mubr.bf16.mxu0 %v1088_v5 }
 0x123   : > { %4084 = vmatmul.mubr.bf16.gmra.mxu0 %v1089_v61 }
 0x124   : > { %4087 = vmatprep.mubr.bf16.mxu0 %v1090_v38 }
 0x12b   : > { %4088 = vmatmul.mubr.bf16.gmra.mxu0 %v1091_v51 }
 0x12c   : > { %4091 = vmatprep.mubr.bf16.mxu0 %v1092_v54 }
 0x133   : > { %4092 = vmatmul.mubr.bf16.gmra.mxu0 %v1093_v16 }
 0x134   : > { %4095 = vmatprep.mubr.bf16.mxu0 %v1094_v28 }
 0x13b   : > { %4096 = vmatmul.mubr.bf16.gmra.mxu0 %v1095_v60 }
 0x142   : > { %v5537_v11 = vpop.permute.xlu0 %1576 }
 0x1c3   : > { %v5483_v56 = vpop.f32.mrf.mxu0 }
 0x1c4   : > { %v1267_v57 = vmul.f32 %v5483_v56, %v5483_v56 }
 0x1c5   : > { %v5485_v20 = vpop.f32.mrf.mxu0 }
 0x1c6   : > { %v1265_v37 = vmul.f32 %v5485_v20, %v5485_v20  ;;  %v1306_v14 = vsel %vm919_vm0, %v1267_v57, 0.0 }
 0x1c7   : > { %v5489_v32 = vpop.f32.mrf.mxu0 }
 0x1c8   : > { %v1268_v47 = vmul.f32 %v5489_v32, %v5489_v32  ;;  %v1297_v31 = vsel %vm919_vm0, %v1265_v37, 0.0 }
 0x1c9   : > { %v5495_v8 = vpop.f32.mrf.mxu0 }
 0x1ca   : > { %v1307_v36 = vsel %vm919_vm0, %v1268_v47, 0.0  ;;  %v1266_v45 = vmul.f32 %v5495_v8, %v5495_v8 }
 0x1cb   : > { %v1308_v21 = vadd.f32 %v1307_v36, %v1306_v14  ;;  %v5501_v39 = vpop.f32.mrf.mxu0 }
 0x1cc   : > { %v1298_v40 = vsel %vm919_vm0, %v1266_v45, 0.0  ;;  %v1271_v2 = vmul.f32 %v5501_v39, %v5501_v39 }
 0x1cd   : > { %v1309_v13 = vrot.slane %v1308_v21, 4  ;;  %v1299_v46 = vadd.f32 %v1298_v40, %v1297_v31  ;;  %v5505_v12 = vpop.f32.mrf.mxu0 }
 0x1ce   : > { %v1269_v22 = vmul.f32 %v5505_v12, %v5505_v12  ;;  %v1324_v17 = vsel %vm919_vm0, %v1271_v2, 0.0  ;;  %v1585_v2 = vpop.permute.xlu0 %1584 }
 0x1cf   : > { %v1310_v33 = vadd.f32 %v1309_v13, %v1308_v21  ;;  %v1300_v7 = vrot.slane %v1299_v46, 4  ;;  %v5509_v62 = vpop.f32.mrf.mxu0 }
 0x1d0   : > { %v1272_v43 = vmul.f32 %v5509_v62, %v5509_v62  ;;  %v1315_v15 = vsel %vm919_vm0, %v1269_v22, 0.0 }
 0x1d1   : > { %v1311_v35 = vrot.slane %v1310_v33, 2  ;;  %v1301_v41 = vadd.f32 %v1300_v7, %v1299_v46  ;;  %v5515_v44 = vpop.f32.mrf.mxu0 }
 0x1d2   : > { %v1325_v63 = vsel %vm919_vm0, %v1272_v43, 0.0  ;;  %v1270_v18 = vmul.f32 %v5515_v44, %v5515_v44  ;;  %v6452_v43 = vld [vmem:[#allocation7_spill] sm:$0xff] }
 0x1d3   : > { %v1312_v26 = vadd.f32 %v1311_v35, %v1310_v33  ;;  %v1302_v4 = vrot.slane %v1301_v41, 2  ;;  %v1326_v42 = vadd.f32 %v1325_v63, %v1324_v17  ;;  %v5521_v10 = vpop.f32.mrf.mxu0  ;;  %v1590_v35 = vrot.slane %v1585_v2, %v6452_v43  ;;  %v5558_v17 = vpop.permute.xlu1 %1592 }
 0x1d4   : > { %v1316_v27 = vsel %vm919_vm0, %v1270_v18, 0.0  ;;  %v1275_v5 = vmul.f32 %v5521_v10, %v5521_v10 }
 0x1d5   : > { %v1313_v53 = vrot.slane %v1312_v26, 1  ;;  %v1303_v55 = vadd.f32 %v1302_v4, %v1301_v41  ;;  %v1327_v58 = vrot.slane %v1326_v42, 4  ;;  %v1317_v24 = vadd.f32 %v1316_v27, %v1315_v15  ;;  %v5525_v29 = vpop.f32.mrf.mxu0 }
 0x1d6   : > { %v1273_v38 = vmul.f32 %v5525_v29, %v5525_v29  ;;  %v1342_v3 = vsel %vm919_vm0, %v1275_v5, 0.0 }
 0x1d7   : > { %v1314_v34 = vadd.f32 %v1313_v53, %v1312_v26  ;;  %v1304_v23 = vrot.slane %v1303_v55, 1  ;;  %v1328_v9 = vadd.f32 %v1327_v58, %v1326_v42  ;;  %v1318_v1 = vrot.slane %v1317_v24, 4  ;;  %v5529_v61 = vpop.f32.mrf.mxu0 }
 0x1d8   : > { %v1276_v0 = vmul.f32 %v5529_v61, %v5529_v61  ;;  %v1333_v60 = vsel %vm919_vm0, %v1273_v38, 0.0 }
 0x1d9   : > { %v1442_v48 = vmax.f32 %v1314_v34, 1e-24  ;;  %v1305_v49 = vadd.f32 %v1304_v23, %v1303_v55  ;;  %v1329_v52 = vrot.slane %v1328_v9, 2  ;;  %v1319_v51 = vadd.f32 %v1318_v1, %v1317_v24  ;;  %v5535_v54 = vpop.f32.mrf.mxu0 }
 0x1da   : > { %v1343_v30 = vsel %vm919_vm0, %v1276_v0, 0.0  ;;  %v1274_v25 = vmul.f32 %v5535_v54, %v5535_v54 }
 0x1db   : > { %4477 = vrsqrt.f32 %v1442_v48  ;;  %v1441_v16 = vmax.f32 %v1305_v49, 1e-24  ;;  %v1330_v28 = vadd.f32 %v1329_v52, %v1328_v9  ;;  %v1320_v6 = vrot.slane %v1319_v51, 2  ;;  %v5543_v50 = vpop.f32.mrf.mxu0 }
 0x1dc   : > { %v1344_v19 = vadd.f32 %v1343_v30, %v1342_v3  ;;  %v1334_v57 = vsel %vm919_vm0, %v1274_v25, 0.0  ;;  %v1279_v21 = vmul.f32 %v5543_v50, %v5543_v50  ;;  %v1601_v3 = vpop.permute.xlu1 %1600 }
 0x1dd   : > { %4479 = vrsqrt.f32 %v1441_v16  ;;  %v1331_v37 = vrot.slane %v1330_v28, 1  ;;  %v1321_v47 = vadd.f32 %v1320_v6, %v1319_v51  ;;  %v1335_v14 = vadd.f32 %v1334_v57, %v1333_v60  ;;  %v5547_v36 = vpop.f32.mrf.mxu0 }
 0x1de   : > { %v1345_v45 = vrot.slane %v1344_v19, 4  ;;  %v1277_v7 = vmul.f32 %v5547_v36, %v5547_v36  ;;  %v1360_v42 = vsel %vm919_vm0, %v1279_v21, 0.0  ;;  %v1582_v51 = vrot.slane %v5537_v11, %v6452_v43 }
 0x1df   : > { %v1332_v31 = vadd.f32 %v1331_v37, %v1330_v28  ;;  %v1322_v40 = vrot.slane %v1321_v47, 1  ;;  %v1336_v13 = vrot.slane %v1335_v14, 4  ;;  %v5551_v46 = vpop.f32.mrf.mxu0  ;;  %v1606_v60 = vrot.slane %v1601_v3, %v6452_v43 }
 0x1e0   : > { %v1346_v33 = vadd.f32 %v1345_v45, %v1344_v19  ;;  %v1280_v22 = vmul.f32 %v5551_v46, %v5551_v46  ;;  %v1351_v34 = vsel %vm919_vm0, %v1277_v7, 0.0  ;;  %v1598_v3 = vrot.slane %v5558_v17, %v6452_v43 }
 0x1e1   : > { %v1444_v41 = vmax.f32 %v1332_v31, 1e-24  ;;  %v1323_v63 = vadd.f32 %v1322_v40, %v1321_v47  ;;  %v1337_v18 = vadd.f32 %v1336_v13, %v1335_v14  ;;  %v5560_v26 = vpop.f32.mrf.mxu0 }
 0x1e2   : > { %v1347_v4 = vrot.slane %v1346_v33, 2  ;;  %v1361_v15 = vsel %vm919_vm0, %v1280_v22, 0.0  ;;  %v1278_v27 = vmul.f32 %v5560_v26, %v5560_v26 }
 0x1e3   : > { %4481 = vrsqrt.f32 %v1444_v41  ;;  %v1443_v53 = vmax.f32 %v1323_v63, 1e-24  ;;  %v1338_v55 = vrot.slane %v1337_v18, 2  ;;  %v1362_v58 = vadd.f32 %v1361_v15, %v1360_v42  ;;  %v5566_v24 = vpop.f32.mrf.mxu0 }
 0x1e4   : > { %v1348_v5 = vadd.f32 %v1347_v4, %v1346_v33  ;;  %v1352_v23 = vsel %vm919_vm0, %v1278_v27, 0.0  ;;  %v1283_v9 = vmul.f32 %v5566_v24, %v5566_v24 }
 0x1e5   : > { %4483 = vrsqrt.f32 %v1443_v53  ;;  %v1339_v1 = vadd.f32 %v1338_v55, %v1337_v18  ;;  %v1363_v38 = vrot.slane %v1362_v58, 4  ;;  %v1353_v0 = vadd.f32 %v1352_v23, %v1351_v34  ;;  %v5572_v48 = vpop.f32.mrf.mxu0  ;;  %v5604_v55 = vpop.permute.xlu0 %1608 }
 0x1e6   : > { %v1349_v49 = vrot.slane %v1348_v5, 1  ;;  %v1281_v52 = vmul.f32 %v5572_v48, %v5572_v48  ;;  %v1378_v57 = vsel %vm919_vm0, %v1283_v9, 0.0 }
 0x1e7   : > { %v1340_v30 = vrot.slane %v1339_v1, 1  ;;  %v1364_v25 = vadd.f32 %v1363_v38, %v1362_v58  ;;  %v1354_v16 = vrot.slane %v1353_v0, 4  ;;  %v5578_v28 = vpop.f32.mrf.mxu0 }
 0x1e8   : > { %v4478_v6 = vpop.eup %4477  ;;  %v1350_v19 = vadd.f32 %v1349_v49, %v1348_v5  ;;  %v1284_v37 = vmul.f32 %v5578_v28, %v5578_v28  ;;  %v1369_v13 = vsel %vm919_vm0, %v1281_v52, 0.0 }
 0x1e9   : > { %v1704_v47 = vmul.f32 %v4478_v6, %v1590_v35  ;;  %v1341_v14 = vadd.f32 %v1340_v30, %v1339_v1  ;;  %v1365_v45 = vrot.slane %v1364_v25, 2  ;;  %v1355_v21 = vadd.f32 %v1354_v16, %v1353_v0  ;;  %v5584_v11 = vpop.f32.mrf.mxu0 }
 0x1ea   : > { %v4480_v31 = vpop.eup %4479  ;;  %v1446_v40 = vmax.f32 %v1350_v19, 1e-24  ;;  %v1379_v2 = vsel %vm919_vm0, %v1284_v37, 0.0  ;;  %v1282_v33 = vmul.f32 %v5584_v11, %v5584_v11 }
 0x1eb   : > { %v1703_v7 = vmul.f32 %v4480_v31, %v1582_v51  ;;  %v5591_v22 = vmul.f32 %v5483_v56, %v1704_v47  ;;  %v5594_v35 = vmul.f32 %v5489_v32, %v1704_v47  ;;  %v1445_v41 = vmax.f32 %v1341_v14, 1e-24  ;;  %v5596_v63 = vpop.f32.mrf.mxu0 }
 0x1ec   : > { %4485 = vrsqrt.f32 %v1446_v40  ;;  %v1366_v18 = vadd.f32 %v1365_v45, %v1364_v25  ;;  %v1356_v4 = vrot.slane %v1355_v21, 2  ;;  %v1380_v42 = vadd.f32 %v1379_v2, %v1378_v57 }
 0x1ed   : > { %v1719_v15 = vmul.f32 %v1703_v7, %v5485_v20  ;;  %v1720_v27 = vmul.f32 %v1703_v7, %v5495_v8  ;;  %v1752_v53 = vpack.c.bf16 %v5594_v35, %v5591_v22  ;;  %4487 = vrsqrt.f32 %v1445_v41  ;;  %v5602_v56 = vpop.f32.mrf.mxu0 }
 0x1ee   : > { %v1367_v32 = vrot.slane %v1366_v18, 1  ;;  %v1357_v58 = vadd.f32 %v1356_v4, %v1355_v21  ;;  %v1381_v5 = vrot.slane %v1380_v42, 4  ;;  %v1370_v34 = vsel %vm919_vm0, %v1282_v33, 0.0 }
 0x1ef   : > { %v1751_v23 = vpack.c.bf16 %v1720_v27, %v1719_v15  ;;  %v1371_v9 = vadd.f32 %v1370_v34, %v1369_v13  ;;  %v1287_v20 = vmul.f32 %v5596_v63, %v5596_v63  ;;  %v1285_v8 = vmul.f32 %v5602_v56, %v5602_v56  ;;  %v5611_v1 = vpop.f32.mrf.mxu0  ;;  %v5632_v13 = vpop.permute.xlu0 %1624 }
 0x1f0   : > { %v4482_v38 = vpop.eup %4481  ;;  %v1368_v0 = vadd.f32 %v1367_v32, %v1366_v18  ;;  %v1358_v49 = vrot.slane %v1357_v58, 1  ;;  %v1382_v52 = vadd.f32 %v1381_v5, %v1380_v42  ;;  %v1288_v51 = vmul.f32 %v5611_v1, %v5611_v1 }
 0x1f1   : > { %v1706_v30 = vmul.f32 %v4482_v38, %v1606_v60  ;;  %v1372_v25 = vrot.slane %v1371_v9, 4  ;;  %v1396_v16 = vsel %vm919_vm0, %v1287_v20, 0.0  ;;  %v5618_v6 = vpop.f32.mrf.mxu0  ;;  %4103 = vmatprep.mubr.msk.bf16.mxu0 %vm919_vm0, %v1751_v23  ;;  %v1387_v60 = vsel %vm919_vm0, %v1285_v8, 0.0 }
 0x1f2   : > { %v4484_v19 = vpop.eup %4483  ;;  %v1448_v57 = vmax.f32 %v1368_v0, 1e-24  ;;  %v1359_v37 = vadd.f32 %v1358_v49, %v1357_v58  ;;  %v1383_v47 = vrot.slane %v1382_v52, 2  ;;  %v1397_v14 = vsel %vm919_vm0, %v1288_v51, 0.0  ;;  %4104 = vmatmul.mubr.msk.bf16.vlgmr.msra.gmra.mxu0 %vm919_vm0, %v1752_v53 }
 0x1f3   : > { %v1705_v45 = vmul.f32 %v4484_v19, %v1598_v3  ;;  %v5624_v21 = vmul.f32 %v5501_v39, %v1706_v30  ;;  %v1373_v17 = vadd.f32 %v1372_v25, %v1371_v9  ;;  %v5627_v31 = vpop.f32.mrf.mxu0  ;;  %v5630_v40 = vmul.f32 %v5509_v62, %v1706_v30  ;;  %v1617_v39 = vpop.permute.xlu1 %1616 }
 0x1f4   : > { %v1447_v2 = vmax.f32 %v1359_v37, 1e-24  ;;  %v1384_v33 = vadd.f32 %v1383_v47, %v1382_v52  ;;  %v1398_v7 = vadd.f32 %v1397_v14, %v1396_v16  ;;  %4489 = vrsqrt.f32 %v1448_v57 }
 0x1f5   : > { %v1723_v41 = vmul.f32 %v1705_v45, %v5505_v12  ;;  %v5636_v18 = vmul.f32 %v1705_v45, %v5515_v44  ;;  %v1374_v4 = vrot.slane %v1373_v17, 2  ;;  %v5638_v42 = vpop.f32.mrf.mxu0  ;;  %v1286_v62 = vmul.f32 %v5618_v6, %v5618_v6 }
 0x1f6   : > { %4491 = vrsqrt.f32 %v1447_v2  ;;  %v1385_v53 = vrot.slane %v1384_v33, 1  ;;  %v1399_v32 = vrot.slane %v1398_v7, 4  ;;  %v2578_v34 = vmul.f32 %v1720_v27, %v1720_v27  ;;  %v5655_v27 = vpop.permute.xlu0 %1640 }
 0x1f7   : > { %v1753_v58 = vpack.c.bf16 %v5636_v18, %v1723_v41  ;;  %v1375_v5 = vadd.f32 %v1374_v4, %v1373_v17  ;;  %v2577_v23 = vmul.f32 %v1719_v15, %v1719_v15  ;;  %v5643_v12 = vpop.f32.mrf.mxu0  ;;  %v1754_v44 = vpack.c.bf16 %v5630_v40, %v5624_v21  ;;  %v1633_v37 = vpop.permute.xlu1 %1632 }
 0x1f8   : > { %v5647_v9 = vadd.f32 %v1385_v53, %v1384_v33  ;;  %v1400_v20 = vadd.f32 %v1399_v32, %v1398_v7  ;;  %v1388_v8 = vsel %vm919_vm0, %v1286_v62, 0.0  ;;  %v2612_v52 = vsel %vm919_vm0, %v2578_v34, 0.0 }
 0x1f9   : > { %v4486_v38 = vpop.eup %4485  ;;  %v1376_v0 = vrot.slane %v1375_v5, 1  ;;  %v1389_v49 = vadd.f32 %v1388_v8, %v1387_v60  ;;  %v2609_v51 = vsel %vm919_vm0, %v2577_v23, 0.0  ;;  %v5652_v3 = vpop.f32.mrf.mxu0  ;;  %4107 = vmatprep.mubr.msk.bf16.mxu0 %vm919_vm0, %v1753_v58  ;;  %v1622_v30 = vrot.slane %v1617_v39, %v6452_v43  ;;  %2613 = vadd.xlane.f32.xlu1 %v2612_v52 }
 0x1fa   : > { %v4488_v15 = vpop.eup %4487  ;;  %v1401_v25 = vrot.slane %v1400_v20, 2  ;;  %2610 = vadd.xlane.f32.xlu0 %v2609_v51  ;;  %v1291_v16 = vmul.f32 %v5627_v31, %v5627_v31  ;;  %v1614_v19 = vrot.slane %v5604_v55, %v6452_v43  ;;  %v1630_v57 = vrot.slane %v5632_v13, %v6452_v43  ;;  %4108 = vmatmul.mubr.msk.bf16.gmra.mxu0 %vm919_vm0, %v1754_v44 }
 0x1fb   : > { %v1377_v47 = vadd.f32 %v1376_v0, %v1375_v5  ;;  %v1390_v14 = vrot.slane %v1389_v49, 4  ;;  %v5665_v45 = vpop.f32.mrf.mxu0  ;;  %v1646_v17 = vrot.slane %v5655_v27, %v6452_v43  ;;  %v1708_v60 = vmul.f32 %v4486_v38, %v1622_v30 }
 0x1fc   : > { %v1638_v2 = vrot.slane %v1633_v37, %v6452_v43  ;;  %v1402_v33 = vadd.f32 %v1401_v25, %v1400_v20  ;;  %v1450_v7 = vmax.f32 %v5647_v9, 1e-24  ;;  %v1289_v13 = vmul.f32 %v5638_v42, %v5638_v42 }
 0x1fd   : > { %v1449_v55 = vmax.f32 %v1377_v47, 1e-24  ;;  %v1391_v39 = vadd.f32 %v1390_v14, %v1389_v49  ;;  %v5673_v4 = vpop.f32.mrf.mxu0  ;;  %v1414_v32 = vsel %vm919_vm0, %v1291_v16, 0.0  ;;  %v2579_v62 = vmul.f32 %v5591_v22, %v5591_v22 }
 0x1fe   : > { %v1403_v53 = vrot.slane %v1402_v33, 1  ;;  %v1292_v58 = vmul.f32 %v5643_v12, %v5643_v12  ;;  %v5680_v5 = vmul.f32 %v4488_v15, %v1614_v19  ;;  %v1290_v23 = vmul.f32 %v5652_v3, %v5652_v3 }
 0x1ff   : > { %4493 = vrsqrt.f32 %v1449_v55  ;;  %v1392_v34 = vrot.slane %v1391_v39, 2  ;;  %v2615_v44 = vsel %vm919_vm0, %v2579_v62, 0.0  ;;  %v2580_v20 = vmul.f32 %v5594_v35, %v5594_v35  ;;  %v5690_v52 = vpop.f32.mrf.mxu0 }
 0x200   : > { %v1415_v9 = vsel %vm919_vm0, %v1292_v58, 0.0  ;;  %v2581_v8 = vmul.f32 %v1723_v41, %v1723_v41  ;;  %v1405_v22 = vsel %vm919_vm0, %v1289_v13, 0.0  ;;  %2616 = vadd.xlane.f32.xlu0 %v2615_v44  ;;  %v1406_v49 = vsel %vm919_vm0, %v1290_v23, 0.0 }
 0x201   : > { %v1393_v38 = vadd.f32 %v1392_v34, %v1391_v39  ;;  %v1416_v0 = vadd.f32 %v1415_v9, %v1414_v32  ;;  %v4490_v51 = vpop.eup %4489  ;;  %v5693_v15 = vmul.f32 %v5521_v10, %v1708_v60  ;;  %v1404_v30 = vadd.f32 %v1403_v53, %v1402_v33 }
 0x202   : > { %v1407_v25 = vadd.f32 %v1406_v49, %v1405_v22  ;;  %v2621_v16 = vsel %vm919_vm0, %v2581_v8, 0.0  ;;  %v5697_v35 = vmul.f32 %v5529_v61, %v1708_v60  ;;  %v1295_v47 = vmul.f32 %v5665_v45, %v5665_v45  ;;  %v5704_v61 = vpop.f32.mrf.mxu0  ;;  %v1649_v22 = vpop.permute.xlu1 %1648 }
 0x203   : > { %v4492_v19 = vpop.eup %4491  ;;  %v1394_v41 = vrot.slane %v1393_v38, 1  ;;  %v1417_v37 = vrot.slane %v1416_v0, 4  ;;  %2622 = vadd.xlane.f32.xlu1 %v2621_v16  ;;  %v1728_v14 = vmul.f32 %v5680_v5, %v5535_v54  ;;  %4495 = vrsqrt.f32 %v1450_v7 }
 0x204   : > { %v1709_v55 = vmul.f32 %v4492_v19, %v1630_v57  ;;  %v2618_v10 = vsel %vm919_vm0, %v2580_v20, 0.0  ;;  %v1710_v33 = vmul.f32 %v4490_v51, %v1638_v2  ;;  %v1408_v53 = vrot.slane %v1407_v25, 4 }
 0x205   : > { %v1395_v39 = vadd.f32 %v1394_v41, %v1393_v38  ;;  %v1418_v13 = vadd.f32 %v1417_v37, %v1416_v0  ;;  %2619 = vadd.xlane.f32.xlu0 %v2618_v10  ;;  %v1452_v32 = vmax.f32 %v1404_v30, 1e-24  ;;  %v1432_v62 = vsel %vm919_vm0, %v1295_v47, 0.0 }
 0x206   : > { %v5707_v60 = vmul.f32 %v1709_v55, %v5547_v36  ;;  %v1293_v54 = vmul.f32 %v5673_v4, %v5673_v4  ;;  %v1409_v58 = vadd.f32 %v1408_v53, %v1407_v25  ;;  %v2582_v2 = vmul.f32 %v5636_v18, %v5636_v18 }
 0x207   : > { %v1451_v57 = vmax.f32 %v1395_v39, 1e-24  ;;  %v1419_v7 = vrot.slane %v1418_v13, 2  ;;  %v5715_v34 = vmul.f32 %v1709_v55, %v5560_v26  ;;  %v2583_v23 = vmul.f32 %v5624_v21, %v5624_v21 }
 0x208   : > { %v1296_v36 = vmul.f32 %v5690_v52, %v5690_v52  ;;  %v1294_v44 = vmul.f32 %v5704_v61, %v5704_v61  ;;  %v1410_v20 = vrot.slane %v1409_v58, 2  ;;  %v2624_v8 = vsel %vm919_vm0, %v2582_v2, 0.0 }
 0x209   : > { %4497 = vrsqrt.f32 %v1451_v57  ;;  %v1420_v9 = vadd.f32 %v1419_v7, %v1418_v13  ;;  %v1423_v38 = vsel %vm919_vm0, %v1293_v54, 0.0  ;;  %2625 = vadd.xlane.f32.xlu0 %v2624_v8  ;;  %v2627_v26 = vsel %vm919_vm0, %v2583_v23, 0.0 }
 0x20a   : > { %v1433_v18 = vsel %vm919_vm0, %v1296_v36, 0.0  ;;  %v1424_v21 = vsel %vm919_vm0, %v1294_v44, 0.0  ;;  %v1411_v49 = vadd.f32 %v1410_v20, %v1409_v58  ;;  %2628 = vadd.xlane.f32.xlu1 %v2627_v26  ;;  %v1654_v16 = vrot.slane %v1649_v22, %v6452_v43 }
 0x20b   : > { %v1421_v0 = vrot.slane %v1420_v9, 1  ;;  %v1434_v51 = vadd.f32 %v1433_v18, %v1432_v62  ;;  %v1425_v30 = vadd.f32 %v1424_v21, %v1423_v38  ;;  %v1727_v19 = vmul.f32 %v5680_v5, %v5525_v29 }
 0x20c   : > { %v4494_v25 = vpop.eup %4493  ;;  %v2584_v41 = vmul.f32 %v5630_v40, %v5630_v40  ;;  %4499 = vrsqrt.f32 %v1452_v32  ;;  %v1412_v47 = vrot.slane %v1411_v49, 1  ;;  %v1757_v10 = vpack.c.bf16 %v5715_v34, %v5707_v60 }
 0x20d   : > { %v1711_v37 = vmul.f32 %v4494_v25, %v1646_v17  ;;  %v1435_v55 = vrot.slane %v1434_v51, 4  ;;  %v1426_v39 = vrot.slane %v1425_v30, 4  ;;  %v1755_v13 = vpack.c.bf16 %v1728_v14, %v1727_v19 }
 0x20e   : > { %v2630_v53 = vsel %vm919_vm0, %v2584_v41, 0.0  ;;  %v1756_v29 = vpack.c.bf16 %v5697_v35, %v5693_v15  ;;  %v1733_v5 = vmul.f32 %v5543_v50, %v1710_v33  ;;  %v1422_v40 = vadd.f32 %v1421_v0, %v1420_v9 }
 0x20f   : > { %v1413_v62 = vadd.f32 %v1412_v47, %v1411_v49  ;;  %2631 = vadd.xlane.f32.xlu0 %v2630_v53  ;;  %v1436_v27 = vadd.f32 %v1435_v55, %v1434_v51  ;;  %v1427_v17 = vadd.f32 %v1426_v39, %v1425_v30  ;;  %4111 = vmatprep.mubr.msk.bf16.mxu1 %vm919_vm0, %v1755_v13  ;;  %v1665_v39 = vpop.permute.xlu1 %1664 }
 0x210   : > { %v2585_v32 = vmul.f32 %v1727_v19, %v1727_v19  ;;  %v2586_v54 = vmul.f32 %v1728_v14, %v1728_v14  ;;  %v4496_v57 = vpop.eup %4495  ;;  %v1734_v7 = vmul.f32 %v5551_v46, %v1710_v33  ;;  %v1735_v58 = vmul.f32 %v1711_v37, %v5572_v48  ;;  %4112 = vmatmul.mubr.msk.bf16.vlgmr.msra.gmra.mxu1 %vm919_vm0, %v1756_v29 }
 0x211   : > { %v1736_v2 = vmul.f32 %v1711_v37, %v5584_v11  ;;  %v1453_v23 = vmax.f32 %v1413_v62, 1e-24  ;;  %v1437_v50 = vrot.slane %v1436_v27, 2  ;;  %v1428_v36 = vrot.slane %v1427_v17, 2  ;;  %4115 = vmatprep.mubr.msk.bf16.mxu1 %vm919_vm0, %v1757_v10  ;;  %v1657_v11 = vpop.permute.xlu0 %1656 }
 0x212   : > { %v2633_v44 = vsel %vm919_vm0, %v2585_v32, 0.0  ;;  %v2587_v9 = vmul.f32 %v5693_v15, %v5693_v15  ;;  %v1454_v14 = vmax.f32 %v1422_v40, 1e-24  ;;  %v2636_v46 = vsel %vm919_vm0, %v2586_v54, 0.0  ;;  %v4309_v54 = vld [vmem:[%s6400_s4 + $0x18] sm:$0xff]  }
 0x213   : > { %4501 = vrsqrt.f32 %v1453_v23  ;;  %2634 = vadd.xlane.f32.xlu1 %v2633_v44  ;;  %v2588_v48 = vmul.f32 %v5697_v35, %v5697_v35  ;;  %v1438_v33 = vadd.f32 %v1437_v50, %v1436_v27  ;;  %v1429_v20 = vadd.f32 %v1428_v36, %v1427_v17  ;;  %2637 = vadd.xlane.f32.xlu0 %v2636_v46 }
 0x214   : > { %v1662_v8 = vrot.slane %v1657_v11, %v6452_v43  ;;  %v1758_v38 = vpack.c.bf16 %v1734_v7, %v1733_v5  ;;  %v1712_v26 = vmul.f32 %v4496_v57, %v1654_v16  ;;  %v2589_v15 = vmul.f32 %v5707_v60, %v5707_v60  ;;  %4135 = vmatprep.subr.bf16.mxu1 %v4309_v54 }
 0x215   : > { %v1759_v21 = vpack.c.bf16 %v1736_v2, %v1735_v58  ;;  %v1439_v22 = vrot.slane %v1438_v33, 1  ;;  %v1430_v0 = vrot.slane %v1429_v20, 1  ;;  %v2639_v49 = vsel %vm919_vm0, %v2587_v9, 0.0  ;;  %v1673_v62 = vpop.permute.xlu0 %1672  ;;  %4136 = vmatpush3.bf16.msra.mxu1 %v4309_v54  ;;  %v5818_v54 = vld [vmem:[%s6405_s9] sm:$0x7f] }
 0x216   : > { %v4498_v18 = vpop.eup %4497  ;;  %4503 = vrsqrt.f32 %v1454_v14  ;;  %v2642_v35 = vsel %vm919_vm0, %v2588_v48, 0.0  ;;  %v2590_v30 = vmul.f32 %v5715_v34, %v5715_v34  ;;  %v2645_v16 = vsel %vm919_vm0, %v2589_v15, 0.0  ;;  %v1681_v48 = vpop.permute.xlu1 %1680 }
 0x217   : > { %v1713_v51 = vmul.f32 %v4498_v18, %v1662_v8  ;;  %2640 = vadd.xlane.f32.xlu1 %v2639_v49  ;;  %v1440_v25 = vadd.f32 %v1439_v22, %v1438_v33  ;;  %v1431_v19 = vadd.f32 %v1430_v0, %v1429_v20  ;;  %2643 = vadd.xlane.f32.xlu0 %v2642_v35 }
 0x218   : > { %v1737_v60 = vmul.f32 %v5566_v24, %v1712_v26  ;;  %4116 = vmatmul.mubr.msk.bf16.gmra.mxu1 %vm919_vm0, %v1758_v38  ;;  %v2591_v10 = vmul.f32 %v1733_v5, %v1733_v5  ;;  %v1738_v34 = vmul.f32 %v5578_v28, %v1712_v26  ;;  %v2648_v53 = vsel %vm919_vm0, %v2590_v30, 0.0 }
 0x219   : > { %v4500_v41 = vpop.eup %4499  ;;  %v1739_v37 = vmul.f32 %v1713_v51, %v5602_v56  ;;  %v1740_v47 = vmul.f32 %v1713_v51, %v5618_v6  ;;  %v1455_v55 = vmax.f32 %v1431_v19, 1e-24  ;;  %4119 = vmatprep.mubr.msk.bf16.mxu1 %vm919_vm0, %v1759_v21  ;;  %v1456_v13 = vmax.f32 %v1440_v25, 1e-24  ;;  %v1689_v33 = vpop.permute.xlu0 %1688 }
 0x21a   : > { %v2592_v29 = vmul.f32 %v1734_v7, %v1734_v7  ;;  %v1670_v24 = vrot.slane %v1665_v39, %v6452_v43  ;;  %v2593_v40 = vmul.f32 %v1735_v58, %v1735_v58  ;;  %v1678_v56 = vrot.slane %v1673_v62, %v6452_v43  ;;  %v1697_v21 = vpop.permute.xlu1 %1696 }
 0x21b   : > { %2646 = vadd.xlane.f32.xlu1 %v2645_v16  ;;  %2649 = vadd.xlane.f32.xlu0 %v2648_v53  ;;  %4505 = vrsqrt.f32 %v1455_v55  ;;  %v1761_v5 = vpack.c.bf16 %v1740_v47, %v1739_v37  ;;  %v2651_v27 = vsel %vm919_vm0, %v2591_v10, 0.0  ;;  %v1760_v17 = vpack.c.bf16 %v1738_v34, %v1737_v60 }
 0x21c   : > { %v1714_v6 = vmul.f32 %v4500_v41, %v1670_v24  ;;  %4507 = vrsqrt.f32 %v1456_v13  ;;  %v2654_v28 = vsel %vm919_vm0, %v2592_v29, 0.0  ;;  %v2594_v32 = vmul.f32 %v1736_v2, %v1736_v2 }
 0x21d   : > { %v2657_v7 = vsel %vm919_vm0, %v2593_v40, 0.0  ;;  %v2595_v36 = vmul.f32 %v1737_v60, %v1737_v60  ;;  %v2596_v14 = vmul.f32 %v1738_v34, %v1738_v34  ;;  %v2597_v11 = vmul.f32 %v1739_v37, %v1739_v37 }
 0x21e   : > { %v1741_v23 = vmul.f32 %v5596_v63, %v1714_v6  ;;  %v1742_v50 = vmul.f32 %v5611_v1, %v1714_v6  ;;  %v2660_v9 = vsel %vm919_vm0, %v2594_v32, 0.0  ;;  %v1686_v63 = vrot.slane %v1681_v48, %v6452_v43  ;;  %v4310_v6 = vld [vmem:[%s6400_s4 + $0x10] sm:$0xff]  }
 0x21f   : > { %2652 = vadd.xlane.f32.xlu1 %v2651_v27  ;;  %2655 = vadd.xlane.f32.xlu0 %v2654_v28  ;;  %v2663_v20 = vsel %vm919_vm0, %v2595_v36, 0.0  ;;  %v2669_v26 = vsel %vm919_vm0, %v2597_v11, 0.0  ;;  %v1694_v15 = vrot.slane %v1689_v33, %v6452_v43  ;;  %v1702_v16 = vrot.slane %v1697_v21, %v6452_v43 }
 0x220   : > { %v4502_v57 = vpop.eup %4501  ;;  %4120 = vmatmul.mubr.msk.bf16.gmra.mxu1 %vm919_vm0, %v1760_v17  ;;  %v1762_v8 = vpack.c.bf16 %v1742_v50, %v1741_v23  ;;  %v2599_v22 = vmul.f32 %v1741_v23, %v1741_v23  ;;  %v2600_v0 = vmul.f32 %v1742_v50, %v1742_v50  ;;  %4137 = vmatprep.subr.bf16.mxu1 %v4310_v6 }
 0x221   : > { %v1715_v58 = vmul.f32 %v4502_v57, %v1678_v56  ;;  %4123 = vmatprep.mubr.msk.bf16.mxu1 %vm919_vm0, %v1761_v5  ;;  %4138 = vmatpush3.bf16.msra.mxu1 %v4310_v6  ;;  %v5822_v57 = vrot.slane %v5818_v54, %v6452_v43 }
 0x222   : > { %v2675_v37 = vsel %vm919_vm0, %v2599_v22, 0.0 }
 0x223   : > { %v1743_v2 = vmul.f32 %v1715_v58, %v5638_v42  ;;  %v1744_v44 = vmul.f32 %v1715_v58, %v5652_v3  ;;  %2658 = vadd.xlane.f32.xlu1 %v2657_v7  ;;  %v4504_v46 = vpop.eup %4503  ;;  %2661 = vadd.xlane.f32.xlu0 %v2660_v9  ;;  %v2666_v42 = vsel %vm919_vm0, %v2596_v14, 0.0  ;;  %v2598_v3 = vmul.f32 %v1740_v47, %v1740_v47 }
 0x224   : > { %v1716_v38 = vmul.f32 %v4504_v46, %v1686_v63  ;;  %v2678_v47 = vsel %vm919_vm0, %v2600_v0, 0.0 }
 0x225   : > { %v1763_v1 = vpack.c.bf16 %v1744_v44, %v1743_v2  ;;  %v2672_v30 = vsel %vm919_vm0, %v2598_v3, 0.0  ;;  %v2601_v19 = vmul.f32 %v1743_v2, %v1743_v2  ;;  %v2602_v10 = vmul.f32 %v1744_v44, %v1744_v44 }
 0x226   : > { %v1745_v49 = vmul.f32 %v5627_v31, %v1716_v38  ;;  %v1746_v51 = vmul.f32 %v5643_v12, %v1716_v38 }
 0x227   : > { %2664 = vadd.xlane.f32.xlu1 %v2663_v20  ;;  %2667 = vadd.xlane.f32.xlu0 %v2666_v42  ;;  %v2681_v39 = vsel %vm919_vm0, %v2601_v19, 0.0  ;;  %v2684_v13 = vsel %vm919_vm0, %v2602_v10, 0.0 }
 0x228   : > { %4124 = vmatmul.mubr.msk.bf16.gmra.mxu1 %vm919_vm0, %v1762_v8  ;;  %v4506_v18 = vpop.eup %4505  ;;  %v1764_v31 = vpack.c.bf16 %v1746_v51, %v1745_v49  ;;  %v2603_v34 = vmul.f32 %v1745_v49, %v1745_v49  ;;  %v2604_v53 = vmul.f32 %v1746_v51, %v1746_v51 }
 0x229   : > { %4127 = vmatprep.mubr.msk.bf16.mxu1 %vm919_vm0, %v1763_v1  ;;  %v1717_v35 = vmul.f32 %v4506_v18, %v1694_v15  ;;  %v4508_v25 = vpop.eup %4507 }
 0x22a   : > { %v1718_v55 = vmul.f32 %v4508_v25, %v1702_v16  ;;  %v2687_v24 = vsel %vm919_vm0, %v2603_v34, 0.0  ;;  %v2690_v62 = vsel %vm919_vm0, %v2604_v53, 0.0 }
 0x22b   : > { %2670 = vadd.xlane.f32.xlu1 %v2669_v26  ;;  %2673 = vadd.xlane.f32.xlu0 %v2672_v30  ;;  %v1747_v60 = vmul.f32 %v1717_v35, %v5673_v4  ;;  %v1748_v41 = vmul.f32 %v1717_v35, %v5704_v61 }
 0x22c   : > { %v1749_v4 = vmul.f32 %v5665_v45, %v1718_v55  ;;  %v1750_v61 = vmul.f32 %v5690_v52, %v1718_v55 }
 0x22d   : > { %v1765_v12 = vpack.c.bf16 %v1748_v41, %v1747_v60  ;;  %v2605_v29 = vmul.f32 %v1747_v60, %v1747_v60  ;;  %v2606_v56 = vmul.f32 %v1748_v41, %v1748_v41 }
 0x22e   : > { %v1766_v40 = vpack.c.bf16 %v1750_v61, %v1749_v4  ;;  %v2607_v52 = vmul.f32 %v1749_v4, %v1749_v4  ;;  %v2608_v27 = vmul.f32 %v1750_v61, %v1750_v61 }
 0x22f   : > { %2676 = vadd.xlane.f32.xlu1 %v2675_v37  ;;  %2679 = vadd.xlane.f32.xlu0 %v2678_v47  ;;  %v2693_v45 = vsel %vm919_vm0, %v2605_v29, 0.0  ;;  %v2696_v5 = vsel %vm919_vm0, %v2606_v56, 0.0 }
 0x230   : > { %4128 = vmatmul.mubr.msk.bf16.gmra.mxu1 %vm919_vm0, %v1764_v31  ;;  %v2699_v17 = vsel %vm919_vm0, %v2607_v52, 0.0  ;;  %v2702_v28 = vsel %vm919_vm0, %v2608_v27, 0.0 }
 0x231   : > { %4131 = vmatprep.mubr.msk.bf16.mxu1 %vm919_vm0, %v1765_v12 }
 0x233   : > { %2682 = vadd.xlane.f32.xlu1 %v2681_v39  ;;  %2685 = vadd.xlane.f32.xlu0 %v2684_v13 }
 0x237   : > { %2688 = vadd.xlane.f32.xlu1 %v2687_v24  ;;  %2691 = vadd.xlane.f32.xlu0 %v2690_v62 }
 0x238   : > { %4132 = vmatmul.mubr.msk.bf16.gmra.mxu1 %vm919_vm0, %v1766_v40 }
 0x23b   : > { %2694 = vadd.xlane.f32.xlu1 %v2693_v45  ;;  %2697 = vadd.xlane.f32.xlu0 %v2696_v5 }
 0x23f   : > { %2700 = vadd.xlane.f32.xlu1 %v2699_v17  ;;  %2703 = vadd.xlane.f32.xlu0 %v2702_v28 }
 0x2b2   : > { %v4105_v32 = vpop.f32.mrf.mxu0 }
 0x2b3   : > { %v1878_v36 = vadd.f32 %v4105_v32, %v5822_v57 }
 0x2b4   : > { %v1869_v7 = vpop.f32.mrf.mxu0 }
 0x2b5   : > { %v1870_v23 = vadd.f32 %v1869_v7, %v5822_v57  ;;  %v1998_v11 = vmax.f32 %v1878_v36, 0.0 }
 0x2b6   : > { %v4106_v58 = vpop.f32.mrf.mxu0 }
 0x2b7   : > { %v1881_v50 = vadd.f32 %v4106_v58, %v5822_v57  ;;  %v1996_v14 = vmax.f32 %v1870_v23, 0.0 }
 0x2b8   : > { %v1872_v2 = vpop.f32.mrf.mxu0 }
 0x2b9   : > { %v1873_v44 = vadd.f32 %v1872_v2, %v5822_v57  ;;  %v1999_v9 = vmax.f32 %v1881_v50, 0.0 }
 0x2ba   : > { %v4109_v48 = vpop.f32.mrf.mxu0 }
 0x2bb   : > { %v1997_v46 = vmax.f32 %v1873_v44, 0.0  ;;  %v2029_v43 = vpack.c.bf16 %v1999_v9, %v1998_v11  ;;  %v1894_v38 = vadd.f32 %v4109_v48, %v5822_v57 }
 0x2bc   : > { %v1885_v33 = vpop.f32.mrf.mxu0 }
 0x2bd   : > { %v2028_v63 = vpack.c.bf16 %v1997_v46, %v1996_v14  ;;  %v1886_v20 = vadd.f32 %v1885_v33, %v5822_v57  ;;  %v2002_v21 = vmax.f32 %v1894_v38, 0.0 }
 0x2be   : > { %v4110_v1 = vpop.f32.mrf.mxu0 }
 0x2bf   : > { %4139 = vmatprep.mubr.msk.bf16.mxu1 %vm919_vm0, %v2028_v63  ;;  %v1897_v8 = vadd.f32 %v4110_v1, %v5822_v57  ;;  %v2000_v15 = vmax.f32 %v1886_v20, 0.0 }
 0x2c0   : > { %4140 = vmatmul.mubr.msk.bf16.vlgmr.msra.gmra.mxu1 %vm919_vm0, %v2029_v43  ;;  %v1888_v42 = vpop.f32.mrf.mxu0 }
 0x2c1   : > { %v1889_v3 = vadd.f32 %v1888_v42, %v5822_v57  ;;  %v2003_v26 = vmax.f32 %v1897_v8, 0.0 }
 0x2c3   : > { %v2001_v18 = vmax.f32 %v1889_v3, 0.0  ;;  %v2031_v0 = vpack.c.bf16 %v2003_v26, %v2002_v21 }
 0x2c5   : > { %v2030_v22 = vpack.c.bf16 %v2001_v18, %v2000_v15 }
 0x2c7   : > { %4143 = vmatprep.mubr.msk.bf16.mxu1 %vm919_vm0, %v2030_v22 }
 0x2c8   : > { %4144 = vmatmul.mubr.msk.bf16.gmra.mxu1 %vm919_vm0, %v2031_v0 }
 0x2d0   : > { %v4113_v49 = vpop.f32.mrf.mxu1 }
 0x2d1   : > { %v1910_v19 = vadd.f32 %v4113_v49, %v5822_v57 }
 0x2d2   : > { %v1901_v51 = vpop.f32.mrf.mxu1 }
 0x2d3   : > { %v1902_v30 = vadd.f32 %v1901_v51, %v5822_v57  ;;  %v2006_v55 = vmax.f32 %v1910_v19, 0.0 }
 0x2d4   : > { %v4114_v35 = vpop.f32.mrf.mxu1 }
 0x2d5   : > { %v1913_v25 = vadd.f32 %v4114_v35, %v5822_v57  ;;  %v2004_v47 = vmax.f32 %v1902_v30, 0.0 }
 0x2d6   : > { %v1904_v16 = vpop.f32.mrf.mxu1 }
 0x2d7   : > { %v1905_v60 = vadd.f32 %v1904_v16, %v5822_v57  ;;  %v2007_v41 = vmax.f32 %v1913_v25, 0.0 }
 0x2d8   : > { %v4117_v37 = vpop.f32.mrf.mxu1 }
 0x2d9   : > { %v2005_v31 = vmax.f32 %v1905_v60, 0.0  ;;  %v2033_v39 = vpack.c.bf16 %v2007_v41, %v2006_v55  ;;  %v1926_v13 = vadd.f32 %v4117_v37, %v5822_v57 }
 0x2da   : > { %v1917_v12 = vpop.f32.mrf.mxu1 }
 0x2db   : > { %v2032_v10 = vpack.c.bf16 %v2005_v31, %v2004_v47  ;;  %v1918_v4 = vadd.f32 %v1917_v12, %v5822_v57  ;;  %v2010_v6 = vmax.f32 %v1926_v13, 0.0 }
 0x2dc   : > { %v4118_v34 = vpop.f32.mrf.mxu1 }
 0x2dd   : > { %v1929_v61 = vadd.f32 %v4118_v34, %v5822_v57  ;;  %4147 = vmatprep.mubr.msk.bf16.mxu1 %vm919_vm0, %v2032_v10  ;;  %v2008_v62 = vmax.f32 %v1918_v4, 0.0 }
 0x2de   : > { %v1920_v53 = vpop.f32.mrf.mxu1  ;;  %4148 = vmatmul.mubr.msk.bf16.gmra.mxu1 %vm919_vm0, %v2033_v39 }
 0x2df   : > { %v1921_v29 = vadd.f32 %v1920_v53, %v5822_v57  ;;  %v2011_v24 = vmax.f32 %v1929_v61, 0.0 }
 0x2e0   : > { %v4121_v40 = vpop.f32.mrf.mxu1 }
 0x2e1   : > { %v2009_v56 = vmax.f32 %v1921_v29, 0.0  ;;  %v2035_v5 = vpack.c.bf16 %v2011_v24, %v2010_v6  ;;  %v1942_v32 = vadd.f32 %v4121_v40, %v5822_v57  ;;  %v2453_v40 = vld [vmem:[%s6401_s5 + $0x18] sm:$0xff]  ;;  %v5887_v6 = vld [vmem:[%s6403_s7 + $0x8] sm:$0xff]  }
 0x2e2   : > { %v1933_v45 = vpop.f32.mrf.mxu1  ;;  %4171 = vmatprep.subr.mxu0 %v2453_v40 }
 0x2e3   : > { %v2034_v52 = vpack.c.bf16 %v2009_v56, %v2008_v62  ;;  %v1934_v17 = vadd.f32 %v1933_v45, %v5822_v57  ;;  %v2014_v44 = vmax.f32 %v1942_v32, 0.0  ;;  %v2452_v62 = vld [vmem:[%s6401_s5 + $0x10] sm:$0xff]  ;;  %4172 = vmatpush3.msra.mxu0 %v2453_v40  ;;  %v2450_v56 = vld [vmem:[%s6401_s5] sm:$0xff]  ;;  %v6453_v32 = vsub.s32 1, %v6451_v59 }
 0x2e4   : > { %v4122_v27 = vpop.f32.mrf.mxu1  ;;  %4173 = vmatprep.subr.mxu0 %v2452_v62 }
 0x2e5   : > { %v1945_v28 = vadd.f32 %v4122_v27, %v5822_v57  ;;  %4151 = vmatprep.mubr.msk.bf16.mxu1 %vm919_vm0, %v2034_v52  ;;  %v2012_v36 = vmax.f32 %v1934_v17, 0.0  ;;  %4174 = vmatpush3.msra.mxu0 %v2452_v62 }
 0x2e6   : > { %v1936_v7 = vpop.f32.mrf.mxu1  ;;  %4152 = vmatmul.mubr.msk.bf16.gmra.mxu1 %vm919_vm0, %v2035_v5 }
 0x2e7   : > { %v1937_v58 = vadd.f32 %v1936_v7, %v5822_v57  ;;  %v2015_v23 = vmax.f32 %v1945_v28, 0.0  ;;  %v5893_v7 = vrot.slane %v5818_v54, %v6453_v32 }
 0x2e8   : > { %v4125_v50 = vpop.f32.mrf.mxu1 }
 0x2e9   : > { %v2013_v2 = vmax.f32 %v1937_v58, 0.0  ;;  %v2037_v46 = vpack.c.bf16 %v2015_v23, %v2014_v44  ;;  %v1958_v33 = vadd.f32 %v4125_v50, %v5822_v57 }
 0x2ea   : > { %v1949_v9 = vpop.f32.mrf.mxu1 }
 0x2eb   : > { %v2036_v14 = vpack.c.bf16 %v2013_v2, %v2012_v36  ;;  %v1950_v11 = vadd.f32 %v1949_v9, %v5822_v57  ;;  %v2018_v3 = vmax.f32 %v1958_v33, 0.0 }
 0x2ec   : > { %v4126_v48 = vpop.f32.mrf.mxu1 }
 0x2ed   : > { %v1961_v63 = vadd.f32 %v4126_v48, %v5822_v57  ;;  %4155 = vmatprep.mubr.msk.bf16.mxu1 %vm919_vm0, %v2036_v14  ;;  %v2016_v38 = vmax.f32 %v1950_v11, 0.0 }
 0x2ee   : > { %v1952_v43 = vpop.f32.mrf.mxu1  ;;  %4156 = vmatmul.mubr.msk.bf16.gmra.mxu1 %vm919_vm0, %v2037_v46 }
 0x2ef   : > { %v1953_v1 = vadd.f32 %v1952_v43, %v5822_v57  ;;  %v2019_v20 = vmax.f32 %v1961_v63, 0.0 }
 0x2f0   : > { %v4129_v8 = vpop.f32.mrf.mxu1 }
 0x2f1   : > { %v2017_v42 = vmax.f32 %v1953_v1, 0.0  ;;  %v2039_v18 = vpack.c.bf16 %v2019_v20, %v2018_v3  ;;  %v1974_v49 = vadd.f32 %v4129_v8, %v5822_v57 }
 0x2f2   : > { %v1965_v26 = vpop.f32.mrf.mxu1 }
 0x2f3   : > { %v2038_v15 = vpack.c.bf16 %v2017_v42, %v2016_v38  ;;  %v1966_v22 = vadd.f32 %v1965_v26, %v5822_v57  ;;  %v2022_v60 = vmax.f32 %v1974_v49, 0.0 }
 0x2f4   : > { %v4130_v21 = vpop.f32.mrf.mxu1 }
 0x2f5   : > { %v1977_v0 = vadd.f32 %v4130_v21, %v5822_v57  ;;  %4159 = vmatprep.mubr.msk.bf16.mxu1 %vm919_vm0, %v2038_v15  ;;  %v2020_v19 = vmax.f32 %v1966_v22, 0.0 }
 0x2f6   : > { %v1968_v51 = vpop.f32.mrf.mxu1  ;;  %4160 = vmatmul.mubr.msk.bf16.gmra.mxu1 %vm919_vm0, %v2039_v18 }
 0x2f7   : > { %v1969_v35 = vadd.f32 %v1968_v51, %v5822_v57  ;;  %v2023_v30 = vmax.f32 %v1977_v0, 0.0 }
 0x2f8   : > { %v4133_v25 = vpop.f32.mrf.mxu1 }
 0x2f9   : > { %v2021_v16 = vmax.f32 %v1969_v35, 0.0  ;;  %v2041_v47 = vpack.c.bf16 %v2023_v30, %v2022_v60  ;;  %v1990_v10 = vadd.f32 %v4133_v25, %v5822_v57 }
 0x2fa   : > { %v1981_v41 = vpop.f32.mrf.mxu1 }
 0x2fb   : > { %v2040_v37 = vpack.c.bf16 %v2021_v16, %v2020_v19  ;;  %v1982_v55 = vadd.f32 %v1981_v41, %v5822_v57  ;;  %v2026_v53 = vmax.f32 %v1990_v10, 0.0 }
 0x2fc   : > { %v4134_v31 = vpop.f32.mrf.mxu1 }
 0x2fd   : > { %v1993_v12 = vadd.f32 %v4134_v31, %v5822_v57  ;;  %4163 = vmatprep.mubr.msk.bf16.mxu1 %vm919_vm0, %v2040_v37  ;;  %v2024_v61 = vmax.f32 %v1982_v55, 0.0 }
 0x2fe   : > { %v1984_v39 = vpop.f32.mrf.mxu1  ;;  %4164 = vmatmul.mubr.msk.bf16.gmra.mxu1 %vm919_vm0, %v2041_v47 }
 0x2ff   : > { %v1985_v34 = vadd.f32 %v1984_v39, %v5822_v57  ;;  %v2027_v4 = vmax.f32 %v1993_v12, 0.0  ;;  %v2451_v57 = vld [vmem:[%s6401_s5 + $0x8] sm:$0xff] }
 0x300   : > { %4175 = vmatprep.subr.mxu0 %v2451_v57 }
 0x301   : > { %v2025_v13 = vmax.f32 %v1985_v34, 0.0  ;;  %v2043_v24 = vpack.c.bf16 %v2027_v4, %v2026_v53  ;;  %4176 = vmatpush3.msra.mxu0 %v2451_v57  ;;  %v4313_v34 = vld [vmem:[%s6403_s7 + $0x18] sm:$0xff]   ;;  %v4314_v4 = vld [vmem:[%s6403_s7 + $0x10] sm:$0xff]  }
 0x302   : > { %4177 = vmatprep.subr.mxu0 %v2450_v56  ;;  %4218 = vmatprep.subr.bf16.mxu1 %v4313_v34 }
 0x303   : > { %v2042_v29 = vpack.c.bf16 %v2025_v13, %v2024_v61  ;;  %4178 = vmatpush3.msra.mxu0 %v2450_v56  ;;  %4219 = vmatpush3.bf16.msra.mxu1 %v4313_v34 }
 0x304   : > { %4182 = vmatprep.subr.bf16.mxu0 %v5887_v6  ;;  %4220 = vmatprep.subr.bf16.mxu1 %v4314_v4 }
 0x305   : > { %4167 = vmatprep.mubr.msk.bf16.mxu1 %vm919_vm0, %v2042_v29 }
 0x306   : > { %4168 = vmatmul.mubr.msk.bf16.gmra.mxu1 %vm919_vm0, %v2043_v24 }
 0x307   : > { %4221 = vmatpush3.bf16.msra.mxu1 %v4314_v4 }
 0x380   : > { %v4141_v45 = vpop.f32.mrf.mxu1 }
 0x381   : > { %v2156_v9 = vadd.f32 %v4141_v45, %v5893_v7 }
 0x382   : > { %v2147_v52 = vpop.f32.mrf.mxu1 }
 0x383   : > { %v2148_v44 = vadd.f32 %v2147_v52, %v5893_v7  ;;  %v2276_v43 = vmax.f32 %v2156_v9, 0.0 }
 0x384   : > { %v4142_v5 = vpop.f32.mrf.mxu1 }
 0x385   : > { %v2159_v36 = vadd.f32 %v4142_v5, %v5893_v7  ;;  %v2274_v33 = vmax.f32 %v2148_v44, 0.0  ;;  %v2315_v15 = vsel %vm919_vm0, %v2276_v43, 0.0 }
 0x386   : > { %v2150_v27 = vpop.f32.mrf.mxu1 }
 0x387   : > { %v2151_v23 = vadd.f32 %v2150_v27, %v5893_v7  ;;  %v2277_v48 = vmax.f32 %v2159_v36, 0.0  ;;  %v2306_v26 = vsel %vm919_vm0, %v2274_v33, 0.0 }
 0x388   : > { %v4145_v17 = vpop.f32.mrf.mxu1 }
 0x389   : > { %v2275_v46 = vmax.f32 %v2151_v23, 0.0  ;;  %v2172_v1 = vadd.f32 %v4145_v17, %v5893_v7  ;;  %v2316_v38 = vsel %vm919_vm0, %v2277_v48, 0.0 }
 0x38a   : > { %v2163_v28 = vpop.f32.mrf.mxu1  ;;  %v2317_v0 = vadd.f32 %v2316_v38, %v2315_v15 }
 0x38b   : > { %v2164_v14 = vadd.f32 %v2163_v28, %v5893_v7  ;;  %v2307_v8 = vsel %vm919_vm0, %v2275_v46, 0.0  ;;  %v2280_v21 = vmax.f32 %v2172_v1, 0.0 }
 0x38c   : > { %v4146_v58 = vpop.f32.mrf.mxu1  ;;  %v2308_v18 = vadd.f32 %v2307_v8, %v2306_v26  ;;  %v2318_v25 = vrot.slane %v2317_v0, 4 }
 0x38d   : > { %v2175_v11 = vadd.f32 %v4146_v58, %v5893_v7  ;;  %v2278_v20 = vmax.f32 %v2164_v14, 0.0  ;;  %v2333_v30 = vsel %vm919_vm0, %v2280_v21, 0.0 }
 0x38e   : > { %v2166_v50 = vpop.f32.mrf.mxu1  ;;  %v2309_v35 = vrot.slane %v2308_v18, 4  ;;  %v2319_v55 = vadd.f32 %v2318_v25, %v2317_v0 }
 0x38f   : > { %v2167_v2 = vadd.f32 %v2166_v50, %v5893_v7  ;;  %v2281_v42 = vmax.f32 %v2175_v11, 0.0  ;;  %v2324_v22 = vsel %vm919_vm0, %v2278_v20, 0.0 }
 0x390   : > { %v2310_v47 = vadd.f32 %v2309_v35, %v2308_v18  ;;  %v2320_v57 = vrot.slane %v2319_v55, 2 }
 0x391   : > { %v2279_v63 = vmax.f32 %v2167_v2, 0.0  ;;  %v2334_v51 = vsel %vm919_vm0, %v2281_v42, 0.0 }
 0x392   : > { %v2335_v19 = vadd.f32 %v2334_v51, %v2333_v30  ;;  %v2311_v29 = vrot.slane %v2310_v47, 2  ;;  %v2321_v44 = vadd.f32 %v2320_v57, %v2319_v55 }
 0x393   : > { %v2325_v3 = vsel %vm919_vm0, %v2279_v63, 0.0 }
 0x394   : > { %v2326_v49 = vadd.f32 %v2325_v3, %v2324_v22  ;;  %v2336_v12 = vrot.slane %v2335_v19, 4  ;;  %v2312_v23 = vadd.f32 %v2311_v29, %v2310_v47  ;;  %v2322_v26 = vrot.slane %v2321_v44, 1 }
 0x396   : > { %v2327_v16 = vrot.slane %v2326_v49, 4  ;;  %v2337_v56 = vadd.f32 %v2336_v12, %v2335_v19  ;;  %v2313_v8 = vrot.slane %v2312_v23, 1 }
 0x398   : > { %v2328_v10 = vadd.f32 %v2327_v16, %v2326_v49  ;;  %v2338_v11 = vrot.slane %v2337_v56, 2  ;;  %v2314_v16 = vadd.f32 %v2313_v8, %v2312_v23 }
 0x39a   : > { %v2329_v45 = vrot.slane %v2328_v10, 2  ;;  %v2339_v22 = vadd.f32 %v2338_v11, %v2337_v56 }
 0x39c   : > { %v2330_v9 = vadd.f32 %v2329_v45, %v2328_v10  ;;  %v2340_v34 = vrot.slane %v2339_v22, 1 }
 0x39e   : > { %v4149_v60 = vpop.f32.mrf.mxu1  ;;  %v2331_v15 = vrot.slane %v2330_v9, 1 }
 0x39f   : > { %v2188_v41 = vadd.f32 %v4149_v60, %v5893_v7 }
 0x3a0   : > { %v2179_v37 = vpop.f32.mrf.mxu1  ;;  %v2332_v47 = vadd.f32 %v2331_v15, %v2330_v9 }
 0x3a1   : > { %v2180_v31 = vadd.f32 %v2179_v37, %v5893_v7  ;;  %v2284_v61 = vmax.f32 %v2188_v41, 0.0 }
 0x3a2   : > { %v4150_v39 = vpop.f32.mrf.mxu1 }
 0x3a3   : > { %v2191_v13 = vadd.f32 %v4150_v39, %v5893_v7  ;;  %v2282_v24 = vmax.f32 %v2180_v31, 0.0  ;;  %v2351_v5 = vsel %vm919_vm0, %v2284_v61, 0.0  ;;  %v2323_v39 = vadd.f32 %v2322_v26, %v2321_v44 }
 0x3a4   : > { %v2182_v53 = vpop.f32.mrf.mxu1 }
 0x3a5   : > { %v2285_v40 = vmax.f32 %v2191_v13, 0.0  ;;  %v2183_v62 = vadd.f32 %v2182_v53, %v5893_v7  ;;  %v2342_v50 = vsel %vm919_vm0, %v2282_v24, 0.0  ;;  %v5936_v13 = vpop.xlane.xlu0 %2610  ;;  %v2475_v57 = vsel %vm2474_vm1, %v2323_v39, %v2314_v16 }
 0x3a6   : > { %v4153_v52 = vpop.f32.mrf.mxu1 }
 0x3a7   : > { %v2352_v27 = vsel %vm919_vm0, %v2285_v40, 0.0  ;;  %v2283_v17 = vmax.f32 %v2183_v62, 0.0  ;;  %v2204_v28 = vadd.f32 %v4153_v52, %v5893_v7 }
 0x3a8   : > { %v2353_v32 = vadd.f32 %v2352_v27, %v2351_v5  ;;  %v2195_v58 = vpop.f32.mrf.mxu1  ;;  %v2477_v5 = vsel %vm2476_vm2, %v2332_v47, %v2475_v57 }
 0x3a9   : > { %v2343_v36 = vsel %vm919_vm0, %v2283_v17, 0.0  ;;  %v2196_v2 = vadd.f32 %v2195_v58, %v5893_v7  ;;  %v2288_v63 = vmax.f32 %v2204_v28, 0.0 }
 0x3aa   : > { %v2354_v14 = vrot.slane %v2353_v32, 4  ;;  %v2344_v46 = vadd.f32 %v2343_v36, %v2342_v50  ;;  %v4154_v48 = vpop.f32.mrf.mxu1  ;;  %v2341_v36 = vadd.f32 %v2340_v34, %v2339_v22 }
 0x3ab   : > { %v2207_v33 = vadd.f32 %v4154_v48, %v5893_v7  ;;  %v2286_v38 = vmax.f32 %v2196_v2, 0.0  ;;  %v2369_v0 = vsel %vm919_vm0, %v2288_v63, 0.0 }
 0x3ac   : > { %v2355_v43 = vadd.f32 %v2354_v14, %v2353_v32  ;;  %v2345_v1 = vrot.slane %v2344_v46, 4  ;;  %v2198_v20 = vpop.f32.mrf.mxu1 }
 0x3ad   : > { %v2289_v42 = vmax.f32 %v2207_v33, 0.0  ;;  %v2199_v3 = vadd.f32 %v2198_v20, %v5893_v7  ;;  %v2360_v60 = vsel %vm919_vm0, %v2286_v38, 0.0  ;;  %v5946_v33 = vpop.xlane.xlu0 %2616  ;;  %v2479_v38 = vsel %vm2478_vm3, %v2341_v36, %v2477_v5 }
 0x3ae   : > { %v2346_v18 = vadd.f32 %v2345_v1, %v2344_v46  ;;  %v4157_v21 = vpop.f32.mrf.mxu1  ;;  %v2356_v35 = vrot.slane %v2355_v43, 2 }
 0x3af   : > { %v2370_v49 = vsel %vm919_vm0, %v2289_v42, 0.0  ;;  %v2287_v51 = vmax.f32 %v2199_v3, 0.0  ;;  %v2220_v4 = vadd.f32 %v4157_v21, %v5893_v7 }
 0x3b0   : > { %v2347_v30 = vrot.slane %v2346_v18, 2  ;;  %v2371_v25 = vadd.f32 %v2370_v49, %v2369_v0  ;;  %v2211_v19 = vpop.f32.mrf.mxu1  ;;  %v2357_v53 = vadd.f32 %v2356_v35, %v2355_v43 }
 0x3b1   : > { %v2361_v41 = vsel %vm919_vm0, %v2287_v51, 0.0  ;;  %v2212_v37 = vadd.f32 %v2211_v19, %v5893_v7  ;;  %v2292_v58 = vmax.f32 %v2220_v4, 0.0 }
 0x3b2   : > { %v2348_v31 = vadd.f32 %v2347_v30, %v2346_v18  ;;  %v2372_v55 = vrot.slane %v2371_v25, 4  ;;  %v2362_v12 = vadd.f32 %v2361_v41, %v2360_v60  ;;  %v4158_v10 = vpop.f32.mrf.mxu1  ;;  %v2358_v2 = vrot.slane %v2357_v53, 1 }
 0x3b3   : > { %v2223_v61 = vadd.f32 %v4158_v10, %v5893_v7  ;;  %v2290_v56 = vmax.f32 %v2212_v37, 0.0  ;;  %v2387_v42 = vsel %vm919_vm0, %v2292_v58, 0.0 }
 0x3b4   : > { %v2349_v29 = vrot.slane %v2348_v31, 1  ;;  %v2373_v24 = vadd.f32 %v2372_v55, %v2371_v25  ;;  %v2363_v40 = vrot.slane %v2362_v12, 4  ;;  %v2214_v62 = vpop.f32.mrf.mxu1  ;;  %v2359_v18 = vadd.f32 %v2358_v2, %v2357_v53  ;;  %v5957_v55 = vpop.xlane.xlu0 %2619 }
 0x3b5   : > { %v2293_v45 = vmax.f32 %v2223_v61, 0.0  ;;  %v2215_v52 = vadd.f32 %v2214_v62, %v5893_v7  ;;  %v2378_v46 = vsel %vm919_vm0, %v2290_v56, 0.0 }
 0x3b6   : > { %v2374_v27 = vrot.slane %v2373_v24, 2  ;;  %v2364_v17 = vadd.f32 %v2363_v40, %v2362_v12  ;;  %v4161_v28 = vpop.f32.mrf.mxu1  ;;  %v2350_v32 = vadd.f32 %v2349_v29, %v2348_v31 }
 0x3b7   : > { %v2291_v23 = vmax.f32 %v2215_v52, 0.0  ;;  %v2236_v50 = vadd.f32 %v4161_v28, %v5893_v7  ;;  %v2388_v48 = vsel %vm919_vm0, %v2293_v45, 0.0  ;;  %v5966_v45 = vpop.xlane.xlu1 %2613 }
 0x3b8   : > { %v2375_v44 = vadd.f32 %v2374_v27, %v2373_v24  ;;  %v2365_v9 = vrot.slane %v2364_v17, 2  ;;  %v2227_v14 = vpop.f32.mrf.mxu1  ;;  %v2481_v15 = vsel %vm2480_vm4, %v2350_v32, %v2479_v38  ;;  %v2389_v22 = vadd.f32 %v2388_v48, %v2387_v42 }
 0x3b9   : > { %v2379_v11 = vsel %vm919_vm0, %v2291_v23, 0.0  ;;  %v2228_v63 = vadd.f32 %v2227_v14, %v5893_v7  ;;  %v2296_v20 = vmax.f32 %v2236_v50, 0.0  ;;  %v2483_v60 = vsel %vm2482_vm5, %v2359_v18, %v2481_v15  ;;  %v5969_v23 = vpop.xlane.xlu0 %2625 }
 0x3ba   : > { %v2366_v43 = vadd.f32 %v2365_v9, %v2364_v17  ;;  %v2380_v1 = vadd.f32 %v2379_v11, %v2378_v46  ;;  %v4162_v8 = vpop.f32.mrf.mxu1  ;;  %v2376_v26 = vrot.slane %v2375_v44, 1  ;;  %v2390_v12 = vrot.slane %v2389_v22, 4 }
 0x3bb   : > { %v2239_v3 = vadd.f32 %v4162_v8, %v5893_v7  ;;  %v2294_v49 = vmax.f32 %v2228_v63, 0.0  ;;  %v2405_v19 = vsel %vm919_vm0, %v2296_v20, 0.0  ;;  %v5974_v48 = vpop.xlane.xlu1 %2622 }
 0x3bc   : > { %v2367_v21 = vrot.slane %v2366_v43, 1  ;;  %v2230_v0 = vpop.f32.mrf.mxu1  ;;  %v2381_v25 = vrot.slane %v2380_v1, 4  ;;  %v2377_v31 = vadd.f32 %v2376_v26, %v2375_v44  ;;  %v2391_v52 = vadd.f32 %v2390_v12, %v2389_v22 }
 0x3bd   : > { %v2297_v51 = vmax.f32 %v2239_v3, 0.0  ;;  %v2231_v35 = vadd.f32 %v2230_v0, %v5893_v7  ;;  %v2396_v4 = vsel %vm919_vm0, %v2294_v49, 0.0  ;;  %v5980_v0 = vpop.xlane.xlu0 %2631 }
 0x3be   : > { %v2368_v30 = vadd.f32 %v2367_v21, %v2366_v43  ;;  %v4165_v16 = vpop.f32.mrf.mxu1  ;;  %v2382_v24 = vadd.f32 %v2381_v25, %v2380_v1  ;;  %v2392_v11 = vrot.slane %v2391_v52, 2 }
 0x3bf   : > { %v2406_v41 = vsel %vm919_vm0, %v2297_v51, 0.0  ;;  %v2295_v37 = vmax.f32 %v2231_v35, 0.0  ;;  %v2252_v47 = vadd.f32 %v4165_v16, %v5893_v7 }
 0x3c0   : > { %v2407_v10 = vadd.f32 %v2406_v41, %v2405_v19  ;;  %v2243_v39 = vpop.f32.mrf.mxu1  ;;  %v2485_v34 = vsel %vm2484_vm6, %v2368_v30, %v2483_v60  ;;  %v2383_v50 = vrot.slane %v2382_v24, 2  ;;  %v2393_v49 = vadd.f32 %v2392_v11, %v2391_v52 }
 0x3c1   : > { %v2397_v61 = vsel %vm919_vm0, %v2295_v37, 0.0  ;;  %v2244_v53 = vadd.f32 %v2243_v39, %v5893_v7  ;;  %v2487_v29 = vsel %vm2486_vm7, %v2377_v31, %v2485_v34  ;;  %v2300_v57 = vmax.f32 %v2252_v47, 0.0  ;;  %v5983_v37 = vpop.xlane.xlu1 %2628 }
 0x3c2   : > { %v2398_v40 = vadd.f32 %v2397_v61, %v2396_v4  ;;  %v4166_v62 = vpop.f32.mrf.mxu1  ;;  %4179 = vmatprep.mubr.msk.f32.mxu0 %vm919_vm0, %v2487_v29  ;;  %v2408_v5 = vrot.slane %v2407_v10, 4  ;;  %v2384_v18 = vadd.f32 %v2383_v50, %v2382_v24  ;;  %v2394_v34 = vrot.slane %v2393_v49, 1 }
 0x3c3   : > { %v2255_v56 = vadd.f32 %v4166_v62, %v5893_v7  ;;  %v2298_v28 = vmax.f32 %v2244_v53, 0.0  ;;  %v2423_v44 = vsel %vm919_vm0, %v2300_v57, 0.0 }
 0x3c4   : > { %v2399_v27 = vrot.slane %v2398_v40, 4  ;;  %v2246_v17 = vpop.f32.mrf.mxu1  ;;  %v2409_v63 = vadd.f32 %v2408_v5, %v2407_v10  ;;  %v2385_v31 = vrot.slane %v2384_v18, 1  ;;  %v2746_v5 = vsub.s32 3, %v6451_v59 }
 0x3c5   : > { %v2301_v32 = vmax.f32 %v2255_v56, 0.0  ;;  %v2247_v58 = vadd.f32 %v2246_v17, %v5893_v7  ;;  %v2414_v8 = vsel %vm919_vm0, %v2298_v28, 0.0  ;;  %v2635_v17 = vpop.xlane.xlu1 %2634 }
 0x3c6   : > { %v2400_v36 = vadd.f32 %v2399_v27, %v2398_v40  ;;  %v4169_v2 = vpop.f32.mrf.mxu1  ;;  %v2410_v51 = vrot.slane %v2409_v63, 2  ;;  %v2386_v27 = vadd.f32 %v2385_v31, %v2384_v18  ;;  %v5998_v11 = vrot.slane %v5818_v54, %v2746_v5  ;;  %v4312_v31 = vld [vmem:[%s6403_s7] sm:$0xff]  }
 0x3c7   : > { %v2424_v9 = vsel %vm919_vm0, %v2301_v32, 0.0  ;;  %v2299_v14 = vmax.f32 %v2247_v58, 0.0  ;;  %v2268_v46 = vadd.f32 %v4169_v2, %v5893_v7 }
 0x3c8   : > { %v2401_v43 = vrot.slane %v2400_v36, 2  ;;  %v2425_v1 = vadd.f32 %v2424_v9, %v2423_v44  ;;  %v2259_v20 = vpop.f32.mrf.mxu1  ;;  %v2411_v29 = vadd.f32 %v2410_v51, %v2409_v63  ;;  %v5995_v9 = vld [vmem:[%s6402_s6] ss:$0 sm:$0xff] }
 0x3c9   : > { %v2415_v38 = vsel %vm919_vm0, %v2299_v14, 0.0  ;;  %v2260_v42 = vadd.f32 %v2259_v20, %v5893_v7  ;;  %v2304_v21 = vmax.f32 %v2268_v46, 0.0  ;;  %v2641_v18 = vpop.xlane.xlu1 %2640 }
 0x3ca   : > { %v2426_v3 = vrot.slane %v2425_v1, 4  ;;  %v2416_v26 = vadd.f32 %v2415_v38, %v2414_v8  ;;  %v4170_v15 = vpop.f32.mrf.mxu1  ;;  %v2402_v35 = vadd.f32 %v2401_v43, %v2400_v36  ;;  %v2395_v36 = vadd.f32 %v2394_v34, %v2393_v49 }
 0x3cb   : > { %v2271_v22 = vadd.f32 %v4170_v15, %v5893_v7  ;;  %v2302_v16 = vmax.f32 %v2260_v42, 0.0  ;;  %v2441_v12 = vsel %vm919_vm0, %v2304_v21, 0.0  ;;  %v2412_v2 = vrot.slane %v2411_v29, 1 }
 0x3cc   : > { %v2417_v30 = vrot.slane %v2416_v26, 4  ;;  %v2262_v25 = vpop.f32.mrf.mxu1  ;;  %v2427_v19 = vadd.f32 %v2426_v3, %v2425_v1  ;;  %v2403_v4 = vrot.slane %v2402_v35, 1  ;;  %v2488_v63 = vsel %vm2474_vm1, %v2395_v36, %v2386_v27 }
 0x3cd   : > { %v2305_v60 = vmax.f32 %v2271_v22, 0.0  ;;  %v2263_v41 = vadd.f32 %v2262_v25, %v5893_v7  ;;  %v2432_v40 = vsel %vm919_vm0, %v2302_v16, 0.0  ;;  %v5989_v7 = vpop.xlane.xlu0 %2637  ;;  %v2713_v42 = vmul.f32 %v5995_v9, %v5966_v45 }
 0x3ce   : > { %v2418_v47 = vadd.f32 %v2417_v30, %v2416_v26  ;;  %v2428_v24 = vrot.slane %v2427_v19, 2  ;;  %v2404_v28 = vadd.f32 %v2403_v4, %v2402_v35  ;;  %v2712_v3 = vmul.f32 %v5995_v9, %v5936_v13 }
 0x3cf   : > { %v2442_v10 = vsel %vm919_vm0, %v2305_v60, 0.0  ;;  %v2303_v39 = vmax.f32 %v2263_v41, 0.0  ;;  %v2413_v26 = vadd.f32 %v2412_v2, %v2411_v29  ;;  %v2749_v35 = vadd.f32 %v5998_v11, %v2713_v42  ;;  %v2647_v41 = vpop.xlane.xlu1 %2646 }
 0x3d0   : > { %v2419_v61 = vrot.slane %v2418_v47, 2  ;;  %v2443_v53 = vadd.f32 %v2442_v10, %v2441_v12  ;;  %v2429_v44 = vadd.f32 %v2428_v24, %v2427_v19  ;;  %v2489_v1 = vsel %vm2476_vm2, %v2404_v28, %v2488_v63 }
 0x3d1   : > { %v2433_v62 = vsel %vm919_vm0, %v2303_v39, 0.0  ;;  %v2644_v43 = vpop.xlane.xlu0 %2643  ;;  %v2490_v54 = vsel %vm2478_vm3, %v2413_v26, %v2489_v1  ;;  %v2748_v30 = vadd.f32 %v5998_v11, %v2712_v3  ;;  %v2715_v60 = vmul.f32 %v5995_v9, %v5957_v55 }
 0x3d2   : > { %v2420_v57 = vadd.f32 %v2419_v61, %v2418_v47  ;;  %v2444_v56 = vrot.slane %v2443_v53, 4  ;;  %v2434_v52 = vadd.f32 %v2433_v62, %v2432_v40  ;;  %v2430_v15 = vrot.slane %v2429_v44, 1 }
 0x3d3   : > { %v2780_v12 = vpack.c.bf16 %v2749_v35, %v2748_v30  ;;  %v2717_v10 = vmul.f32 %v5995_v9, %v5969_v23  ;;  %v2714_v34 = vmul.f32 %v5995_v9, %v5946_v33  ;;  %v2716_v55 = vmul.f32 %v5995_v9, %v5974_v48  ;;  %v2653_v29 = vpop.xlane.xlu1 %2652 }
 0x3d4   : > { %v2421_v32 = vrot.slane %v2420_v57, 1  ;;  %v2445_v58 = vadd.f32 %v2444_v56, %v2443_v53  ;;  %v2435_v50 = vrot.slane %v2434_v52, 4  ;;  %v2431_v25 = vadd.f32 %v2430_v15, %v2429_v44 }
 0x3d5   : > { %v2650_v19 = vpop.xlane.xlu0 %2649  ;;  %v2751_v4 = vadd.f32 %v5998_v11, %v2715_v60  ;;  %v2753_v23 = vadd.f32 %v5998_v11, %v2717_v10  ;;  %v2750_v53 = vadd.f32 %v5998_v11, %v2714_v34  ;;  %v2752_v33 = vadd.f32 %v5998_v11, %v2716_v55 }
 0x3d6   : > { %v2446_v14 = vrot.slane %v2445_v58, 2  ;;  %v2436_v46 = vadd.f32 %v2435_v50, %v2434_v52  ;;  %v2422_v20 = vadd.f32 %v2421_v32, %v2420_v57  ;;  %v2719_v48 = vmul.f32 %v5995_v9, %v5980_v0 }
 0x3d7   : > { %v2781_v24 = vpack.c.bf16 %v2751_v4, %v2750_v53  ;;  %v2782_v40 = vpack.c.bf16 %v2753_v23, %v2752_v33  ;;  %v2718_v62 = vmul.f32 %v5995_v9, %v5983_v37  ;;  %v2720_v56 = vmul.f32 %v5995_v9, %v2635_v17  ;;  %v2659_v5 = vpop.xlane.xlu1 %2658 }
 0x3d8   : > { %v2447_v8 = vadd.f32 %v2446_v14, %v2445_v58  ;;  %v2437_v38 = vrot.slane %v2436_v46, 2  ;;  %v2491_v49 = vsel %vm2480_vm4, %v2422_v20, %v2490_v54  ;;  %v2755_v52 = vadd.f32 %v5998_v11, %v2719_v48 }
 0x3d9   : > { %v2492_v13 = vsel %vm2482_vm5, %v2431_v25, %v2491_v49  ;;  %v2656_v61 = vpop.xlane.xlu0 %2655  ;;  %v2754_v0 = vadd.f32 %v5998_v11, %v2718_v62  ;;  %v2756_v28 = vadd.f32 %v5998_v11, %v2720_v56  ;;  %v2723_v32 = vmul.f32 %v5995_v9, %v2644_v43 }
 0x3da   : > { %v2438_v21 = vadd.f32 %v2437_v38, %v2436_v46  ;;  %v2448_v22 = vrot.slane %v2447_v8, 1  ;;  %v2725_v50 = vmul.f32 %v5995_v9, %v2650_v19  ;;  %v2722_v17 = vmul.f32 %v5995_v9, %v2641_v18 }
 0x3db   : > { %v2665_v36 = vpop.xlane.xlu1 %2664  ;;  %v2724_v2 = vmul.f32 %v5995_v9, %v2647_v41  ;;  %v2759_v44 = vadd.f32 %v5998_v11, %v2723_v32  ;;  %v2727_v20 = vmul.f32 %v5995_v9, %v2656_v61  ;;  %v2726_v3 = vmul.f32 %v5995_v9, %v2653_v29 }
 0x3dc   : > { %v2439_v51 = vrot.slane %v2438_v21, 1  ;;  %v2449_v16 = vadd.f32 %v2448_v22, %v2447_v8  ;;  %v2761_v14 = vadd.f32 %v5998_v11, %v2725_v50  ;;  %v2758_v46 = vadd.f32 %v5998_v11, %v2722_v17 }
 0x3dd   : > { %v2662_v57 = vpop.xlane.xlu0 %2661  ;;  %v2760_v43 = vadd.f32 %v5998_v11, %v2724_v2  ;;  %v2728_v26 = vmul.f32 %v5995_v9, %v2659_v5  ;;  %v2763_v15 = vadd.f32 %v5998_v11, %v2727_v20  ;;  %v2762_v54 = vadd.f32 %v5998_v11, %v2726_v3 }
 0x3de   : > { %v2440_v45 = vadd.f32 %v2439_v51, %v2438_v21  ;;  %v2785_v1 = vpack.c.bf16 %v2759_v44, %v2758_v46  ;;  %v2729_v42 = vmul.f32 %v5995_v9, %v2662_v57  ;;  %v2730_v19 = vmul.f32 %v5995_v9, %v2665_v36 }
 0x3df   : > { %v2671_v8 = vpop.xlane.xlu1 %2670  ;;  %v2786_v38 = vpack.c.bf16 %v2761_v14, %v2760_v43  ;;  %v2764_v49 = vadd.f32 %v5998_v11, %v2728_v26  ;;  %v2787_v51 = vpack.c.bf16 %v2763_v15, %v2762_v54  ;;  %v2456_v46 = vsub.s32 2, %v6451_v59 }
 0x3e0   : > { %v2493_v47 = vsel %vm2484_vm6, %v2440_v45, %v2492_v13  ;;  %v2765_v21 = vadd.f32 %v5998_v11, %v2729_v42 }
 0x3e1   : > { %v2494_v39 = vsel %vm2486_vm7, %v2449_v16, %v2493_v47  ;;  %v2668_v37 = vpop.xlane.xlu0 %2667  ;;  %v2732_v16 = vmul.f32 %v5995_v9, %v2671_v8  ;;  %v2766_v47 = vadd.f32 %v5998_v11, %v2730_v19  ;;  %v2802_v8 = vsub.s32 4, %v6451_v59 }
 0x3e2   : > { %4180 = vmatmul.mubr.msk.f32.vlgmr.msra.gmra.mxu0 %vm919_vm0, %v2494_v39  ;;  %v2731_v35 = vmul.f32 %v5995_v9, %v2668_v37  ;;  %v2788_v30 = vpack.c.bf16 %v2765_v21, %v2764_v49 }
 0x3e3   : > { %4183 = vmatpush3.bf16.msra.mxu0 %v5887_v6  ;;  %4186 = vmatprep.mubr.msk.bf16.mxu0 %vm919_vm0, %v2780_v12  ;;  %v2721_v6 = vmul.f32 %v5995_v9, %v5989_v7  ;;  %v2783_v7 = vpack.c.bf16 %v2755_v52, %v2754_v0  ;;  %v2677_v22 = vpop.xlane.xlu1 %2676 }
 0x3e4   : > { %4184 = vmatprep.subr.bf16.mxu0 %v4312_v31  ;;  %v2767_v13 = vadd.f32 %v5998_v11, %v2731_v35  ;;  %v2734_v4 = vmul.f32 %v5995_v9, %v2677_v22 }
 0x3e5   : > { %v2757_v27 = vadd.f32 %v5998_v11, %v2721_v6  ;;  %v2674_v63 = vpop.xlane.xlu0 %2673 }
 0x3e6   : > { %v2733_v25 = vmul.f32 %v5995_v9, %v2674_v63  ;;  %v2789_v12 = vpack.c.bf16 %v2767_v13, %v2766_v47  ;;  %v2770_v33 = vadd.f32 %v5998_v11, %v2734_v4  ;;  %v6105_v63 = vld [vmem:[%s6405_s9] sm:$0x7f] }
 0x3e7   : > { %4185 = vmatpush3.bf16.msra.mxu0 %v4312_v31  ;;  %v2784_v58 = vpack.c.bf16 %v2757_v27, %v2756_v28  ;;  %v2683_v60 = vpop.xlane.xlu1 %2682  ;;  %v2768_v31 = vadd.f32 %v5998_v11, %v2732_v16  ;;  %v6114_v42 = vrot.slane %v6105_v63, %v2802_v8 }
 0x3e8   : > { %v2769_v41 = vadd.f32 %v5998_v11, %v2733_v25  ;;  %v2736_v23 = vmul.f32 %v5995_v9, %v2683_v60 }
 0x3e9   : > { %v2680_v18 = vpop.xlane.xlu0 %2679 }
 0x3ea   : > { %4187 = vmatmul.mubr.msk.bf16.vlgmr.msra.gmra.mxu0 %vm919_vm0, %v2781_v24  ;;  %v2735_v10 = vmul.f32 %v5995_v9, %v2680_v18  ;;  %v2790_v34 = vpack.c.bf16 %v2769_v41, %v2768_v31  ;;  %v2772_v48 = vadd.f32 %v5998_v11, %v2736_v23 }
 0x3eb   : > { %4190 = vmatprep.mubr.msk.bf16.mxu0 %vm919_vm0, %v2782_v40  ;;  %v2689_v61 = vpop.xlane.xlu1 %2688 }
 0x3ec   : > { %v2771_v53 = vadd.f32 %v5998_v11, %v2735_v10  ;;  %v2738_v52 = vmul.f32 %v5995_v9, %v2689_v61 }
 0x3ed   : > { %v2686_v45 = vpop.xlane.xlu0 %2685 }
 0x3ee   : > { %v2737_v55 = vmul.f32 %v5995_v9, %v2686_v45  ;;  %v2791_v40 = vpack.c.bf16 %v2771_v53, %v2770_v33 }
 0x3ef   : > { %v2695_v62 = vpop.xlane.xlu1 %2694 }
 0x3f0   : > { %v2773_v29 = vadd.f32 %v5998_v11, %v2737_v55  ;;  %v2740_v5 = vmul.f32 %v5995_v9, %v2695_v62 }
 0x3f1   : > { %v2692_v39 = vpop.xlane.xlu0 %2691 }
 0x3f2   : > { %4191 = vmatmul.mubr.msk.bf16.gmra.mxu0 %vm919_vm0, %v2783_v7  ;;  %v2739_v6 = vmul.f32 %v5995_v9, %v2692_v39  ;;  %v2792_v57 = vpack.c.bf16 %v2773_v29, %v2772_v48  ;;  %v2774_v7 = vadd.f32 %v5998_v11, %v2738_v52  ;;  %v2776_v32 = vadd.f32 %v5998_v11, %v2740_v5 }
 0x3f3   : > { %4194 = vmatprep.mubr.msk.bf16.mxu0 %vm919_vm0, %v2784_v58  ;;  %v2701_v37 = vpop.xlane.xlu1 %2700 }
 0x3f4   : > { %v2775_v27 = vadd.f32 %v5998_v11, %v2739_v6  ;;  %v2742_v36 = vmul.f32 %v5995_v9, %v2701_v37 }
 0x3f5   : > { %v2698_v24 = vpop.xlane.xlu0 %2697 }
 0x3f6   : > { %v2741_v56 = vmul.f32 %v5995_v9, %v2698_v24  ;;  %v2793_v58 = vpack.c.bf16 %v2775_v27, %v2774_v7  ;;  %v2778_v44 = vadd.f32 %v5998_v11, %v2742_v36 }
 0x3f8   : > { %v2777_v0 = vadd.f32 %v5998_v11, %v2741_v56 }
 0x3f9   : > { %v2704_v28 = vpop.xlane.xlu0 %2703 }
 0x3fa   : > { %4195 = vmatmul.mubr.msk.bf16.gmra.mxu0 %vm919_vm0, %v2785_v1  ;;  %v2743_v50 = vmul.f32 %v5995_v9, %v2704_v28  ;;  %v2794_v17 = vpack.c.bf16 %v2777_v0, %v2776_v32  ;;  %v2457_v9 = vrot.slane %v6105_v63, %v2456_v46 }
 0x3fb   : > { %4198 = vmatprep.mubr.msk.bf16.mxu0 %vm919_vm0, %v2786_v38 }
 0x3fc   : > { %v2779_v2 = vadd.f32 %v5998_v11, %v2743_v50 }
 0x3fe   : > { %v2795_v14 = vpack.c.bf16 %v2779_v2, %v2778_v44 }
 0x402   : > { %4199 = vmatmul.mubr.msk.bf16.gmra.mxu0 %vm919_vm0, %v2787_v51 }
 0x403   : > { %4202 = vmatprep.mubr.msk.bf16.mxu0 %vm919_vm0, %v2788_v30 }
 0x40a   : > { %4203 = vmatmul.mubr.msk.bf16.gmra.mxu0 %vm919_vm0, %v2789_v12 }
 0x40b   : > { %4206 = vmatprep.mubr.msk.bf16.mxu0 %vm919_vm0, %v2790_v34 }
 0x412   : > { %4207 = vmatmul.mubr.msk.bf16.gmra.mxu0 %vm919_vm0, %v2791_v40 }
 0x413   : > { %4210 = vmatprep.mubr.msk.bf16.mxu0 %vm919_vm0, %v2792_v57 }
 0x41a   : > { %4211 = vmatmul.mubr.msk.bf16.gmra.mxu0 %vm919_vm0, %v2793_v58 }
 0x41b   : > { %4214 = vmatprep.mubr.msk.bf16.mxu0 %vm919_vm0, %v2794_v17 }
 0x422   : > { %4215 = vmatmul.mubr.msk.bf16.gmra.mxu0 %vm919_vm0, %v2795_v14 }
 0x4a2   : > { %v4181_v43 = vpop.f32.mrf.mxu0 }
 0x4a3   : > { %v2571_v20 = vadd.f32 %v4181_v43, %v2457_v9 }
 0x4a4   : > { %v2565_v1 = vpop.f32.mrf.mxu0 }
 0x4a5   : > { %v2566_v11 = vadd.f32 %v2565_v1, %v2457_v9  ;;  %2576 = vst.msk [vmem:[%s476_s20 + $0x8] sm:$0xff] %vm2574_vm8, %v2571_v20 }
 0x4a7   : > { %2575 = vst.msk [vmem:[%s476_s20] sm:$0xff] %vm2574_vm8, %v2566_v11 }
 0x4aa   : > { %v4188_v38 = vpop.f32.mrf.mxu0 }
 0x4ab   : > { %v2907_v21 = vadd.f32 %v4188_v38, %v6114_v42 }
 0x4ac   : > { %v2898_v3 = vpop.f32.mrf.mxu0 }
 0x4ad   : > { %v2899_v15 = vadd.f32 %v2898_v3, %v6114_v42  ;;  %v3027_v25 = vmax.f32 %v2907_v21, 0.0 }
 0x4ae   : > { %v4189_v26 = vpop.f32.mrf.mxu0 }
 0x4af   : > { %v2910_v18 = vadd.f32 %v4189_v26, %v6114_v42  ;;  %v3025_v35 = vmax.f32 %v2899_v15, 0.0 }
 0x4b0   : > { %v2901_v54 = vpop.f32.mrf.mxu0 }
 0x4b1   : > { %v2902_v22 = vadd.f32 %v2901_v54, %v6114_v42  ;;  %v3028_v49 = vmax.f32 %v2910_v18, 0.0 }
 0x4b2   : > { %v4192_v51 = vpop.f32.mrf.mxu0 }
 0x4b3   : > { %v3026_v30 = vmax.f32 %v2902_v22, 0.0  ;;  %v3058_v16 = vpack.c.bf16 %v3028_v49, %v3027_v25  ;;  %v2923_v47 = vadd.f32 %v4192_v51, %v6114_v42 }
 0x4b4   : > { %v2914_v19 = vpop.f32.mrf.mxu0 }
 0x4b5   : > { %v3057_v45 = vpack.c.bf16 %v3026_v30, %v3025_v35  ;;  %v2915_v60 = vadd.f32 %v2914_v19, %v6114_v42  ;;  %v3031_v4 = vmax.f32 %v2923_v47, 0.0 }
 0x4b6   : > { %v4193_v13 = vpop.f32.mrf.mxu0 }
 0x4b7   : > { %v2926_v41 = vadd.f32 %v4193_v13, %v6114_v42  ;;  %4222 = vmatprep.mubr.msk.bf16.mxu1 %vm919_vm0, %v3057_v45  ;;  %v3029_v34 = vmax.f32 %v2915_v60, 0.0 }
 0x4b8   : > { %v2917_v31 = vpop.f32.mrf.mxu0  ;;  %4223 = vmatmul.mubr.msk.bf16.vlgmr.msra.gmra.mxu1 %vm919_vm0, %v3058_v16 }
 0x4b9   : > { %v2918_v12 = vadd.f32 %v2917_v31, %v6114_v42  ;;  %v3032_v10 = vmax.f32 %v2926_v41, 0.0 }
 0x4ba   : > { %v4196_v39 = vpop.f32.mrf.mxu0 }
 0x4bb   : > { %v3030_v55 = vmax.f32 %v2918_v12, 0.0  ;;  %v3060_v53 = vpack.c.bf16 %v3032_v10, %v3031_v4  ;;  %v2939_v48 = vadd.f32 %v4196_v39, %v6114_v42 }
 0x4bc   : > { %v2930_v61 = vpop.f32.mrf.mxu0 }
 0x4bd   : > { %v3059_v23 = vpack.c.bf16 %v3030_v55, %v3029_v34  ;;  %v2931_v33 = vadd.f32 %v2930_v61, %v6114_v42  ;;  %v3035_v5 = vmax.f32 %v2939_v48, 0.0 }
 0x4be   : > { %v4197_v29 = vpop.f32.mrf.mxu0 }
 0x4bf   : > { %v2942_v24 = vadd.f32 %v4197_v29, %v6114_v42  ;;  %4226 = vmatprep.mubr.msk.bf16.mxu1 %vm919_vm0, %v3059_v23  ;;  %v3033_v56 = vmax.f32 %v2931_v33, 0.0 }
 0x4c0   : > { %v2933_v40 = vpop.f32.mrf.mxu0  ;;  %4227 = vmatmul.mubr.msk.bf16.gmra.mxu1 %vm919_vm0, %v3060_v53 }
 0x4c1   : > { %v2934_v6 = vadd.f32 %v2933_v40, %v6114_v42  ;;  %v3036_v62 = vmax.f32 %v2942_v24, 0.0 }
 0x4c2   : > { %v4200_v57 = vpop.f32.mrf.mxu0 }
 0x4c3   : > { %v3034_v52 = vmax.f32 %v2934_v6, 0.0  ;;  %v3062_v28 = vpack.c.bf16 %v3036_v62, %v3035_v5  ;;  %v2955_v58 = vadd.f32 %v4200_v57, %v6114_v42 }
 0x4c4   : > { %v2946_v27 = vpop.f32.mrf.mxu0 }
 0x4c5   : > { %v3061_v0 = vpack.c.bf16 %v3034_v52, %v3033_v56  ;;  %v2947_v32 = vadd.f32 %v2946_v27, %v6114_v42  ;;  %v3039_v46 = vmax.f32 %v2955_v58, 0.0 }
 0x4c6   : > { %v4201_v7 = vpop.f32.mrf.mxu0 }
 0x4c7   : > { %v2958_v37 = vadd.f32 %v4201_v7, %v6114_v42  ;;  %4230 = vmatprep.mubr.msk.bf16.mxu1 %vm919_vm0, %v3061_v0  ;;  %v3037_v44 = vmax.f32 %v2947_v32, 0.0 }
 0x4c8   : > { %v2949_v50 = vpop.f32.mrf.mxu0  ;;  %4231 = vmatmul.mubr.msk.bf16.gmra.mxu1 %vm919_vm0, %v3062_v28 }
 0x4c9   : > { %v2950_v17 = vadd.f32 %v2949_v50, %v6114_v42  ;;  %v3040_v36 = vmax.f32 %v2958_v37, 0.0 }
 0x4ca   : > { %v4204_v2 = vpop.f32.mrf.mxu0 }
 0x4cb   : > { %v3038_v14 = vmax.f32 %v2950_v17, 0.0  ;;  %v3064_v1 = vpack.c.bf16 %v3040_v36, %v3039_v46  ;;  %v2971_v38 = vadd.f32 %v4204_v2, %v6114_v42  ;;  %v3471_v2 = vrot.slane %v6105_v63, 6 }
 0x4cc   : > { %v2962_v9 = vpop.f32.mrf.mxu0 }
 0x4cd   : > { %v3063_v43 = vpack.c.bf16 %v3038_v14, %v3037_v44  ;;  %v2963_v20 = vadd.f32 %v2962_v9, %v6114_v42  ;;  %v3043_v22 = vmax.f32 %v2971_v38, 0.0  ;;  %4258 = vpush %v3471_v2  ;;  %v3080_v44 = vsub.s32 5, %v6451_v59 }
 0x4ce   : > { %v4205_v11 = vpop.f32.mrf.mxu0 }
 0x4cf   : > { %v2974_v8 = vadd.f32 %v4205_v11, %v6114_v42  ;;  %4234 = vmatprep.mubr.msk.bf16.mxu1 %vm919_vm0, %v3063_v43  ;;  %v3041_v21 = vmax.f32 %v2963_v20, 0.0  ;;  %v6167_v14 = vrot.slane %v6105_v63, %v3080_v44  ;;  %v6173_v43 = vld [vmem:[%s6404_s8] ss:$0 sm:$0xff] }
 0x4d0   : > { %v2965_v3 = vpop.f32.mrf.mxu0  ;;  %4235 = vmatmul.mubr.msk.bf16.gmra.mxu1 %vm919_vm0, %v3064_v1 }
 0x4d1   : > { %v2966_v26 = vadd.f32 %v2965_v3, %v6114_v42  ;;  %v3044_v15 = vmax.f32 %v2974_v8, 0.0 }
 0x4d2   : > { %v4208_v18 = vpop.f32.mrf.mxu0 }
 0x4d3   : > { %v3042_v54 = vmax.f32 %v2966_v26, 0.0  ;;  %v3066_v35 = vpack.c.bf16 %v3044_v15, %v3043_v22  ;;  %v2987_v45 = vadd.f32 %v4208_v18, %v6114_v42 }
 0x4d4   : > { %v2978_v49 = vpop.f32.mrf.mxu0 }
 0x4d5   : > { %v3065_v51 = vpack.c.bf16 %v3042_v54, %v3041_v21  ;;  %v2979_v25 = vadd.f32 %v2978_v49, %v6114_v42  ;;  %v3047_v12 = vmax.f32 %v2987_v45, 0.0 }
 0x4d6   : > { %v4209_v30 = vpop.f32.mrf.mxu0 }
 0x4d7   : > { %v2990_v19 = vadd.f32 %v4209_v30, %v6114_v42  ;;  %4238 = vmatprep.mubr.msk.bf16.mxu1 %vm919_vm0, %v3065_v51  ;;  %v3045_v47 = vmax.f32 %v2979_v25, 0.0 }
 0x4d8   : > { %v2981_v16 = vpop.f32.mrf.mxu0  ;;  %4239 = vmatmul.mubr.msk.bf16.gmra.mxu1 %vm919_vm0, %v3066_v35 }
 0x4d9   : > { %v2982_v13 = vadd.f32 %v2981_v16, %v6114_v42  ;;  %v3048_v60 = vmax.f32 %v2990_v19, 0.0 }
 0x4da   : > { %v4212_v41 = vpop.f32.mrf.mxu0 }
 0x4db   : > { %v3046_v31 = vmax.f32 %v2982_v13, 0.0  ;;  %v3068_v34 = vpack.c.bf16 %v3048_v60, %v3047_v12  ;;  %v3003_v23 = vadd.f32 %v4212_v41, %v6114_v42 }
 0x4dc   : > { %v2994_v10 = vpop.f32.mrf.mxu0 }
 0x4dd   : > { %v3067_v39 = vpack.c.bf16 %v3046_v31, %v3045_v47  ;;  %v2995_v4 = vadd.f32 %v2994_v10, %v6114_v42  ;;  %v3051_v6 = vmax.f32 %v3003_v23, 0.0 }
 0x4de   : > { %v4213_v55 = vpop.f32.mrf.mxu0 }
 0x4df   : > { %v3006_v61 = vadd.f32 %v4213_v55, %v6114_v42  ;;  %4242 = vmatprep.mubr.msk.bf16.mxu1 %vm919_vm0, %v3067_v39  ;;  %v3049_v48 = vmax.f32 %v2995_v4, 0.0 }
 0x4e0   : > { %v2997_v53 = vpop.f32.mrf.mxu0  ;;  %4243 = vmatmul.mubr.msk.bf16.gmra.mxu1 %vm919_vm0, %v3068_v34 }
 0x4e1   : > { %v2998_v29 = vadd.f32 %v2997_v53, %v6114_v42  ;;  %v3052_v33 = vmax.f32 %v3006_v61, 0.0 }
 0x4e2   : > { %v4216_v24 = vpop.f32.mrf.mxu0 }
 0x4e3   : > { %v3050_v40 = vmax.f32 %v2998_v29, 0.0  ;;  %v3070_v56 = vpack.c.bf16 %v3052_v33, %v3051_v6  ;;  %v3019_v0 = vadd.f32 %v4216_v24, %v6114_v42 }
 0x4e4   : > { %v3010_v62 = vpop.f32.mrf.mxu0 }
 0x4e5   : > { %v3069_v57 = vpack.c.bf16 %v3050_v40, %v3049_v48  ;;  %v3011_v5 = vadd.f32 %v3010_v62, %v6114_v42  ;;  %v3055_v50 = vmax.f32 %v3019_v0, 0.0 }
 0x4e6   : > { %v4217_v52 = vpop.f32.mrf.mxu0 }
 0x4e7   : > { %v3022_v27 = vadd.f32 %v4217_v52, %v6114_v42  ;;  %4246 = vmatprep.mubr.msk.bf16.mxu1 %vm919_vm0, %v3069_v57  ;;  %v3053_v37 = vmax.f32 %v3011_v5, 0.0 }
 0x4e8   : > { %v3013_v28 = vpop.f32.mrf.mxu0  ;;  %4247 = vmatmul.mubr.msk.bf16.gmra.mxu1 %vm919_vm0, %v3070_v56 }
 0x4e9   : > { %v3014_v7 = vadd.f32 %v3013_v28, %v6114_v42  ;;  %v3056_v32 = vmax.f32 %v3022_v27, 0.0 }
 0x4eb   : > { %v3054_v58 = vmax.f32 %v3014_v7, 0.0  ;;  %v3072_v36 = vpack.c.bf16 %v3056_v32, %v3055_v50 }
 0x4ed   : > { %v3071_v17 = vpack.c.bf16 %v3054_v58, %v3053_v37 }
 0x4ef   : > { %4250 = vmatprep.mubr.msk.bf16.mxu1 %vm919_vm0, %v3071_v17 }
 0x4f0   : > { %4251 = vmatmul.mubr.msk.bf16.gmra.mxu1 %vm919_vm0, %v3072_v36 }
 0x4fe   : > { %s4259_s26 = spop %4258 }
 0x578   : > { %v4224_v46 = vpop.f32.mrf.mxu1 }
 0x579   : > { %v3185_v42 = vadd.f32 %v4224_v46, %v6167_v14 }
 0x57a   : > { %v3176_v9 = vpop.f32.mrf.mxu1 }
 0x57b   : > { %v3305_v1 = vmax.f32 %v3185_v42, 0.0  ;;  %v3177_v11 = vadd.f32 %v3176_v9, %v6167_v14 }
 0x57c   : > { %v4225_v20 = vpop.f32.mrf.mxu1 }
 0x57d   : > { %v3303_v8 = vmax.f32 %v3177_v11, 0.0  ;;  %v3188_v38 = vadd.f32 %v4225_v20, %v6167_v14  ;;  %v3344_v3 = vmul.f32 %v6173_v43, %v3305_v1 }
 0x57e   : > { %v3179_v63 = vpop.f32.mrf.mxu1 }
 0x57f   : > { %v3306_v26 = vmax.f32 %v3188_v38, 0.0  ;;  %v3180_v15 = vadd.f32 %v3179_v63, %v6167_v14  ;;  %v3380_v18 = vsel %vm919_vm0, %v3344_v3, 0.0  ;;  %v3342_v21 = vmul.f32 %v6173_v43, %v3303_v8 }
 0x580   : > { %3381 = vadd.xlane.f32.xlu1 %v3380_v18  ;;  %v4228_v54 = vpop.f32.mrf.mxu1 }
 0x581   : > { %v3304_v22 = vmax.f32 %v3180_v15, 0.0  ;;  %v3201_v49 = vadd.f32 %v4228_v54, %v6167_v14  ;;  %v3345_v51 = vmul.f32 %v6173_v43, %v3306_v26  ;;  %v3374_v30 = vsel %vm919_vm0, %v3342_v21, 0.0 }
 0x582   : > { %v3192_v35 = vpop.f32.mrf.mxu1 }
 0x583   : > { %v3309_v25 = vmax.f32 %v3201_v49, 0.0  ;;  %v3193_v19 = vadd.f32 %v3192_v35, %v6167_v14  ;;  %v3383_v45 = vsel %vm919_vm0, %v3345_v51, 0.0  ;;  %v3343_v16 = vmul.f32 %v6173_v43, %v3304_v22 }
 0x584   : > { %3384 = vadd.xlane.f32.xlu0 %v3383_v45  ;;  %v4229_v13 = vpop.f32.mrf.mxu1  ;;  %3375 = vadd.xlane.f32.xlu1 %v3374_v30 }
 0x585   : > { %v3307_v60 = vmax.f32 %v3193_v19, 0.0  ;;  %v3204_v41 = vadd.f32 %v4229_v13, %v6167_v14  ;;  %v3348_v47 = vmul.f32 %v6173_v43, %v3309_v25  ;;  %v3377_v12 = vsel %vm919_vm0, %v3343_v16, 0.0 }
 0x586   : > { %v3195_v31 = vpop.f32.mrf.mxu1 }
 0x587   : > { %v3310_v10 = vmax.f32 %v3204_v41, 0.0  ;;  %v3196_v39 = vadd.f32 %v3195_v31, %v6167_v14  ;;  %v3392_v34 = vsel %vm919_vm0, %v3348_v47, 0.0  ;;  %v3346_v55 = vmul.f32 %v6173_v43, %v3307_v60 }
 0x588   : > { %v4232_v4 = vpop.f32.mrf.mxu1  ;;  %3378 = vadd.xlane.f32.xlu0 %v3377_v12  ;;  %3393 = vadd.xlane.f32.xlu1 %v3392_v34 }
 0x589   : > { %v3308_v61 = vmax.f32 %v3196_v39, 0.0  ;;  %v3217_v23 = vadd.f32 %v4232_v4, %v6167_v14  ;;  %v3349_v53 = vmul.f32 %v6173_v43, %v3310_v10  ;;  %v3386_v33 = vsel %vm919_vm0, %v3346_v55, 0.0 }
 0x58a   : > { %v3208_v29 = vpop.f32.mrf.mxu1 }
 0x58b   : > { %v3313_v24 = vmax.f32 %v3217_v23, 0.0  ;;  %v3209_v48 = vadd.f32 %v3208_v29, %v6167_v14  ;;  %v3395_v40 = vsel %vm919_vm0, %v3349_v53, 0.0  ;;  %v3347_v6 = vmul.f32 %v6173_v43, %v3308_v61 }
 0x58c   : > { %v4233_v62 = vpop.f32.mrf.mxu1  ;;  %3396 = vadd.xlane.f32.xlu0 %v3395_v40  ;;  %3387 = vadd.xlane.f32.xlu1 %v3386_v33 }
 0x58d   : > { %v3311_v57 = vmax.f32 %v3209_v48, 0.0  ;;  %v3220_v56 = vadd.f32 %v4233_v62, %v6167_v14  ;;  %v3352_v52 = vmul.f32 %v6173_v43, %v3313_v24  ;;  %v3389_v27 = vsel %vm919_vm0, %v3347_v6, 0.0 }
 0x58e   : > { %v3211_v5 = vpop.f32.mrf.mxu1 }
 0x58f   : > { %v3314_v0 = vmax.f32 %v3220_v56, 0.0  ;;  %v3212_v28 = vadd.f32 %v3211_v5, %v6167_v14  ;;  %v3404_v7 = vsel %vm919_vm0, %v3352_v52, 0.0  ;;  %v3350_v32 = vmul.f32 %v6173_v43, %v3311_v57 }
 0x590   : > { %v4236_v37 = vpop.f32.mrf.mxu1  ;;  %3390 = vadd.xlane.f32.xlu0 %v3389_v27  ;;  %3405 = vadd.xlane.f32.xlu1 %v3404_v7 }
 0x591   : > { %v3312_v58 = vmax.f32 %v3212_v28, 0.0  ;;  %v3233_v50 = vadd.f32 %v4236_v37, %v6167_v14  ;;  %v3353_v17 = vmul.f32 %v6173_v43, %v3314_v0  ;;  %v3398_v2 = vsel %vm919_vm0, %v3350_v32, 0.0 }
 0x592   : > { %v3224_v36 = vpop.f32.mrf.mxu1 }
 0x593   : > { %v3317_v44 = vmax.f32 %v3233_v50, 0.0  ;;  %v3225_v46 = vadd.f32 %v3224_v36, %v6167_v14  ;;  %v3407_v42 = vsel %vm919_vm0, %v3353_v17, 0.0  ;;  %v3351_v9 = vmul.f32 %v6173_v43, %v3312_v58 }
 0x594   : > { %v4237_v1 = vpop.f32.mrf.mxu1  ;;  %3408 = vadd.xlane.f32.xlu0 %v3407_v42  ;;  %3399 = vadd.xlane.f32.xlu1 %v3398_v2 }
 0x595   : > { %v3315_v11 = vmax.f32 %v3225_v46, 0.0  ;;  %v3236_v20 = vadd.f32 %v4237_v1, %v6167_v14  ;;  %v3356_v8 = vmul.f32 %v6173_v43, %v3317_v44  ;;  %v3401_v3 = vsel %vm919_vm0, %v3351_v9, 0.0 }
 0x596   : > { %v3227_v38 = vpop.f32.mrf.mxu1 }
 0x597   : > { %v3318_v63 = vmax.f32 %v3236_v20, 0.0  ;;  %v3228_v26 = vadd.f32 %v3227_v38, %v6167_v14  ;;  %v3416_v15 = vsel %vm919_vm0, %v3356_v8, 0.0  ;;  %v3354_v18 = vmul.f32 %v6173_v43, %v3315_v11 }
 0x598   : > { %v4240_v21 = vpop.f32.mrf.mxu1  ;;  %3402 = vadd.xlane.f32.xlu0 %v3401_v3  ;;  %3417 = vadd.xlane.f32.xlu1 %v3416_v15 }
 0x599   : > { %v3316_v54 = vmax.f32 %v3228_v26, 0.0  ;;  %v3249_v22 = vadd.f32 %v4240_v21, %v6167_v14  ;;  %v3357_v49 = vmul.f32 %v6173_v43, %v3318_v63  ;;  %v3410_v35 = vsel %vm919_vm0, %v3354_v18, 0.0 }
 0x59a   : > { %v3240_v51 = vpop.f32.mrf.mxu1 }
 0x59b   : > { %v3321_v30 = vmax.f32 %v3249_v22, 0.0  ;;  %v3241_v25 = vadd.f32 %v3240_v51, %v6167_v14  ;;  %v3419_v19 = vsel %vm919_vm0, %v3357_v49, 0.0  ;;  %v3355_v45 = vmul.f32 %v6173_v43, %v3316_v54 }
 0x59c   : > { %v4241_v16 = vpop.f32.mrf.mxu1  ;;  %3420 = vadd.xlane.f32.xlu0 %v3419_v19  ;;  %3411 = vadd.xlane.f32.xlu1 %v3410_v35 }
 0x59d   : > { %v3319_v13 = vmax.f32 %v3241_v25, 0.0  ;;  %v3252_v60 = vadd.f32 %v4241_v16, %v6167_v14  ;;  %v3360_v41 = vmul.f32 %v6173_v43, %v3321_v30  ;;  %v3413_v31 = vsel %vm919_vm0, %v3355_v45, 0.0 }
 0x59e   : > { %v3243_v47 = vpop.f32.mrf.mxu1 }
 0x59f   : > { %v3322_v12 = vmax.f32 %v3252_v60, 0.0  ;;  %v3244_v10 = vadd.f32 %v3243_v47, %v6167_v14  ;;  %v3428_v39 = vsel %vm919_vm0, %v3360_v41, 0.0  ;;  %v3358_v34 = vmul.f32 %v6173_v43, %v3319_v13 }
 0x5a0   : > { %v4244_v55 = vpop.f32.mrf.mxu1  ;;  %3414 = vadd.xlane.f32.xlu0 %v3413_v31  ;;  %3429 = vadd.xlane.f32.xlu1 %v3428_v39 }
 0x5a1   : > { %v3320_v4 = vmax.f32 %v3244_v10, 0.0  ;;  %v3265_v61 = vadd.f32 %v4244_v55, %v6167_v14  ;;  %v3361_v23 = vmul.f32 %v6173_v43, %v3322_v12  ;;  %v3422_v29 = vsel %vm919_vm0, %v3358_v34, 0.0 }
 0x5a2   : > { %v3256_v53 = vpop.f32.mrf.mxu1 }
 0x5a3   : > { %v3325_v33 = vmax.f32 %v3265_v61, 0.0  ;;  %v3257_v24 = vadd.f32 %v3256_v53, %v6167_v14  ;;  %v3431_v48 = vsel %vm919_vm0, %v3361_v23, 0.0  ;;  %v3359_v40 = vmul.f32 %v6173_v43, %v3320_v4 }
 0x5a4   : > { %v4245_v6 = vpop.f32.mrf.mxu1  ;;  %3432 = vadd.xlane.f32.xlu0 %v3431_v48  ;;  %3423 = vadd.xlane.f32.xlu1 %v3422_v29 }
 0x5a5   : > { %v3323_v62 = vmax.f32 %v3257_v24, 0.0  ;;  %v3268_v57 = vadd.f32 %v4245_v6, %v6167_v14  ;;  %v3364_v56 = vmul.f32 %v6173_v43, %v3325_v33  ;;  %v3425_v5 = vsel %vm919_vm0, %v3359_v40, 0.0 }
 0x5a6   : > { %v3259_v52 = vpop.f32.mrf.mxu1 }
 0x5a7   : > { %v3326_v27 = vmax.f32 %v3268_v57, 0.0  ;;  %v3260_v0 = vadd.f32 %v3259_v52, %v6167_v14  ;;  %v3440_v28 = vsel %vm919_vm0, %v3364_v56, 0.0  ;;  %v3362_v7 = vmul.f32 %v6173_v43, %v3323_v62 }
 0x5a8   : > { %v4248_v32 = vpop.f32.mrf.mxu1  ;;  %3426 = vadd.xlane.f32.xlu0 %v3425_v5  ;;  %3441 = vadd.xlane.f32.xlu1 %v3440_v28  ;;  %v6454_v62 = vlaneseq  ;;  %v6271_v5 = vstv %s4259_s26 }
 0x5a9   : > { %v3324_v37 = vmax.f32 %v3260_v0, 0.0  ;;  %v3281_v58 = vadd.f32 %v4248_v32, %v6167_v14  ;;  %v3365_v50 = vmul.f32 %v6173_v43, %v3326_v27  ;;  %v3434_v36 = vsel %vm919_vm0, %v3362_v7, 0.0 }
 0x5aa   : > { %v3272_v17 = vpop.f32.mrf.mxu1  ;;  %v3540_v57 = vand.u32 127, %v6454_v62 }
 0x5ab   : > { %v3329_v2 = vmax.f32 %v3281_v58, 0.0  ;;  %v3273_v44 = vadd.f32 %v3272_v17, %v6167_v14  ;;  %v3443_v46 = vsel %vm919_vm0, %v3365_v50, 0.0  ;;  %v3363_v42 = vmul.f32 %v6173_v43, %v3324_v37 }
 0x5ac   : > { %v4249_v9 = vpop.f32.mrf.mxu1  ;;  %3444 = vadd.xlane.f32.xlu0 %v3443_v46  ;;  %3435 = vadd.xlane.f32.xlu1 %v3434_v36  ;;  %v6282_v17 = vsub.s32 %v3540_v57, %v6451_v59 }
 0x5ad   : > { %v3327_v1 = vmax.f32 %v3273_v44, 0.0  ;;  %v3284_v11 = vadd.f32 %v4249_v9, %v6167_v14  ;;  %v3368_v20 = vmul.f32 %v6173_v43, %v3329_v2  ;;  %v3437_v38 = vsel %vm919_vm0, %v3363_v42, 0.0 }
 0x5ae   : > { %v3275_v8 = vpop.f32.mrf.mxu1 }
 0x5af   : > { %v3330_v3 = vmax.f32 %v3284_v11, 0.0  ;;  %v3276_v63 = vadd.f32 %v3275_v8, %v6167_v14  ;;  %v3452_v26 = vsel %vm919_vm0, %v3368_v20, 0.0  ;;  %v3366_v15 = vmul.f32 %v6173_v43, %v3327_v1 }
 0x5b0   : > { %v4252_v18 = vpop.f32.mrf.mxu1  ;;  %3438 = vadd.xlane.f32.xlu0 %v3437_v38  ;;  %3453 = vadd.xlane.f32.xlu1 %v3452_v26 }
 0x5b1   : > { %v3328_v21 = vmax.f32 %v3276_v63, 0.0  ;;  %v3297_v54 = vadd.f32 %v4252_v18, %v6167_v14  ;;  %v3369_v22 = vmul.f32 %v6173_v43, %v3330_v3  ;;  %v3446_v30 = vsel %vm919_vm0, %v3366_v15, 0.0 }
 0x5b2   : > { %v3288_v49 = vpop.f32.mrf.mxu1 }
 0x5b3   : > { %v3289_v51 = vadd.f32 %v3288_v49, %v6167_v14  ;;  %v3455_v35 = vsel %vm919_vm0, %v3369_v22, 0.0  ;;  %v3367_v25 = vmul.f32 %v6173_v43, %v3328_v21  ;;  %v3333_v45 = vmax.f32 %v3297_v54, 0.0 }
 0x5b4   : > { %v4253_v19 = vpop.f32.mrf.mxu1  ;;  %3456 = vadd.xlane.f32.xlu0 %v3455_v35  ;;  %3447 = vadd.xlane.f32.xlu1 %v3446_v30 }
 0x5b5   : > { %v3331_v16 = vmax.f32 %v3289_v51, 0.0  ;;  %v3300_v13 = vadd.f32 %v4253_v19, %v6167_v14  ;;  %v3449_v31 = vsel %vm919_vm0, %v3367_v25, 0.0  ;;  %v3372_v34 = vmul.f32 %v6173_v43, %v3333_v45 }
 0x5b6   : > { %v3291_v60 = vpop.f32.mrf.mxu1 }
 0x5b7   : > { %v3334_v41 = vmax.f32 %v3300_v13, 0.0  ;;  %v3292_v47 = vadd.f32 %v3291_v60, %v6167_v14  ;;  %v3370_v12 = vmul.f32 %v6173_v43, %v3331_v16  ;;  %v3464_v23 = vsel %vm919_vm0, %v3372_v34, 0.0 }
 0x5b8   : > { %3450 = vadd.xlane.f32.xlu0 %v3449_v31 }
 0x5b9   : > { %v3332_v10 = vmax.f32 %v3292_v47, 0.0  ;;  %v3458_v39 = vsel %vm919_vm0, %v3370_v12, 0.0  ;;  %v3373_v55 = vmul.f32 %v6173_v43, %v3334_v41 }
 0x5ba   : > { %3459 = vadd.xlane.f32.xlu1 %v3458_v39 }
 0x5bb   : > { %v3371_v4 = vmul.f32 %v6173_v43, %v3332_v10  ;;  %v3467_v14 = vsel %vm919_vm0, %v3373_v55, 0.0  ;;  %v3545_v43 = vadd.s32 4294967288, %v3540_v57 }
 0x5bd   : > { %v3461_v61 = vsel %vm919_vm0, %v3371_v4, 0.0  ;;  %v6276_v28 = vsub.s32 %v3545_v43, %v6451_v59 }
 0x5be   : > { %3462 = vadd.xlane.f32.xlu0 %v3461_v61  ;;  %3465 = vadd.xlane.f32.xlu1 %v3464_v23 }
 0x5c2   : > { %3468 = vadd.xlane.f32.xlu0 %v3467_v14 }
 0x609   : > { %v3382_v53 = vpop.xlane.xlu1 %3381 }
 0x60a   : > { %v3477_v36 = vadd.f32 %v6271_v5, %v3382_v53 }
 0x60c   : > { %v3555_v38 = vrot.slane %v3477_v36, %v6282_v17 }
 0x60d   : > { %v3385_v29 = vpop.xlane.xlu0 %3384  ;;  %v3376_v33 = vpop.xlane.xlu1 %3375 }
 0x60e   : > { %v3478_v7 = vadd.f32 %v6271_v5, %v3385_v29  ;;  %v3475_v32 = vadd.f32 %v6271_v5, %v3376_v33 }
 0x610   : > { %v3559_v46 = vrot.slane %v3478_v7, %v6276_v28  ;;  %v3544_v42 = vrot.slane %v3475_v32, %v6282_v17 }
 0x611   : > { %v3379_v24 = vpop.xlane.xlu0 %3378  ;;  %v3394_v48 = vpop.xlane.xlu1 %3393 }
 0x612   : > { %v3476_v27 = vadd.f32 %v6271_v5, %v3379_v24  ;;  %v3481_v63 = vadd.f32 %v6271_v5, %v3394_v48  ;;  %v3560_v18 = vsel %vm3550_vm9, %v3559_v46, %v3555_v38 }
 0x614   : > { %v3549_v2 = vrot.slane %v3476_v27, %v6276_v28  ;;  %v3573_v30 = vrot.slane %v3481_v63, %v6282_v17 }
 0x615   : > { %v3397_v40 = vpop.xlane.xlu0 %3396  ;;  %v3388_v6 = vpop.xlane.xlu1 %3387 }
 0x616   : > { %v3479_v50 = vadd.f32 %v6271_v5, %v3388_v6  ;;  %v3482_v9 = vadd.f32 %v6271_v5, %v3397_v40  ;;  %v3551_v3 = vsel %vm3550_vm9, %v3549_v2, %v3544_v42 }
 0x617   : > { %v3687_v51 = vsel %vm2474_vm1, %v3560_v18, %v3551_v3 }
 0x618   : > { %v3564_v20 = vrot.slane %v3479_v50, %v6282_v17  ;;  %v3577_v21 = vrot.slane %v3482_v9, %v6276_v28 }
 0x619   : > { %v3391_v56 = vpop.xlane.xlu0 %3390  ;;  %v3406_v52 = vpop.xlane.xlu1 %3405 }
 0x61a   : > { %v3480_v0 = vadd.f32 %v6271_v5, %v3391_v56  ;;  %v3485_v19 = vadd.f32 %v6271_v5, %v3406_v52  ;;  %v3578_v60 = vsel %vm3550_vm9, %v3577_v21, %v3573_v30 }
 0x61c   : > { %v3568_v44 = vrot.slane %v3480_v0, %v6276_v28  ;;  %v3591_v34 = vrot.slane %v3485_v19, %v6282_v17 }
 0x61d   : > { %v3409_v37 = vpop.xlane.xlu0 %3408  ;;  %v3400_v58 = vpop.xlane.xlu1 %3399 }
 0x61e   : > { %v3483_v59 = vadd.f32 %v6271_v5, %v3400_v58  ;;  %v3569_v26 = vsel %vm3550_vm9, %v3568_v44, %v3564_v20  ;;  %v3486_v54 = vadd.f32 %v6271_v5, %v3409_v37 }
 0x61f   : > { %v3688_v25 = vsel %vm2476_vm2, %v3569_v26, %v3687_v51 }
 0x620   : > { %v3582_v35 = vrot.slane %v3483_v59, %v6282_v17  ;;  %v3595_v41 = vrot.slane %v3486_v54, %v6276_v28  ;;  %v3689_v10 = vsel %vm2478_vm3, %v3578_v60, %v3688_v25 }
 0x621   : > { %v3403_v1 = vpop.xlane.xlu0 %3402  ;;  %v3418_v11 = vpop.xlane.xlu1 %3417 }
 0x622   : > { %v3484_v8 = vadd.f32 %v6271_v5, %v3403_v1  ;;  %v3489_v47 = vadd.f32 %v6271_v5, %v3418_v11  ;;  %v3596_v14 = vsel %vm3550_vm9, %v3595_v41, %v3591_v34 }
 0x624   : > { %v3586_v15 = vrot.slane %v3484_v8, %v6276_v28  ;;  %v3609_v53 = vrot.slane %v3489_v47, %v6282_v17 }
 0x625   : > { %v3421_v22 = vpop.xlane.xlu0 %3420  ;;  %v3412_v49 = vpop.xlane.xlu1 %3411 }
 0x626   : > { %v3490_v45 = vadd.f32 %v6271_v5, %v3421_v22  ;;  %v3587_v16 = vsel %vm3550_vm9, %v3586_v15, %v3582_v35  ;;  %v3487_v13 = vadd.f32 %v6271_v5, %v3412_v49 }
 0x627   : > { %v3690_v55 = vsel %vm2480_vm4, %v3587_v16, %v3689_v10 }
 0x628   : > { %v3613_v4 = vrot.slane %v3490_v45, %v6276_v28  ;;  %v3600_v61 = vrot.slane %v3487_v13, %v6282_v17  ;;  %v3691_v48 = vsel %vm2482_vm5, %v3596_v14, %v3690_v55 }
 0x629   : > { %v3415_v31 = vpop.xlane.xlu0 %3414  ;;  %v3430_v12 = vpop.xlane.xlu1 %3429 }
 0x62a   : > { %v3488_v39 = vadd.f32 %v6271_v5, %v3415_v31  ;;  %v3614_v40 = vsel %vm3550_vm9, %v3613_v4, %v3609_v53  ;;  %v3493_v44 = vadd.f32 %v6271_v5, %v3430_v12 }
 0x62c   : > { %v3604_v23 = vrot.slane %v3488_v39, %v6276_v28  ;;  %v3627_v63 = vrot.slane %v3493_v44, %v6282_v17 }
 0x62d   : > { %v3433_v29 = vpop.xlane.xlu0 %3432  ;;  %v3424_v33 = vpop.xlane.xlu1 %3423 }
 0x62e   : > { %v3605_v24 = vsel %vm3550_vm9, %v3604_v23, %v3600_v61  ;;  %v3494_v58 = vadd.f32 %v6271_v5, %v3433_v29  ;;  %v3491_v50 = vadd.f32 %v6271_v5, %v3424_v33 }
 0x62f   : > { %v3692_v6 = vsel %vm2484_vm6, %v3605_v24, %v3691_v48 }
 0x630   : > { %v3693_v62 = vsel %vm2486_vm7, %v3614_v40, %v3692_v6  ;;  %v3631_v1 = vrot.slane %v3494_v58, %v6276_v28  ;;  %v3618_v11 = vrot.slane %v3491_v50, %v6282_v17 }
 0x631   : > { %3704 = vst.msk [vmem:[%s6325_s24] sm:$0xff] %vm3703_vm10, %v3693_v62  ;;  %v3427_v57 = vpop.xlane.xlu0 %3426  ;;  %v3442_v43 = vpop.xlane.xlu1 %3441 }
 0x632   : > { %v3492_v7 = vadd.f32 %v6271_v5, %v3427_v57  ;;  %v3497_v15 = vadd.f32 %v6271_v5, %v3442_v43  ;;  %v3632_v54 = vsel %vm3550_vm9, %v3631_v1, %v3627_v63 }
 0x634   : > { %v3622_v46 = vrot.slane %v3492_v7, %v6276_v28  ;;  %v3645_v45 = vrot.slane %v3497_v15, %v6282_v17 }
 0x635   : > { %v3445_v56 = vpop.xlane.xlu0 %3444  ;;  %v3436_v52 = vpop.xlane.xlu1 %3435 }
 0x636   : > { %v3495_v36 = vadd.f32 %v6271_v5, %v3436_v52  ;;  %v3498_v20 = vadd.f32 %v6271_v5, %v3445_v56  ;;  %v3623_v26 = vsel %vm3550_vm9, %v3622_v46, %v3618_v11 }
 0x637   : > { %v3694_v51 = vsel %vm2474_vm1, %v3632_v54, %v3623_v26 }
 0x638   : > { %v3636_v8 = vrot.slane %v3495_v36, %v6282_v17  ;;  %v3649_v22 = vrot.slane %v3498_v20, %v6276_v28 }
 0x639   : > { %v3439_v27 = vpop.xlane.xlu0 %3438  ;;  %v3454_v0 = vpop.xlane.xlu1 %3453 }
 0x63a   : > { %v3496_v32 = vadd.f32 %v6271_v5, %v3439_v27  ;;  %v3501_v13 = vadd.f32 %v6271_v5, %v3454_v0  ;;  %v3650_v47 = vsel %vm3550_vm9, %v3649_v22, %v3645_v45 }
 0x63c   : > { %v3640_v42 = vrot.slane %v3496_v32, %v6276_v28  ;;  %v3663_v4 = vrot.slane %v3501_v13, %v6282_v17 }
 0x63d   : > { %v3457_v37 = vpop.xlane.xlu0 %3456  ;;  %v3448_v2 = vpop.xlane.xlu1 %3447 }
 0x63e   : > { %v3499_v38 = vadd.f32 %v6271_v5, %v3448_v2  ;;  %v3641_v18 = vsel %vm3550_vm9, %v3640_v42, %v3636_v8  ;;  %v3502_v49 = vadd.f32 %v6271_v5, %v3457_v37 }
 0x63f   : > { %v3695_v16 = vsel %vm2476_vm2, %v3641_v18, %v3694_v51 }
 0x640   : > { %v3654_v35 = vrot.slane %v3499_v38, %v6282_v17  ;;  %v3667_v31 = vrot.slane %v3502_v49, %v6276_v28  ;;  %v3696_v39 = vsel %vm2478_vm3, %v3650_v47, %v3695_v16 }
 0x641   : > { %v3451_v9 = vpop.xlane.xlu0 %3450 }
 0x642   : > { %v3500_v59 = vadd.f32 %v6271_v5, %v3451_v9  ;;  %v3668_v53 = vsel %vm3550_vm9, %v3667_v31, %v3663_v4 }
 0x643   : > { %v3460_v3 = vpop.xlane.xlu1 %3459 }
 0x644   : > { %v3658_v21 = vrot.slane %v3500_v59, %v6276_v28  ;;  %v3503_v30 = vadd.f32 %v6271_v5, %v3460_v3 }
 0x646   : > { %v3659_v41 = vsel %vm3550_vm9, %v3658_v21, %v3654_v35  ;;  %v3672_v34 = vrot.slane %v3503_v30, %v6282_v17 }
 0x647   : > { %v3463_v25 = vpop.xlane.xlu0 %3462  ;;  %v3466_v19 = vpop.xlane.xlu1 %3465  ;;  %v3697_v61 = vsel %vm2480_vm4, %v3659_v41, %v3696_v39 }
 0x648   : > { %v3504_v60 = vadd.f32 %v6271_v5, %v3463_v25  ;;  %v3505_v10 = vadd.f32 %v6271_v5, %v3466_v19  ;;  %v3698_v24 = vsel %vm2482_vm5, %v3668_v53, %v3697_v61 }
 0x64a   : > { %v3676_v12 = vrot.slane %v3504_v60, %v6276_v28  ;;  %v3681_v29 = vrot.slane %v3505_v10, %v6282_v17 }
 0x64b   : > { %v3469_v55 = vpop.xlane.xlu0 %3468 }
 0x64c   : > { %v3506_v23 = vadd.f32 %v6271_v5, %v3469_v55  ;;  %v3677_v14 = vsel %vm3550_vm9, %v3676_v12, %v3672_v34 }
 0x64d   : > { %v3699_v48 = vsel %vm2484_vm6, %v3677_v14, %v3698_v24 }
 0x64e   : > { %v3685_v33 = vrot.slane %v3506_v23, %v6276_v28 }
 0x650   : > { %v3686_v40 = vsel %vm3550_vm9, %v3685_v33, %v3681_v29 }
 0x651   : > { %v3700_v6 = vsel %vm2486_vm7, %v3686_v40, %v3699_v48 }
 0x652   : > { %3705 = vst.msk [vmem:[%s6325_s24 + $0x8] sm:$0xff] %vm3703_vm10, %v3700_v6 }
 0x653 PF: > { %s6455_s21 = sld [smem:[#allocation5_spill]]  ;;  %p22_p2 = scmp.ge.s32.totalorder %s4661_s22, 4  }
 0x654   : > { %s6456_s17 = smov %s4564_s18  ;;  %s6457_s18 = smov %s4568_s19 }
 0x655   : > { %s6459_s20 = smov %s4661_s22  ;;  %24 = sbr.rel (!%p22_p2) target bundleno = 3 (0x3), region = 123 }
 0x659   : > { %s6458_s19 = smov %s6455_s21 }
 0x65a   :  { %3745 = vsyncpa [#allocation3], 1 }
 0x65b   :  { %3747 = vsyncpa [#allocation3 + $0x1], 1 }

</bundles_post_ra>
